<compile_context>
chip_gen: v7x
topology: tpu7x:2x2x1
jax: 0.10.0
libtpu: 0.0.40
codegen_flags: <defaults>
</compile_context>

<pallas_src>
import functools

import jax
import jax.numpy as jnp
from jax.experimental import pallas as pl
from jax.experimental.pallas import tpu as pltpu


def _round_up(x, m):
    return ((x + m - 1) // m) * m


def _lane_pad(c):
    # Minor-most dim lives on the 128-wide lane axis in VMEM (padded layout).
    return _round_up(c, 128)


def edge_model_kernel(src_ref, dest_ref, edge_ref,
                      w1s_ref, w1d_ref, w1e_ref, b1_ref,
                      w2_ref, b2_ref,
                      out_ref):
    # Upcast the streamed tiles (possibly bf16) to f32 for compute.
    s = src_ref[...].astype(jnp.float32)
    d = dest_ref[...].astype(jnp.float32)
    e = edge_ref[...].astype(jnp.float32)

    # Hidden layer: cat([s, d, e]) @ W1 expressed concat-free as three MXU
    # dots against the row-split pieces of W1, all accumulated in f32.
    h = jnp.dot(s, w1s_ref[...], preferred_element_type=jnp.float32)
    h = h + jnp.dot(d, w1d_ref[...], preferred_element_type=jnp.float32)
    h = h + jnp.dot(e, w1e_ref[...], preferred_element_type=jnp.float32)
    h = jnp.maximum(h + b1_ref[...], 0.0)

    # Output layer + residual (edge_out == edge_in) in f32; cast only at store.
    y = jnp.dot(h, w2_ref[...], preferred_element_type=jnp.float32) + b2_ref[...]
    out_ref[...] = (y + e).astype(out_ref.dtype)


@functools.partial(jax.jit, static_argnames=("block_e",))
def edge_model_forward(src, dest, edge_attr, w1, b1, w2, b2, *, block_e=4096):
    E, node_in = src.shape
    edge_in = edge_attr.shape[1]
    in_feats, hidden = w1.shape
    edge_out = w2.shape[1]
    if in_feats != 2 * node_in + edge_in:
        raise ValueError("w1 must have 2*node_in + edge_in input rows")
    if edge_in != edge_out:
        raise ValueError("residual connection requires edge_in == edge_out")
    if block_e % 8 != 0:
        raise ValueError("block_e must be a multiple of 8 (sublane)")

    b1 = b1.reshape(1, hidden)
    b2 = b2.reshape(1, edge_out)

    # Split W1 row-wise (static slices, free) to avoid an in-kernel concat.
    w1_src = w1[:node_in]
    w1_dst = w1[node_in:2 * node_in]
    w1_edge = w1[2 * node_in:]

    io_bytes = src.dtype.itemsize
    out_dtype = edge_attr.dtype

    def vmem_need(be):
        # Double-buffered streamed tiles (lane-padded VMEM layouts).
        stream_cols = 2 * _lane_pad(node_in) + _lane_pad(edge_in) + _lane_pad(edge_out)
        stream = 2 * be * stream_cols * max(io_bytes, out_dtype.itemsize)
        # f32 intermediates (upcasts + hidden + pre-store output).
        interm_cols = (2 * _lane_pad(node_in) + _lane_pad(edge_in)
                       + _lane_pad(hidden) + _lane_pad(edge_out))
        interm = be * interm_cols * 4
        weights = 2 * 4 * (w1.size + b1.size + w2.size + b2.size)
        return stream + interm + weights

    # Biggest tile that fits the VMEM budget (memory-bound kernel: large tiles
    # amortize the ~0.35 us per-grid-step overhead).  No explicit padding; the
    # cdiv grid lets Pallas clip the boundary block's DMAs.
    block_e_eff = min(block_e, _round_up(E, 8))
    while vmem_need(block_e_eff) > (40 << 20) and block_e_eff > 512:
        block_e_eff = _round_up(block_e_eff // 2, 8)

    grid = (pl.cdiv(E, block_e_eff),)
    vmem_limit = min(int(vmem_need(block_e_eff)) + (8 << 20), 64 << 20)

    def row_spec(feat):
        return pl.BlockSpec((block_e_eff, feat), lambda i: (i, 0))

    def full_spec(r, c):
        return pl.BlockSpec((r, c), lambda i: (0, 0))

    flops = 2 * E * (in_feats * hidden + hidden * edge_out)
    bytes_accessed = (E * (2 * node_in + edge_in) * io_bytes
                      + E * edge_out * out_dtype.itemsize
                      + 4 * (w1.size + b1.size + w2.size + b2.size))

    return pl.pallas_call(
        edge_model_kernel,
        out_shape=jax.ShapeDtypeStruct((E, edge_out), out_dtype),
        grid_spec=pltpu.PrefetchScalarGridSpec(
            num_scalar_prefetch=0,
            grid=grid,
            in_specs=[
                row_spec(node_in),            # src       [E, node_in]
                row_spec(node_in),            # dest      [E, node_in]
                row_spec(edge_in),            # edge_attr [E, edge_in]
                full_spec(*w1_src.shape),     # W1_src    [node_in, hidden]
                full_spec(*w1_dst.shape),     # W1_dest   [node_in, hidden]
                full_spec(*w1_edge.shape),    # W1_edge   [edge_in, hidden]
                full_spec(*b1.shape),         # b1        [1, hidden]
                full_spec(*w2.shape),         # W2        [hidden, edge_out]
                full_spec(*b2.shape),         # b2        [1, edge_out]
            ],
            out_specs=row_spec(edge_out),
        ),
        compiler_params=pltpu.CompilerParams(
            dimension_semantics=("parallel",),
            vmem_limit_bytes=vmem_limit),
        cost_estimate=pl.CostEstimate(
            flops=flops, transcendentals=0, bytes_accessed=int(bytes_accessed)),
    )(src, dest, edge_attr, w1_src, w1_dst, w1_edge, b1, w2, b2)


def _ref_forward(src, dest, edge_attr, w1, b1, w2, b2):
    x = jnp.concatenate([src, dest, edge_attr], axis=1)
    h = jnp.maximum(x @ w1 + b1, 0.0)
    y = h @ w2 + b2
    return y + edge_attr


if __name__ == "__main__":
    # Small shapes consistent with the module.  E deliberately not a tile
    # multiple to exercise the clipped-boundary-block path.
    E = 1000
    node_in = 16
    edge_in = edge_out = 32      # residuals=True requires edge_in == edge_out
    hidden = 64
    in_feats = 2 * node_in + edge_in

    key = jax.random.PRNGKey(0)
    k_src, k_dst, k_edge, k_w1, k_b1, k_w2, k_b2 = jax.random.split(key, 7)

    src = jax.random.normal(k_src, (E, node_in), dtype=jnp.float32)
    dest = jax.random.normal(k_dst, (E, node_in), dtype=jnp.float32)
    edge_attr = jax.random.normal(k_edge, (E, edge_in), dtype=jnp.float32)

    # PyTorch Linear default init (uniform(-1/sqrt(fan_in), 1/sqrt(fan_in))),
    # stored as [in, out] so the kernel computes x @ W.
    bound1 = 1.0 / (in_feats ** 0.5)
    w1 = jax.random.uniform(k_w1, (in_feats, hidden), jnp.float32, -bound1, bound1)
    b1 = jax.random.uniform(k_b1, (1, hidden), jnp.float32, -bound1, bound1)
    bound2 = 1.0 / (hidden ** 0.5)
    w2 = jax.random.uniform(k_w2, (hidden, edge_out), jnp.float32, -bound2, bound2)
    b2 = jax.random.uniform(k_b2, (1, edge_out), jnp.float32, -bound2, bound2)

    ref = _ref_forward(src, dest, edge_attr, w1, b1, w2, b2)

    # 1) f32 I/O, single (partial) tile — strict tolerance.
    out1 = jax.block_until_ready(
        edge_model_forward(src, dest, edge_attr, w1, b1, w2, b2))
    assert out1.shape == (E, edge_out) and out1.dtype == jnp.float32
    assert jnp.allclose(out1, ref, atol=1e-5, rtol=1e-5)

    # 2) f32 I/O, small tile -> multi-step grid with a partial trailing block.
    out2 = jax.block_until_ready(
        edge_model_forward(src, dest, edge_attr, w1, b1, w2, b2, block_e=256))
    assert jnp.allclose(out2, ref, atol=1e-5, rtol=1e-5)

    # 3) bf16 activations in / bf16 out (weights f32, compute stays f32 in-kernel).
    src_b = src.astype(jnp.bfloat16)
    dest_b = dest.astype(jnp.bfloat16)
    edge_b = edge_attr.astype(jnp.bfloat16)
    out3 = jax.block_until_ready(
        edge_model_forward(src_b, dest_b, edge_b, w1, b1, w2, b2))
    ref_b = _ref_forward(src_b.astype(jnp.float32), dest_b.astype(jnp.float32),
                         edge_b.astype(jnp.float32), w1, b1, w2, b2)
    assert out3.dtype == jnp.bfloat16
    assert jnp.allclose(out3.astype(jnp.float32), ref_b, atol=2e-2, rtol=2e-2)

    print("KERNEL_OK")
</pallas_src>

<mosaic_0001>
module attributes {stable_mosaic.version = 11 : i64} {
  func.func @edge_model_kernel(%arg0: i32, %arg1: memref<1000x16xf32, #tpu.memory_space<vmem>>, %arg2: memref<1000x16xf32, #tpu.memory_space<vmem>>, %arg3: memref<1000x32xf32, #tpu.memory_space<vmem>>, %arg4: memref<16x64xf32, #tpu.memory_space<vmem>>, %arg5: memref<16x64xf32, #tpu.memory_space<vmem>>, %arg6: memref<32x64xf32, #tpu.memory_space<vmem>>, %arg7: memref<1x64xf32, #tpu.memory_space<vmem>>, %arg8: memref<64x32xf32, #tpu.memory_space<vmem>>, %arg9: memref<1x32xf32, #tpu.memory_space<vmem>>, %arg10: memref<1000x32xf32, #tpu.memory_space<vmem>>) attributes {dimension_semantics = [#tpu.dimension_semantics<parallel>], iteration_bounds = array<i64: 1>, scalar_prefetch = 0 : i64, scratch_operands = 0 : i64, tpu.core_type = #tpu.core_type<tc>, window_params = [{transform_indices = @transform_0, window_bounds = array<i64: 1000, 16>}, {transform_indices = @transform_1, window_bounds = array<i64: 1000, 16>}, {transform_indices = @transform_2, window_bounds = array<i64: 1000, 32>}, {pipeline_mode = #tpu.pipeline_mode<synchronous>, transform_indices = @transform_3, window_bounds = array<i64: 16, 64>}, {pipeline_mode = #tpu.pipeline_mode<synchronous>, transform_indices = @transform_4, window_bounds = array<i64: 16, 64>}, {pipeline_mode = #tpu.pipeline_mode<synchronous>, transform_indices = @transform_5, window_bounds = array<i64: 32, 64>}, {pipeline_mode = #tpu.pipeline_mode<synchronous>, transform_indices = @transform_6, window_bounds = array<i64: 1, 64>}, {pipeline_mode = #tpu.pipeline_mode<synchronous>, transform_indices = @transform_7, window_bounds = array<i64: 64, 32>}, {pipeline_mode = #tpu.pipeline_mode<synchronous>, transform_indices = @transform_8, window_bounds = array<i64: 1, 32>}, {transform_indices = @transform_9, window_bounds = array<i64: 1000, 32>}]} {
    %c0 = arith.constant 0 : index
    %c0_0 = arith.constant 0 : index
    %0 = vector.load %arg1[%c0, %c0_0] : memref<1000x16xf32, #tpu.memory_space<vmem>>, vector<1000x16xf32>
    %c0_1 = arith.constant 0 : index
    %c0_2 = arith.constant 0 : index
    %1 = vector.load %arg2[%c0_1, %c0_2] : memref<1000x16xf32, #tpu.memory_space<vmem>>, vector<1000x16xf32>
    %c0_3 = arith.constant 0 : index
    %c0_4 = arith.constant 0 : index
    %2 = vector.load %arg3[%c0_3, %c0_4] : memref<1000x32xf32, #tpu.memory_space<vmem>>, vector<1000x32xf32>
    %c0_5 = arith.constant 0 : index
    %c0_6 = arith.constant 0 : index
    %3 = vector.load %arg4[%c0_5, %c0_6] : memref<16x64xf32, #tpu.memory_space<vmem>>, vector<16x64xf32>
    %cst = arith.constant dense<0.000000e+00> : vector<1000x64xf32>
    %4 = tpu.matmul %0, %3, %cst {dimension_numbers = #tpu.dot_dimension_numbers<[1], [0], [0], [1], [0, 0, 1, 1], [], []>} : vector<1000x16xf32>, vector<16x64xf32>, vector<1000x64xf32> -> vector<1000x64xf32>
    %c0_7 = arith.constant 0 : index
    %c0_8 = arith.constant 0 : index
    %5 = vector.load %arg5[%c0_7, %c0_8] : memref<16x64xf32, #tpu.memory_space<vmem>>, vector<16x64xf32>
    %cst_9 = arith.constant dense<0.000000e+00> : vector<1000x64xf32>
    %6 = tpu.matmul %1, %5, %cst_9 {dimension_numbers = #tpu.dot_dimension_numbers<[1], [0], [0], [1], [0, 0, 1, 1], [], []>} : vector<1000x16xf32>, vector<16x64xf32>, vector<1000x64xf32> -> vector<1000x64xf32>
    %7 = arith.addf %4, %6 : vector<1000x64xf32>
    %c0_10 = arith.constant 0 : index
    %c0_11 = arith.constant 0 : index
    %8 = vector.load %arg6[%c0_10, %c0_11] : memref<32x64xf32, #tpu.memory_space<vmem>>, vector<32x64xf32>
    %cst_12 = arith.constant dense<0.000000e+00> : vector<1000x64xf32>
    %9 = tpu.matmul %2, %8, %cst_12 {dimension_numbers = #tpu.dot_dimension_numbers<[1], [0], [0], [1], [0, 0, 1, 1], [], []>} : vector<1000x32xf32>, vector<32x64xf32>, vector<1000x64xf32> -> vector<1000x64xf32>
    %10 = arith.addf %7, %9 : vector<1000x64xf32>
    %c0_13 = arith.constant 0 : index
    %c0_14 = arith.constant 0 : index
    %11 = vector.load %arg7[%c0_13, %c0_14] : memref<1x64xf32, #tpu.memory_space<vmem>>, vector<1x64xf32>
    %12 = vector.broadcast %11 : vector<1x64xf32> to vector<1000x64xf32>
    %13 = arith.addf %10, %12 : vector<1000x64xf32>
    %cst_15 = arith.constant 0.000000e+00 : f32
    %14 = vector.broadcast %cst_15 : f32 to vector<1000x64xf32>
    %15 = arith.maximumf %13, %14 : vector<1000x64xf32>
    %c0_16 = arith.constant 0 : index
    %c0_17 = arith.constant 0 : index
    %16 = vector.load %arg8[%c0_16, %c0_17] : memref<64x32xf32, #tpu.memory_space<vmem>>, vector<64x32xf32>
    %cst_18 = arith.constant dense<0.000000e+00> : vector<1000x32xf32>
    %17 = tpu.matmul %15, %16, %cst_18 {dimension_numbers = #tpu.dot_dimension_numbers<[1], [0], [0], [1], [0, 0, 1, 1], [], []>} : vector<1000x64xf32>, vector<64x32xf32>, vector<1000x32xf32> -> vector<1000x32xf32>
    %c0_19 = arith.constant 0 : index
    %c0_20 = arith.constant 0 : index
    %18 = vector.load %arg9[%c0_19, %c0_20] : memref<1x32xf32, #tpu.memory_space<vmem>>, vector<1x32xf32>
    %19 = vector.broadcast %18 : vector<1x32xf32> to vector<1000x32xf32>
    %20 = arith.addf %17, %19 : vector<1000x32xf32>
    %21 = arith.addf %20, %2 : vector<1000x32xf32>
    %c0_21 = arith.constant 0 : index
    %c0_22 = arith.constant 0 : index
    %22 = vector.load %arg10[%c0_21, %c0_22] : memref<1000x32xf32, #tpu.memory_space<vmem>>, vector<1000x32xf32>
    tpu.vector_store %arg10[%c0_21, %c0_22], %21 {strides = array<i32>} : memref<1000x32xf32, #tpu.memory_space<vmem>>, vector<1000x32xf32>,
    return
  }
  func.func @transform_0(%arg0: i32) -> (i32, i32) {
    %c0_i32 = arith.constant 0 : i32
    %c0_i32_0 = arith.constant 0 : i32
    return %arg0, %c0_i32 : i32, i32
  }
  func.func @transform_1(%arg0: i32) -> (i32, i32) {
    %c0_i32 = arith.constant 0 : i32
    %c0_i32_0 = arith.constant 0 : i32
    return %arg0, %c0_i32 : i32, i32
  }
  func.func @transform_2(%arg0: i32) -> (i32, i32) {
    %c0_i32 = arith.constant 0 : i32
    %c0_i32_0 = arith.constant 0 : i32
    return %arg0, %c0_i32 : i32, i32
  }
  func.func @transform_3(%arg0: i32) -> (i32, i32) {
    %c0_i32 = arith.constant 0 : i32
    %c0_i32_0 = arith.constant 0 : i32
    %c0_i32_1 = arith.constant 0 : i32
    return %c0_i32, %c0_i32_0 : i32, i32
  }
  func.func @transform_4(%arg0: i32) -> (i32, i32) {
    %c0_i32 = arith.constant 0 : i32
    %c0_i32_0 = arith.constant 0 : i32
    %c0_i32_1 = arith.constant 0 : i32
    return %c0_i32, %c0_i32_0 : i32, i32
  }
  func.func @transform_5(%arg0: i32) -> (i32, i32) {
    %c0_i32 = arith.constant 0 : i32
    %c0_i32_0 = arith.constant 0 : i32
    %c0_i32_1 = arith.constant 0 : i32
    return %c0_i32, %c0_i32_0 : i32, i32
  }
  func.func @transform_6(%arg0: i32) -> (i32, i32) {
    %c0_i32 = arith.constant 0 : i32
    %c0_i32_0 = arith.constant 0 : i32
    %c0_i32_1 = arith.constant 0 : i32
    return %c0_i32, %c0_i32_0 : i32, i32
  }
  func.func @transform_7(%arg0: i32) -> (i32, i32) {
    %c0_i32 = arith.constant 0 : i32
    %c0_i32_0 = arith.constant 0 : i32
    %c0_i32_1 = arith.constant 0 : i32
    return %c0_i32, %c0_i32_0 : i32, i32
  }
  func.func @transform_8(%arg0: i32) -> (i32, i32) {
    %c0_i32 = arith.constant 0 : i32
    %c0_i32_0 = arith.constant 0 : i32
    %c0_i32_1 = arith.constant 0 : i32
    return %c0_i32, %c0_i32_0 : i32, i32
  }
  func.func @transform_9(%arg0: i32) -> (i32, i32) {
    %c0_i32 = arith.constant 0 : i32
    %c0_i32_0 = arith.constant 0 : i32
    return %arg0, %c0_i32 : i32, i32
  }
}

</mosaic_0001>

<bundles_post_ra>
// kernel: edge_model_forward.1
= control target key start
LH: loop header
LB: loop body
LE: loop exit
PB: predicated region body
PF: predicated region fallthrough
CT: control target
= control target key end

     0   :  { %v8035_v0 = vmov 0.0|0.0   ;;  %vm8036_vm0 = vmmov 0   ;;  %v8037_v6 = vmov 0.0   ;;  %vm411_vm1 = vcmask 130048   ;;  %s12299_s4 = inlined_call_operand.vmem [shape: f32[16,64], index: 4, kind: input, shape index: {}]   ;;  %s12300_s3 = inlined_call_operand.vmem [shape: f32[16,64], index: 3, kind: input, shape index: {}]   ;;  %s12301_s5 = inlined_call_operand.vmem [shape: f32[32,64], index: 5, kind: input, shape index: {}]   ;;  %s12302_s1 = inlined_call_operand.vmem [shape: f32[1000,16], index: 1, kind: input, shape index: {}]   ;;  %s12303_s0 = inlined_call_operand.vmem [shape: f32[1000,16], index: 0, kind: input, shape index: {}]   ;;  %s12304_s7 = inlined_call_operand.vmem [shape: f32[64,32], index: 7, kind: input, shape index: {}]   ;;  %s12305_s2 = inlined_call_operand.vmem [shape: f32[1000,32], index: 2, kind: input, shape index: {}]   ;;  %s12306_s6 = inlined_call_operand.vmem [shape: f32[1,64], index: 6, kind: input, shape index: {}]   ;;  %s12307_s8 = inlined_call_operand.vmem [shape: f32[1,32], index: 8, kind: input, shape index: {}]   ;;  %s12308_s9 = inlined_call_operand.vmem [shape: f32[1000,32], index: 9, kind: output, shape index: {}]  }
   0x1   :  { %7879 = vmatprep.subr.bf16.mxu0 %v8035_v0  ;;  %v409_v1 = vld [vmem:[%s12299_s4] sm:$0xff]  ;;  %v410_v2 = vld [vmem:[%s12299_s4 + $0x8] sm:$0xff]  ;;  %7882 = vmatprep.subr.bf16.mxu1 %v8035_v0  ;;  %v159_v15 = vld [vmem:[%s12302_s1 + $0x10] sm:$0xff]  ;;  %vm2546_vm2 = vcmask 261120   ;;  %vm4009_vm3 = vcmask 523264  }
   0x2   :  { %v407_v3 = vld [vmem:[%s12300_s3] sm:$0xff]  ;;  %v7880_v4 = vpack.c.bf16 %v410_v2, %v409_v1  ;;  %v408_v5 = vld [vmem:[%s12300_s3 + $0x8] sm:$0xff]  ;;  %6351 = vmatprep.mubr.msk.f32.mxu0 %vm8036_vm0, %v8037_v6  ;;  %6730 = vmatprep.mubr.msk.f32.mxu1 %vm8036_vm0, %v8037_v6  ;;  %v34_v16 = vld [vmem:[%s12303_s0 + $0x10] sm:$0xff] }
   0x3   :  { %v7883_v7 = vpack.c.bf16 %v408_v5, %v407_v3  ;;  %v2542_v8 = vld [vmem:[%s12301_s5] sm:$0xff]  ;;  %v2543_v9 = vld [vmem:[%s12301_s5 + $0x8] sm:$0xff]  ;;  %v160_v17 = vld [vmem:[%s12302_s1 + $0x18] sm:$0xff] }
   0x4   :  { %7881 = vmatpush3.bf16.msra.mxu0 %v7880_v4  ;;  %v157_v10 = vld [vmem:[%s12302_s1] sm:$0xff]  ;;  %v7886_v11 = vpack.c.bf16 %v2543_v9, %v2542_v8  ;;  %v158_v13 = vld [vmem:[%s12302_s1 + $0x8] sm:$0xff]  ;;  %v35_v18 = vld [vmem:[%s12303_s0 + $0x18] sm:$0xff] }
   0x5   :  { %7884 = vmatpush3.bf16.msra.mxu1 %v7883_v7  ;;  %7885 = vmatprep.subr.bf16.mxu0 %v8035_v0  ;;  %v32_v12 = vld [vmem:[%s12303_s0] sm:$0xff]  ;;  %v33_v14 = vld [vmem:[%s12303_s0 + $0x8] sm:$0xff]  ;;  %v163_v23 = vld [vmem:[%s12302_s1 + $0x30] sm:$0xff] }
   0x6   :  { %7891 = vmatprep.subr.bf16.mxu1 %v8035_v0  ;;  %v161_v19 = vld [vmem:[%s12302_s1 + $0x20] sm:$0xff]  ;;  %v162_v21 = vld [vmem:[%s12302_s1 + $0x28] sm:$0xff]  ;;  %v38_v24 = vld [vmem:[%s12303_s0 + $0x30] sm:$0xff] }
   0x7   :  { %6352 = vmatmul.mubr.msk.f32.vlgmr.msra.gmra.mrb[0].mxu0 %vm411_vm1, %v157_v10  ;;  %v36_v20 = vld [vmem:[%s12303_s0 + $0x20] sm:$0xff]  ;;  %v37_v22 = vld [vmem:[%s12303_s0 + $0x28] sm:$0xff]  ;;  %v164_v25 = vld [vmem:[%s12302_s1 + $0x38] sm:$0xff] }
   0x8   :  { %6731 = vmatmul.mubr.msk.f32.vlgmr.msra.gmra.mrb[0].mxu1 %vm411_vm1, %v32_v12  ;;  %7887 = vmatpush3.bf16.msra.mxu0 %v7886_v11  ;;  %v39_v26 = vld [vmem:[%s12303_s0 + $0x38] sm:$0xff]  ;;  %v165_v27 = vld [vmem:[%s12302_s1 + $0x40] sm:$0xff]  ;;  %v166_v29 = vld [vmem:[%s12302_s1 + $0x48] sm:$0xff] }
   0x9   :  { %6354 = vmatprep.mubr.msk.f32.mxu0 %vm8036_vm0, %v8037_v6  ;;  %6733 = vmatprep.mubr.msk.f32.mxu1 %vm8036_vm0, %v8037_v6  ;;  %v40_v28 = vld [vmem:[%s12303_s0 + $0x40] sm:$0xff]  ;;  %v41_v30 = vld [vmem:[%s12303_s0 + $0x48] sm:$0xff]  ;;  %v167_v31 = vld [vmem:[%s12302_s1 + $0x50] sm:$0xff] }
   0xa   :  { %7888 = vmatprep.subr.bf16.mxu0 %v8035_v0  ;;  %v42_v32 = vld [vmem:[%s12303_s0 + $0x50] sm:$0xff]  ;;  %v168_v33 = vld [vmem:[%s12302_s1 + $0x58] sm:$0xff]  ;;  %v169_v35 = vld [vmem:[%s12302_s1 + $0x60] sm:$0xff] }
   0xb   :  { %6355 = vmatmul.mubr.msk.f32.gmra.mrb[2].mxu0 %vm411_vm1, %v158_v13  ;;  %v43_v34 = vld [vmem:[%s12303_s0 + $0x58] sm:$0xff]  ;;  %v44_v36 = vld [vmem:[%s12303_s0 + $0x60] sm:$0xff]  ;;  %v170_v37 = vld [vmem:[%s12302_s1 + $0x68] sm:$0xff] }
   0xc   :  { %6734 = vmatmul.mubr.msk.f32.gmra.mrb[2].mxu1 %vm411_vm1, %v33_v14  ;;  %6357 = vmatprep.mubr.msk.f32.mxu0 %vm8036_vm0, %v8037_v6  ;;  %v45_v38 = vld [vmem:[%s12303_s0 + $0x68] sm:$0xff]  ;;  %v171_v39 = vld [vmem:[%s12302_s1 + $0x70] sm:$0xff]  ;;  %v172_v41 = vld [vmem:[%s12302_s1 + $0x78] sm:$0xff] }
   0xd   :  { %6736 = vmatprep.mubr.msk.f32.mxu1 %vm8036_vm0, %v8037_v6  ;;  %v46_v40 = vld [vmem:[%s12303_s0 + $0x70] sm:$0xff]  ;;  %v47_v42 = vld [vmem:[%s12303_s0 + $0x78] sm:$0xff]  ;;  %v173_v43 = vld [vmem:[%s12302_s1 + $0x80] sm:$0xff] }
   0xe   :  { %v48_v44 = vld [vmem:[%s12303_s0 + $0x80] sm:$0xff]  ;;  %v174_v45 = vld [vmem:[%s12302_s1 + $0x88] sm:$0xff]  ;;  %v175_v47 = vld [vmem:[%s12302_s1 + $0x90] sm:$0xff] }
   0xf   :  { %6358 = vmatmul.mubr.msk.f32.gmra.mrb[4].mxu0 %vm411_vm1, %v159_v15  ;;  %v49_v46 = vld [vmem:[%s12303_s0 + $0x88] sm:$0xff]  ;;  %v50_v48 = vld [vmem:[%s12303_s0 + $0x90] sm:$0xff]  ;;  %v176_v49 = vld [vmem:[%s12302_s1 + $0x98] sm:$0xff] }
  0x10   :  { %6737 = vmatmul.mubr.msk.f32.gmra.mrb[4].mxu1 %vm411_vm1, %v34_v16  ;;  %6360 = vmatprep.mubr.msk.f32.mxu0 %vm8036_vm0, %v8037_v6  ;;  %v51_v50 = vld [vmem:[%s12303_s0 + $0x98] sm:$0xff]  ;;  %v177_v51 = vld [vmem:[%s12302_s1 + $0xa0] sm:$0xff]  ;;  %v178_v53 = vld [vmem:[%s12302_s1 + $0xa8] sm:$0xff] }
  0x11   :  { %6739 = vmatprep.mubr.msk.f32.mxu1 %vm8036_vm0, %v8037_v6  ;;  %v52_v52 = vld [vmem:[%s12303_s0 + $0xa0] sm:$0xff]  ;;  %v53_v54 = vld [vmem:[%s12303_s0 + $0xa8] sm:$0xff]  ;;  %v179_v55 = vld [vmem:[%s12302_s1 + $0xb0] sm:$0xff] }
  0x12   :  { %v54_v56 = vld [vmem:[%s12303_s0 + $0xb0] sm:$0xff]  ;;  %v180_v57 = vld [vmem:[%s12302_s1 + $0xb8] sm:$0xff]  ;;  %v3994_v59 = vld [vmem:[%s12304_s7] sm:$0xff] }
  0x13   :  { %6361 = vmatmul.mubr.msk.f32.gmra.mrb[6].mxu0 %vm411_vm1, %v160_v17  ;;  %v55_v58 = vld [vmem:[%s12303_s0 + $0xb8] sm:$0xff]  ;;  %v3995_v60 = vld [vmem:[%s12304_s7 + $0x8] sm:$0xff]  ;;  %v181_v61 = vld [vmem:[%s12302_s1 + $0xc0] sm:$0xff] }
  0x14   :  { %6740 = vmatmul.mubr.msk.f32.gmra.mrb[6].mxu1 %vm411_vm1, %v35_v18  ;;  %6363 = vmatprep.mubr.msk.f32.mxu0 %vm8036_vm0, %v8037_v6  ;;  %v7892_v62 = vpack.c.bf16 %v3995_v60, %v3994_v59  ;;  %v56_v63 = vld [vmem:[%s12303_s0 + $0xc0] sm:$0xff]  ;;  %v182_v1 = vld [vmem:[%s12302_s1 + $0xc8] sm:$0xff]  ;;  %v183_v3 = vld [vmem:[%s12302_s1 + $0xd0] sm:$0xff] }
  0x15   :  { %6742 = vmatprep.mubr.msk.f32.mxu1 %vm8036_vm0, %v8037_v6  ;;  %v57_v2 = vld [vmem:[%s12303_s0 + $0xc8] sm:$0xff]  ;;  %v58_v4 = vld [vmem:[%s12303_s0 + $0xd0] sm:$0xff]  ;;  %v184_v5 = vld [vmem:[%s12302_s1 + $0xd8] sm:$0xff] }
  0x16   :  { %7893 = vmatpush3.bf16.msra.mxu1 %v7892_v62  ;;  %v59_v7 = vld [vmem:[%s12303_s0 + $0xd8] sm:$0xff]  ;;  %v185_v8 = vld [vmem:[%s12302_s1 + $0xe0] sm:$0xff]  ;;  %v186_v10 = vld [vmem:[%s12302_s1 + $0xe8] sm:$0xff] }
  0x17   :  { %6364 = vmatmul.mubr.msk.f32.gmra.mrb[8].mxu0 %vm411_vm1, %v161_v19  ;;  %7894 = vmatprep.subr.bf16.mxu1 %v8035_v0  ;;  %v60_v9 = vld [vmem:[%s12303_s0 + $0xe0] sm:$0xff]  ;;  %v61_v11 = vld [vmem:[%s12303_s0 + $0xe8] sm:$0xff]  ;;  %v187_v12 = vld [vmem:[%s12302_s1 + $0xf0] sm:$0xff] }
  0x18   :  { %6743 = vmatmul.mubr.msk.f32.gmra.mrb[8].mxu1 %vm411_vm1, %v36_v20  ;;  %6366 = vmatprep.mubr.msk.f32.mxu0 %vm8036_vm0, %v8037_v6  ;;  %v62_v13 = vld [vmem:[%s12303_s0 + $0xf0] sm:$0xff]  ;;  %v188_v14 = vld [vmem:[%s12302_s1 + $0xf8] sm:$0xff]  ;;  %v189_v19 = vld [vmem:[%s12302_s1 + $0x100] sm:$0xff] }
  0x19   :  { %6745 = vmatprep.mubr.msk.f32.mxu1 %vm8036_vm0, %v8037_v6  ;;  %v63_v15 = vld [vmem:[%s12303_s0 + $0xf8] sm:$0xff]  ;;  %v2544_v16 = vld [vmem:[%s12301_s5 + $0x10] sm:$0xff]  ;;  %v64_v20 = vld [vmem:[%s12303_s0 + $0x100] sm:$0xff] }
  0x1a   :  { %v2545_v17 = vld [vmem:[%s12301_s5 + $0x18] sm:$0xff]  ;;  %v209_v59 = vld [vmem:[%s12302_s1 + $0x1a0] sm:$0xff]  ;;  %v85_v62 = vld [vmem:[%s12303_s0 + $0x1a8] sm:$0xff] }
  0x1b   :  { %6367 = vmatmul.mubr.msk.f32.gmra.mrb[10].mxu0 %vm411_vm1, %v162_v21  ;;  %v7889_v18 = vpack.c.bf16 %v2545_v17, %v2544_v16  ;;  %v190_v21 = vld [vmem:[%s12302_s1 + $0x108] sm:$0xff]  ;;  %v84_v60 = vld [vmem:[%s12303_s0 + $0x1a0] sm:$0xff]  ;;  %v87_v17 = vld [vmem:[%s12303_s0 + $0x1b8] sm:$0xff] }
  0x1c   :  { %6746 = vmatmul.mubr.msk.f32.gmra.mrb[10].mxu1 %vm411_vm1, %v37_v22  ;;  %6369 = vmatprep.mubr.msk.f32.mxu0 %vm8036_vm0, %v8037_v6  ;;  %v65_v22 = vld [vmem:[%s12303_s0 + $0x108] sm:$0xff] }
  0x1d   :  { %6748 = vmatprep.mubr.msk.f32.mxu1 %vm8036_vm0, %v8037_v6  ;;  %7890 = vmatpush3.bf16.msra.mxu0 %v7889_v18 }
  0x1f   :  { %6370 = vmatmul.mubr.msk.f32.gmra.mrb[12].mxu0 %vm411_vm1, %v163_v23  ;;  %v191_v23 = vld [vmem:[%s12302_s1 + $0x110] sm:$0xff] }
  0x20   :  { %6749 = vmatmul.mubr.msk.f32.gmra.mrb[12].mxu1 %vm411_vm1, %v38_v24  ;;  %6372 = vmatprep.mubr.msk.f32.mxu0 %vm8036_vm0, %v8037_v6  ;;  %v66_v24 = vld [vmem:[%s12303_s0 + $0x110] sm:$0xff] }
  0x21   :  { %6751 = vmatprep.mubr.msk.f32.mxu1 %vm8036_vm0, %v8037_v6 }
  0x23   :  { %6373 = vmatmul.mubr.msk.f32.gmra.mrb[14].mxu0 %vm411_vm1, %v164_v25  ;;  %v192_v25 = vld [vmem:[%s12302_s1 + $0x118] sm:$0xff] }
  0x24   :  { %6752 = vmatmul.mubr.msk.f32.gmra.mrb[14].mxu1 %vm411_vm1, %v39_v26  ;;  %6375 = vmatprep.mubr.msk.f32.mxu0 %vm8036_vm0, %v8037_v6  ;;  %v67_v26 = vld [vmem:[%s12303_s0 + $0x118] sm:$0xff] }
  0x25   :  { %6754 = vmatprep.mubr.msk.f32.mxu1 %vm8036_vm0, %v8037_v6 }
  0x27   :  { %6376 = vmatmul.mubr.msk.f32.gmra.mrb[16].mxu0 %vm411_vm1, %v165_v27  ;;  %v193_v27 = vld [vmem:[%s12302_s1 + $0x120] sm:$0xff] }
  0x28   :  { %6755 = vmatmul.mubr.msk.f32.gmra.mrb[16].mxu1 %vm411_vm1, %v40_v28  ;;  %6378 = vmatprep.mubr.msk.f32.mxu0 %vm8036_vm0, %v8037_v6  ;;  %v68_v28 = vld [vmem:[%s12303_s0 + $0x120] sm:$0xff] }
  0x29   :  { %6757 = vmatprep.mubr.msk.f32.mxu1 %vm8036_vm0, %v8037_v6 }
  0x2b   :  { %6379 = vmatmul.mubr.msk.f32.gmra.mrb[18].mxu0 %vm411_vm1, %v166_v29  ;;  %v194_v29 = vld [vmem:[%s12302_s1 + $0x128] sm:$0xff] }
  0x2c   :  { %6758 = vmatmul.mubr.msk.f32.gmra.mrb[18].mxu1 %vm411_vm1, %v41_v30  ;;  %6381 = vmatprep.mubr.msk.f32.mxu0 %vm8036_vm0, %v8037_v6  ;;  %v69_v30 = vld [vmem:[%s12303_s0 + $0x128] sm:$0xff] }
  0x2d   :  { %6760 = vmatprep.mubr.msk.f32.mxu1 %vm8036_vm0, %v8037_v6 }
  0x2f   :  { %6382 = vmatmul.mubr.msk.f32.gmra.mrb[20].mxu0 %vm411_vm1, %v167_v31  ;;  %v195_v31 = vld [vmem:[%s12302_s1 + $0x130] sm:$0xff] }
  0x30   :  { %6761 = vmatmul.mubr.msk.f32.gmra.mrb[20].mxu1 %vm411_vm1, %v42_v32  ;;  %6384 = vmatprep.mubr.msk.f32.mxu0 %vm8036_vm0, %v8037_v6  ;;  %v70_v32 = vld [vmem:[%s12303_s0 + $0x130] sm:$0xff] }
  0x31   :  { %6763 = vmatprep.mubr.msk.f32.mxu1 %vm8036_vm0, %v8037_v6 }
  0x33   :  { %6385 = vmatmul.mubr.msk.f32.gmra.mrb[22].mxu0 %vm411_vm1, %v168_v33  ;;  %v196_v33 = vld [vmem:[%s12302_s1 + $0x138] sm:$0xff] }
  0x34   :  { %6764 = vmatmul.mubr.msk.f32.gmra.mrb[22].mxu1 %vm411_vm1, %v43_v34  ;;  %6387 = vmatprep.mubr.msk.f32.mxu0 %vm8036_vm0, %v8037_v6  ;;  %v71_v34 = vld [vmem:[%s12303_s0 + $0x138] sm:$0xff] }
  0x35   :  { %6766 = vmatprep.mubr.msk.f32.mxu1 %vm8036_vm0, %v8037_v6 }
  0x37   :  { %6388 = vmatmul.mubr.msk.f32.gmra.mrb[24].mxu0 %vm411_vm1, %v169_v35  ;;  %v197_v35 = vld [vmem:[%s12302_s1 + $0x140] sm:$0xff] }
  0x38   :  { %6767 = vmatmul.mubr.msk.f32.gmra.mrb[24].mxu1 %vm411_vm1, %v44_v36  ;;  %6390 = vmatprep.mubr.msk.f32.mxu0 %vm8036_vm0, %v8037_v6  ;;  %v72_v36 = vld [vmem:[%s12303_s0 + $0x140] sm:$0xff] }
  0x39   :  { %6769 = vmatprep.mubr.msk.f32.mxu1 %vm8036_vm0, %v8037_v6 }
  0x3b   :  { %6391 = vmatmul.mubr.msk.f32.gmra.mrb[26].mxu0 %vm411_vm1, %v170_v37  ;;  %v198_v37 = vld [vmem:[%s12302_s1 + $0x148] sm:$0xff] }
  0x3c   :  { %6770 = vmatmul.mubr.msk.f32.gmra.mrb[26].mxu1 %vm411_vm1, %v45_v38  ;;  %6393 = vmatprep.mubr.msk.f32.mxu0 %vm8036_vm0, %v8037_v6  ;;  %v73_v38 = vld [vmem:[%s12303_s0 + $0x148] sm:$0xff] }
  0x3d   :  { %6772 = vmatprep.mubr.msk.f32.mxu1 %vm8036_vm0, %v8037_v6 }
  0x3f   :  { %6394 = vmatmul.mubr.msk.f32.gmra.mrb[28].mxu0 %vm411_vm1, %v171_v39  ;;  %v199_v39 = vld [vmem:[%s12302_s1 + $0x150] sm:$0xff] }
  0x40   :  { %6773 = vmatmul.mubr.msk.f32.gmra.mrb[28].mxu1 %vm411_vm1, %v46_v40  ;;  %6396 = vmatprep.mubr.msk.f32.mxu0 %vm8036_vm0, %v8037_v6  ;;  %v74_v40 = vld [vmem:[%s12303_s0 + $0x150] sm:$0xff] }
  0x41   :  { %6775 = vmatprep.mubr.msk.f32.mxu1 %vm8036_vm0, %v8037_v6 }
  0x43   :  { %6397 = vmatmul.mubr.msk.f32.gmra.mrb[30].mxu0 %vm411_vm1, %v172_v41  ;;  %v200_v41 = vld [vmem:[%s12302_s1 + $0x158] sm:$0xff] }
  0x44   :  { %6776 = vmatmul.mubr.msk.f32.gmra.mrb[30].mxu1 %vm411_vm1, %v47_v42  ;;  %6399 = vmatprep.mubr.msk.f32.mxu0 %vm8036_vm0, %v8037_v6  ;;  %v75_v42 = vld [vmem:[%s12303_s0 + $0x158] sm:$0xff] }
  0x45   :  { %6778 = vmatprep.mubr.msk.f32.mxu1 %vm8036_vm0, %v8037_v6 }
  0x47   :  { %6400 = vmatmul.mubr.msk.f32.gmra.mrb[32].mxu0 %vm411_vm1, %v173_v43  ;;  %v201_v43 = vld [vmem:[%s12302_s1 + $0x160] sm:$0xff] }
  0x48   :  { %6779 = vmatmul.mubr.msk.f32.gmra.mrb[32].mxu1 %vm411_vm1, %v48_v44  ;;  %6402 = vmatprep.mubr.msk.f32.mxu0 %vm8036_vm0, %v8037_v6  ;;  %v76_v44 = vld [vmem:[%s12303_s0 + $0x160] sm:$0xff] }
  0x49   :  { %6781 = vmatprep.mubr.msk.f32.mxu1 %vm8036_vm0, %v8037_v6 }
  0x4b   :  { %6403 = vmatmul.mubr.msk.f32.gmra.mrb[34].mxu0 %vm411_vm1, %v174_v45  ;;  %v202_v45 = vld [vmem:[%s12302_s1 + $0x168] sm:$0xff] }
  0x4c   :  { %6782 = vmatmul.mubr.msk.f32.gmra.mrb[34].mxu1 %vm411_vm1, %v49_v46  ;;  %6405 = vmatprep.mubr.msk.f32.mxu0 %vm8036_vm0, %v8037_v6  ;;  %v77_v46 = vld [vmem:[%s12303_s0 + $0x168] sm:$0xff] }
  0x4d   :  { %6784 = vmatprep.mubr.msk.f32.mxu1 %vm8036_vm0, %v8037_v6 }
  0x4f   :  { %6406 = vmatmul.mubr.msk.f32.gmra.mrb[36].mxu0 %vm411_vm1, %v175_v47  ;;  %v203_v47 = vld [vmem:[%s12302_s1 + $0x170] sm:$0xff] }
  0x50   :  { %6785 = vmatmul.mubr.msk.f32.gmra.mrb[36].mxu1 %vm411_vm1, %v50_v48  ;;  %6408 = vmatprep.mubr.msk.f32.mxu0 %vm8036_vm0, %v8037_v6  ;;  %v78_v48 = vld [vmem:[%s12303_s0 + $0x170] sm:$0xff] }
  0x51   :  { %6787 = vmatprep.mubr.msk.f32.mxu1 %vm8036_vm0, %v8037_v6 }
  0x53   :  { %6409 = vmatmul.mubr.msk.f32.gmra.mrb[38].mxu0 %vm411_vm1, %v176_v49  ;;  %v204_v49 = vld [vmem:[%s12302_s1 + $0x178] sm:$0xff] }
  0x54   :  { %6788 = vmatmul.mubr.msk.f32.gmra.mrb[38].mxu1 %vm411_vm1, %v51_v50  ;;  %6411 = vmatprep.mubr.msk.f32.mxu0 %vm8036_vm0, %v8037_v6  ;;  %v79_v50 = vld [vmem:[%s12303_s0 + $0x178] sm:$0xff] }
  0x55   :  { %6790 = vmatprep.mubr.msk.f32.mxu1 %vm8036_vm0, %v8037_v6 }
  0x57   :  { %6412 = vmatmul.mubr.msk.f32.gmra.mrb[40].mxu0 %vm411_vm1, %v177_v51  ;;  %v205_v51 = vld [vmem:[%s12302_s1 + $0x180] sm:$0xff] }
  0x58   :  { %6791 = vmatmul.mubr.msk.f32.gmra.mrb[40].mxu1 %vm411_vm1, %v52_v52  ;;  %6414 = vmatprep.mubr.msk.f32.mxu0 %vm8036_vm0, %v8037_v6  ;;  %v80_v52 = vld [vmem:[%s12303_s0 + $0x180] sm:$0xff] }
  0x59   :  { %6793 = vmatprep.mubr.msk.f32.mxu1 %vm8036_vm0, %v8037_v6 }
  0x5b   :  { %6415 = vmatmul.mubr.msk.f32.gmra.mrb[42].mxu0 %vm411_vm1, %v178_v53  ;;  %v206_v53 = vld [vmem:[%s12302_s1 + $0x188] sm:$0xff] }
  0x5c   :  { %6794 = vmatmul.mubr.msk.f32.gmra.mrb[42].mxu1 %vm411_vm1, %v53_v54  ;;  %6417 = vmatprep.mubr.msk.f32.mxu0 %vm8036_vm0, %v8037_v6  ;;  %v81_v54 = vld [vmem:[%s12303_s0 + $0x188] sm:$0xff] }
  0x5d   :  { %6796 = vmatprep.mubr.msk.f32.mxu1 %vm8036_vm0, %v8037_v6 }
  0x5f   :  { %6418 = vmatmul.mubr.msk.f32.gmra.mrb[44].mxu0 %vm411_vm1, %v179_v55  ;;  %v207_v55 = vld [vmem:[%s12302_s1 + $0x190] sm:$0xff] }
  0x60   :  { %6797 = vmatmul.mubr.msk.f32.gmra.mrb[44].mxu1 %vm411_vm1, %v54_v56  ;;  %6420 = vmatprep.mubr.msk.f32.mxu0 %vm8036_vm0, %v8037_v6  ;;  %v82_v56 = vld [vmem:[%s12303_s0 + $0x190] sm:$0xff] }
  0x61   :  { %6799 = vmatprep.mubr.msk.f32.mxu1 %vm8036_vm0, %v8037_v6 }
  0x63   :  { %6421 = vmatmul.mubr.msk.f32.gmra.mrb[46].mxu0 %vm411_vm1, %v180_v57  ;;  %v208_v57 = vld [vmem:[%s12302_s1 + $0x198] sm:$0xff] }
  0x64   :  { %6800 = vmatmul.mubr.msk.f32.gmra.mrb[46].mxu1 %vm411_vm1, %v55_v58  ;;  %6423 = vmatprep.mubr.msk.f32.mxu0 %vm8036_vm0, %v8037_v6  ;;  %v83_v58 = vld [vmem:[%s12303_s0 + $0x198] sm:$0xff] }
  0x65   :  { %6802 = vmatprep.mubr.msk.f32.mxu1 %vm8036_vm0, %v8037_v6 }
  0x67   :  { %6424 = vmatmul.mubr.msk.f32.gmra.mrb[48].mxu0 %vm411_vm1, %v181_v61  ;;  %v210_v61 = vld [vmem:[%s12302_s1 + $0x1a8] sm:$0xff] }
  0x68   :  { %6803 = vmatmul.mubr.msk.f32.gmra.mrb[48].mxu1 %vm411_vm1, %v56_v63  ;;  %6426 = vmatprep.mubr.msk.f32.mxu0 %vm8036_vm0, %v8037_v6 }
  0x69   :  { %6805 = vmatprep.mubr.msk.f32.mxu1 %vm8036_vm0, %v8037_v6 }
  0x6b   :  { %6427 = vmatmul.mubr.msk.f32.gmra.mrb[50].mxu0 %vm411_vm1, %v182_v1 }
  0x6c   :  { %6806 = vmatmul.mubr.msk.f32.gmra.mrb[50].mxu1 %vm411_vm1, %v57_v2  ;;  %6429 = vmatprep.mubr.msk.f32.mxu0 %vm8036_vm0, %v8037_v6 }
  0x6d   :  { %6808 = vmatprep.mubr.msk.f32.mxu1 %vm8036_vm0, %v8037_v6 }
  0x6f   :  { %6430 = vmatmul.mubr.msk.f32.gmra.mrb[52].mxu0 %vm411_vm1, %v183_v3 }
  0x70   :  { %6809 = vmatmul.mubr.msk.f32.gmra.mrb[52].mxu1 %vm411_vm1, %v58_v4  ;;  %6432 = vmatprep.mubr.msk.f32.mxu0 %vm8036_vm0, %v8037_v6  ;;  %v211_v4 = vld [vmem:[%s12302_s1 + $0x1b0] sm:$0xff] }
  0x71   :  { %6811 = vmatprep.mubr.msk.f32.mxu1 %vm8036_vm0, %v8037_v6 }
  0x73   :  { %6433 = vmatmul.mubr.msk.f32.gmra.mrb[54].mxu0 %vm411_vm1, %v184_v5 }
  0x74   :  { %6812 = vmatmul.mubr.msk.f32.gmra.mrb[54].mxu1 %vm411_vm1, %v59_v7  ;;  %6435 = vmatprep.mubr.msk.f32.mxu0 %vm8036_vm0, %v8037_v6  ;;  %v86_v7 = vld [vmem:[%s12303_s0 + $0x1b0] sm:$0xff] }
  0x75   :  { %6814 = vmatprep.mubr.msk.f32.mxu1 %vm8036_vm0, %v8037_v6 }
  0x77   :  { %6436 = vmatmul.mubr.msk.f32.gmra.mrb[56].mxu0 %vm411_vm1, %v185_v8 }
  0x78   :  { %6815 = vmatmul.mubr.msk.f32.gmra.mrb[56].mxu1 %vm411_vm1, %v60_v9  ;;  %6438 = vmatprep.mubr.msk.f32.mxu0 %vm8036_vm0, %v8037_v6 }
  0x79   :  { %6817 = vmatprep.mubr.msk.f32.mxu1 %vm8036_vm0, %v8037_v6 }
  0x7b   :  { %6439 = vmatmul.mubr.msk.f32.gmra.mrb[58].mxu0 %vm411_vm1, %v186_v10 }
  0x7c   :  { %6818 = vmatmul.mubr.msk.f32.gmra.mrb[58].mxu1 %vm411_vm1, %v61_v11  ;;  %6441 = vmatprep.mubr.msk.f32.mxu0 %vm8036_vm0, %v8037_v6  ;;  %v3996_v11 = vld [vmem:[%s12304_s7 + $0x10] sm:$0xff] }
  0x7d   :  { %6820 = vmatprep.mubr.msk.f32.mxu1 %vm8036_vm0, %v8037_v6 }
  0x7f   :  { %6442 = vmatmul.mubr.msk.f32.gmra.mrb[60].mxu0 %vm411_vm1, %v187_v12  ;;  %v3997_v12 = vld [vmem:[%s12304_s7 + $0x18] sm:$0xff] }
  0x80   :  { %6821 = vmatmul.mubr.msk.f32.gmra.mrb[60].mxu1 %vm411_vm1, %v62_v13  ;;  %6444 = vmatprep.mubr.msk.f32.mxu0 %vm8036_vm0, %v8037_v6 }
  0x81   :  { %6823 = vmatprep.mubr.msk.f32.mxu1 %vm8036_vm0, %v8037_v6 }
  0x83   :  { %6445 = vmatmul.mubr.msk.f32.gmra.mrb[62].mxu0 %vm411_vm1, %v188_v14  ;;  %v212_v14 = vld [vmem:[%s12302_s1 + $0x1b8] sm:$0xff] }
  0x84   :  { %6824 = vmatmul.mubr.msk.f32.gmra.mrb[62].mxu1 %vm411_vm1, %v63_v15  ;;  %6447 = vmatprep.mubr.msk.f32.mxu0 %vm8036_vm0, %v8037_v6  ;;  %v7895_v15 = vpack.c.bf16 %v3997_v12, %v3996_v11  ;;  %v95_v12 = vld [vmem:[%s12303_s0 + $0x1f8] sm:$0xff] }
  0x85   :  { %6826 = vmatprep.mubr.msk.f32.mxu1 %vm8036_vm0, %v8037_v6 }
  0x86   :  { %7896 = vmatpush3.bf16.msra.mxu1 %v7895_v15 }
  0x87   :  { %6448 = vmatmul.mubr.msk.f32.gmra.mrb[64].mxu0 %vm411_vm1, %v189_v19  ;;  %7897 = vmatprep.subr.bf16.mxu1 %v8035_v0 }
  0x88   :  { %6827 = vmatmul.mubr.msk.f32.gmra.mrb[64].mxu1 %vm411_vm1, %v64_v20  ;;  %6450 = vmatprep.mubr.msk.f32.mxu0 %vm8036_vm0, %v8037_v6 }
  0x89   :  { %6829 = vmatprep.mubr.msk.f32.mxu1 %vm8036_vm0, %v8037_v6 }
  0x8b   :  { %6451 = vmatmul.mubr.msk.f32.gmra.mrb[66].mxu0 %vm411_vm1, %v190_v21 }
  0x8c   :  { %6830 = vmatmul.mubr.msk.f32.gmra.mrb[66].mxu1 %vm411_vm1, %v65_v22  ;;  %6453 = vmatprep.mubr.msk.f32.mxu0 %vm8036_vm0, %v8037_v6  ;;  %v213_v22 = vld [vmem:[%s12302_s1 + $0x1c0] sm:$0xff] }
  0x8d   :  { %6832 = vmatprep.mubr.msk.f32.mxu1 %vm8036_vm0, %v8037_v6 }
  0x8f   :  { %6454 = vmatmul.mubr.msk.f32.gmra.mrb[68].mxu0 %vm411_vm1, %v191_v23 }
  0x90   :  { %6833 = vmatmul.mubr.msk.f32.gmra.mrb[68].mxu1 %vm411_vm1, %v66_v24  ;;  %6456 = vmatprep.mubr.msk.f32.mxu0 %vm8036_vm0, %v8037_v6  ;;  %v88_v24 = vld [vmem:[%s12303_s0 + $0x1c0] sm:$0xff] }
  0x91   :  { %6835 = vmatprep.mubr.msk.f32.mxu1 %vm8036_vm0, %v8037_v6 }
  0x93   :  { %6457 = vmatmul.mubr.msk.f32.gmra.mrb[70].mxu0 %vm411_vm1, %v192_v25 }
  0x94   :  { %6836 = vmatmul.mubr.msk.f32.gmra.mrb[70].mxu1 %vm411_vm1, %v67_v26  ;;  %6459 = vmatprep.mubr.msk.f32.mxu0 %vm8036_vm0, %v8037_v6 }
  0x95   :  { %6838 = vmatprep.mubr.msk.f32.mxu1 %vm8036_vm0, %v8037_v6 }
  0x97   :  { %6460 = vmatmul.mubr.msk.f32.gmra.mrb[72].mxu0 %vm411_vm1, %v193_v27 }
  0x98   :  { %6839 = vmatmul.mubr.msk.f32.gmra.mrb[72].mxu1 %vm411_vm1, %v68_v28  ;;  %6462 = vmatprep.mubr.msk.f32.mxu0 %vm8036_vm0, %v8037_v6 }
  0x99   :  { %6841 = vmatprep.mubr.msk.f32.mxu1 %vm8036_vm0, %v8037_v6 }
  0x9b   :  { %6463 = vmatmul.mubr.msk.f32.gmra.mrb[74].mxu0 %vm411_vm1, %v194_v29  ;;  %v214_v29 = vld [vmem:[%s12302_s1 + $0x1c8] sm:$0xff] }
  0x9c   :  { %6842 = vmatmul.mubr.msk.f32.gmra.mrb[74].mxu1 %vm411_vm1, %v69_v30  ;;  %6465 = vmatprep.mubr.msk.f32.mxu0 %vm8036_vm0, %v8037_v6 }
  0x9d   :  { %6844 = vmatprep.mubr.msk.f32.mxu1 %vm8036_vm0, %v8037_v6 }
  0x9f   :  { %6466 = vmatmul.mubr.msk.f32.gmra.mrb[76].mxu0 %vm411_vm1, %v195_v31  ;;  %v89_v31 = vld [vmem:[%s12303_s0 + $0x1c8] sm:$0xff] }
  0xa0   :  { %6845 = vmatmul.mubr.msk.f32.gmra.mrb[76].mxu1 %vm411_vm1, %v70_v32  ;;  %6468 = vmatprep.mubr.msk.f32.mxu0 %vm8036_vm0, %v8037_v6 }
  0xa1   :  { %6847 = vmatprep.mubr.msk.f32.mxu1 %vm8036_vm0, %v8037_v6 }
  0xa3   :  { %6469 = vmatmul.mubr.msk.f32.gmra.mrb[78].mxu0 %vm411_vm1, %v196_v33 }
  0xa4   :  { %6848 = vmatmul.mubr.msk.f32.gmra.mrb[78].mxu1 %vm411_vm1, %v71_v34  ;;  %6471 = vmatprep.mubr.msk.f32.mxu0 %vm8036_vm0, %v8037_v6 }
  0xa5   :  { %6850 = vmatprep.mubr.msk.f32.mxu1 %vm8036_vm0, %v8037_v6 }
  0xa7   :  { %6472 = vmatmul.mubr.msk.f32.gmra.mrb[80].mxu0 %vm411_vm1, %v197_v35 }
  0xa8   :  { %6851 = vmatmul.mubr.msk.f32.gmra.mrb[80].mxu1 %vm411_vm1, %v72_v36  ;;  %6474 = vmatprep.mubr.msk.f32.mxu0 %vm8036_vm0, %v8037_v6  ;;  %v215_v36 = vld [vmem:[%s12302_s1 + $0x1d0] sm:$0xff] }
  0xa9   :  { %6853 = vmatprep.mubr.msk.f32.mxu1 %vm8036_vm0, %v8037_v6 }
  0xab   :  { %6475 = vmatmul.mubr.msk.f32.gmra.mrb[82].mxu0 %vm411_vm1, %v198_v37 }
  0xac   :  { %6854 = vmatmul.mubr.msk.f32.gmra.mrb[82].mxu1 %vm411_vm1, %v73_v38  ;;  %6477 = vmatprep.mubr.msk.f32.mxu0 %vm8036_vm0, %v8037_v6  ;;  %v90_v38 = vld [vmem:[%s12303_s0 + $0x1d0] sm:$0xff] }
  0xad   :  { %6856 = vmatprep.mubr.msk.f32.mxu1 %vm8036_vm0, %v8037_v6 }
  0xaf   :  { %6478 = vmatmul.mubr.msk.f32.gmra.mrb[84].mxu0 %vm411_vm1, %v199_v39 }
  0xb0   :  { %6857 = vmatmul.mubr.msk.f32.gmra.mrb[84].mxu1 %vm411_vm1, %v74_v40  ;;  %6480 = vmatprep.mubr.msk.f32.mxu0 %vm8036_vm0, %v8037_v6 }
  0xb1   :  { %6859 = vmatprep.mubr.msk.f32.mxu1 %vm8036_vm0, %v8037_v6 }
  0xb3   :  { %6481 = vmatmul.mubr.msk.f32.gmra.mrb[86].mxu0 %vm411_vm1, %v200_v41 }
  0xb4   :  { %6860 = vmatmul.mubr.msk.f32.gmra.mrb[86].mxu1 %vm411_vm1, %v75_v42  ;;  %6483 = vmatprep.mubr.msk.f32.mxu0 %vm8036_vm0, %v8037_v6 }
  0xb5   :  { %6862 = vmatprep.mubr.msk.f32.mxu1 %vm8036_vm0, %v8037_v6 }
  0xb7   :  { %6484 = vmatmul.mubr.msk.f32.gmra.mrb[88].mxu0 %vm411_vm1, %v201_v43  ;;  %v216_v43 = vld [vmem:[%s12302_s1 + $0x1d8] sm:$0xff] }
  0xb8   :  { %6863 = vmatmul.mubr.msk.f32.gmra.mrb[88].mxu1 %vm411_vm1, %v76_v44  ;;  %6486 = vmatprep.mubr.msk.f32.mxu0 %vm8036_vm0, %v8037_v6 }
  0xb9   :  { %6865 = vmatprep.mubr.msk.f32.mxu1 %vm8036_vm0, %v8037_v6 }
  0xbb   :  { %6487 = vmatmul.mubr.msk.f32.gmra.mrb[90].mxu0 %vm411_vm1, %v202_v45  ;;  %v91_v45 = vld [vmem:[%s12303_s0 + $0x1d8] sm:$0xff] }
  0xbc   :  { %6866 = vmatmul.mubr.msk.f32.gmra.mrb[90].mxu1 %vm411_vm1, %v77_v46  ;;  %6489 = vmatprep.mubr.msk.f32.mxu0 %vm8036_vm0, %v8037_v6 }
  0xbd   :  { %6868 = vmatprep.mubr.msk.f32.mxu1 %vm8036_vm0, %v8037_v6 }
  0xbf   :  { %6490 = vmatmul.mubr.msk.f32.gmra.mrb[92].mxu0 %vm411_vm1, %v203_v47 }
  0xc0   :  { %6869 = vmatmul.mubr.msk.f32.gmra.mrb[92].mxu1 %vm411_vm1, %v78_v48  ;;  %6492 = vmatprep.mubr.msk.f32.mxu0 %vm8036_vm0, %v8037_v6 }
  0xc1   :  { %6871 = vmatprep.mubr.msk.f32.mxu1 %vm8036_vm0, %v8037_v6 }
  0xc3   :  { %6493 = vmatmul.mubr.msk.f32.gmra.mrb[94].mxu0 %vm411_vm1, %v204_v49 }
  0xc4   :  { %6872 = vmatmul.mubr.msk.f32.gmra.mrb[94].mxu1 %vm411_vm1, %v79_v50  ;;  %6495 = vmatprep.mubr.msk.f32.mxu0 %vm8036_vm0, %v8037_v6  ;;  %v217_v50 = vld [vmem:[%s12302_s1 + $0x1e0] sm:$0xff] }
  0xc5   :  { %6874 = vmatprep.mubr.msk.f32.mxu1 %vm8036_vm0, %v8037_v6 }
  0xc7   :  { %6496 = vmatmul.mubr.msk.f32.gmra.mrb[96].mxu0 %vm411_vm1, %v205_v51 }
  0xc8   :  { %6875 = vmatmul.mubr.msk.f32.gmra.mrb[96].mxu1 %vm411_vm1, %v80_v52  ;;  %6498 = vmatprep.mubr.msk.f32.mxu0 %vm8036_vm0, %v8037_v6  ;;  %v92_v52 = vld [vmem:[%s12303_s0 + $0x1e0] sm:$0xff] }
  0xc9   :  { %6877 = vmatprep.mubr.msk.f32.mxu1 %vm8036_vm0, %v8037_v6 }
  0xcb   :  { %6499 = vmatmul.mubr.msk.f32.gmra.mrb[98].mxu0 %vm411_vm1, %v206_v53 }
  0xcc   :  { %6878 = vmatmul.mubr.msk.f32.gmra.mrb[98].mxu1 %vm411_vm1, %v81_v54  ;;  %6501 = vmatprep.mubr.msk.f32.mxu0 %vm8036_vm0, %v8037_v6 }
  0xcd   :  { %6880 = vmatprep.mubr.msk.f32.mxu1 %vm8036_vm0, %v8037_v6 }
  0xcf   :  { %6502 = vmatmul.mubr.msk.f32.gmra.mrb[100].mxu0 %vm411_vm1, %v207_v55 }
  0xd0   :  { %6881 = vmatmul.mubr.msk.f32.gmra.mrb[100].mxu1 %vm411_vm1, %v82_v56  ;;  %6504 = vmatprep.mubr.msk.f32.mxu0 %vm8036_vm0, %v8037_v6 }
  0xd1   :  { %6883 = vmatprep.mubr.msk.f32.mxu1 %vm8036_vm0, %v8037_v6 }
  0xd3   :  { %6505 = vmatmul.mubr.msk.f32.gmra.mrb[102].mxu0 %vm411_vm1, %v208_v57  ;;  %v218_v57 = vld [vmem:[%s12302_s1 + $0x1e8] sm:$0xff] }
  0xd4   :  { %6884 = vmatmul.mubr.msk.f32.gmra.mrb[102].mxu1 %vm411_vm1, %v83_v58  ;;  %6507 = vmatprep.mubr.msk.f32.mxu0 %vm8036_vm0, %v8037_v6 }
  0xd5   :  { %6886 = vmatprep.mubr.msk.f32.mxu1 %vm8036_vm0, %v8037_v6 }
  0xd7   :  { %6508 = vmatmul.mubr.msk.f32.gmra.mrb[104].mxu0 %vm411_vm1, %v209_v59  ;;  %v93_v59 = vld [vmem:[%s12303_s0 + $0x1e8] sm:$0xff] }
  0xd8   :  { %6887 = vmatmul.mubr.msk.f32.gmra.mrb[104].mxu1 %vm411_vm1, %v84_v60  ;;  %6510 = vmatprep.mubr.msk.f32.mxu0 %vm8036_vm0, %v8037_v6 }
  0xd9   :  { %6889 = vmatprep.mubr.msk.f32.mxu1 %vm8036_vm0, %v8037_v6 }
  0xda   :  { %v853_v63 = vpop.f32.mrb[0].mxu0 }
  0xdb   :  { %v6353_v1 = vpop.f32.mrb[1].mxu0  ;;  %6511 = vmatmul.mubr.msk.f32.gmra.mrb[106].mxu0 %vm411_vm1, %v210_v61  ;;  %v1918_v2 = vpop.f32.mrb[0].mxu1 }
  0xdc   :  { %6890 = vmatmul.mubr.msk.f32.gmra.mrb[106].mxu1 %vm411_vm1, %v85_v62  ;;  %6513 = vmatprep.mubr.msk.f32.mxu0 %vm8036_vm0, %v8037_v6  ;;  %v6732_v3 = vpop.f32.mrb[1].mxu1  ;;  %v8777_v5 = vadd.f32 %v1918_v2, %v853_v63  ;;  %v219_v1 = vld [vmem:[%s12302_s1 + $0x1f0] sm:$0xff] }
  0xdd   :  { %6892 = vmatprep.mubr.msk.f32.mxu1 %vm8036_vm0, %v8037_v6  ;;  %v94_v3 = vld [vmem:[%s12303_s0 + $0x1f0] sm:$0xff] }
  0xde   :  { %v858_v8 = vpop.f32.mrb[2].mxu0 }
  0xdf   :  { %v6356_v9 = vpop.f32.mrb[3].mxu0  ;;  %6514 = vmatmul.mubr.msk.f32.gmra.mrb[108].mxu0 %vm411_vm1, %v211_v4  ;;  %v1923_v10 = vpop.f32.mrb[2].mxu1 }
  0xe0   :  { %6893 = vmatmul.mubr.msk.f32.gmra.mrb[108].mxu1 %vm411_vm1, %v86_v7  ;;  %6516 = vmatprep.mubr.msk.f32.mxu0 %vm8036_vm0, %v8037_v6  ;;  %v6735_v13 = vpop.f32.mrb[3].mxu1  ;;  %v8797_v16 = vadd.f32 %v1923_v10, %v858_v8  ;;  %v220_v10 = vld [vmem:[%s12302_s1 + $0x1f8] sm:$0xff] }
  0xe1   :  { %6895 = vmatprep.mubr.msk.f32.mxu1 %vm8036_vm0, %v8037_v6 }
  0xe2   :  { %v863_v18 = vpop.f32.mrb[4].mxu0 }
  0xe3   :  { %v6359_v19 = vpop.f32.mrb[5].mxu0  ;;  %6517 = vmatmul.mubr.msk.f32.gmra.mrb[110].mxu0 %vm411_vm1, %v212_v14  ;;  %v1928_v20 = vpop.f32.mrb[4].mxu1 }
  0xe4   :  { %6896 = vmatmul.mubr.msk.f32.gmra.mrb[110].mxu1 %vm411_vm1, %v87_v17  ;;  %6519 = vmatprep.mubr.msk.f32.mxu0 %vm8036_vm0, %v8037_v6  ;;  %v6738_v21 = vpop.f32.mrb[5].mxu1  ;;  %v8812_v23 = vadd.f32 %v1928_v20, %v863_v18  ;;  %v221_v18 = vld [vmem:[%s12302_s1 + $0x200] sm:$0xff] }
  0xe5   :  { %6898 = vmatprep.mubr.msk.f32.mxu1 %vm8036_vm0, %v8037_v6  ;;  %v96_v20 = vld [vmem:[%s12303_s0 + $0x200] sm:$0xff] }
  0xe6   :  { %v868_v25 = vpop.f32.mrb[6].mxu0 }
  0xe7   :  { %v6362_v26 = vpop.f32.mrb[7].mxu0  ;;  %6520 = vmatmul.mubr.msk.f32.gmra.mrb[112].mxu0 %vm411_vm1, %v213_v22  ;;  %v1933_v27 = vpop.f32.mrb[6].mxu1 }
  0xe8   :  { %6899 = vmatmul.mubr.msk.f32.gmra.mrb[112].mxu1 %vm411_vm1, %v88_v24  ;;  %6522 = vmatprep.mubr.msk.f32.mxu0 %vm8036_vm0, %v8037_v6  ;;  %v6741_v28 = vpop.f32.mrb[7].mxu1  ;;  %v8826_v30 = vadd.f32 %v1933_v27, %v868_v25  ;;  %v222_v26 = vld [vmem:[%s12302_s1 + $0x208] sm:$0xff] }
  0xe9   :  { %6901 = vmatprep.mubr.msk.f32.mxu1 %vm8036_vm0, %v8037_v6  ;;  %v97_v28 = vld [vmem:[%s12303_s0 + $0x208] sm:$0xff] }
  0xea   :  { %v873_v32 = vpop.f32.mrb[8].mxu0 }
  0xeb   :  { %v6365_v33 = vpop.f32.mrb[9].mxu0  ;;  %6523 = vmatmul.mubr.msk.f32.gmra.mrb[114].mxu0 %vm411_vm1, %v214_v29  ;;  %v1938_v34 = vpop.f32.mrb[8].mxu1 }
  0xec   :  { %6902 = vmatmul.mubr.msk.f32.gmra.mrb[114].mxu1 %vm411_vm1, %v89_v31  ;;  %6525 = vmatprep.mubr.msk.f32.mxu0 %vm8036_vm0, %v8037_v6  ;;  %v6744_v35 = vpop.f32.mrb[9].mxu1  ;;  %v8840_v37 = vadd.f32 %v1938_v34, %v873_v32  ;;  %v223_v34 = vld [vmem:[%s12302_s1 + $0x210] sm:$0xff] }
  0xed   :  { %6904 = vmatprep.mubr.msk.f32.mxu1 %vm8036_vm0, %v8037_v6 }
  0xee   :  { %v878_v39 = vpop.f32.mrb[10].mxu0 }
  0xef   :  { %v6368_v40 = vpop.f32.mrb[11].mxu0  ;;  %6526 = vmatmul.mubr.msk.f32.gmra.mrb[116].mxu0 %vm411_vm1, %v215_v36  ;;  %v1943_v41 = vpop.f32.mrb[10].mxu1  ;;  %v98_v36 = vld [vmem:[%s12303_s0 + $0x210] sm:$0xff] }
  0xf0   :  { %6905 = vmatmul.mubr.msk.f32.gmra.mrb[116].mxu1 %vm411_vm1, %v90_v38  ;;  %6528 = vmatprep.mubr.msk.f32.mxu0 %vm8036_vm0, %v8037_v6  ;;  %v6747_v42 = vpop.f32.mrb[11].mxu1  ;;  %v8854_v44 = vadd.f32 %v1943_v41, %v878_v39 }
  0xf1   :  { %6907 = vmatprep.mubr.msk.f32.mxu1 %vm8036_vm0, %v8037_v6  ;;  %v224_v42 = vld [vmem:[%s12302_s1 + $0x218] sm:$0xff] }
  0xf2   :  { %v883_v46 = vpop.f32.mrb[12].mxu0 }
  0xf3   :  { %v6371_v47 = vpop.f32.mrb[13].mxu0  ;;  %6529 = vmatmul.mubr.msk.f32.gmra.mrb[118].mxu0 %vm411_vm1, %v216_v43  ;;  %v1948_v48 = vpop.f32.mrb[12].mxu1 }
  0xf4   :  { %6908 = vmatmul.mubr.msk.f32.gmra.mrb[118].mxu1 %vm411_vm1, %v91_v45  ;;  %6531 = vmatprep.mubr.msk.f32.mxu0 %vm8036_vm0, %v8037_v6  ;;  %v6750_v49 = vpop.f32.mrb[13].mxu1  ;;  %v8868_v51 = vadd.f32 %v1948_v48, %v883_v46  ;;  %v99_v45 = vld [vmem:[%s12303_s0 + $0x218] sm:$0xff] }
  0xf5   :  { %6910 = vmatprep.mubr.msk.f32.mxu1 %vm8036_vm0, %v8037_v6 }
  0xf6   :  { %v888_v53 = vpop.f32.mrb[14].mxu0 }
  0xf7   :  { %v6374_v54 = vpop.f32.mrb[15].mxu0  ;;  %6532 = vmatmul.mubr.msk.f32.gmra.mrb[120].mxu0 %vm411_vm1, %v217_v50  ;;  %v1953_v55 = vpop.f32.mrb[14].mxu1  ;;  %v225_v50 = vld [vmem:[%s12302_s1 + $0x220] sm:$0xff] }
  0xf8   :  { %6911 = vmatmul.mubr.msk.f32.gmra.mrb[120].mxu1 %vm411_vm1, %v92_v52  ;;  %6534 = vmatprep.mubr.msk.f32.mxu0 %vm8036_vm0, %v8037_v6  ;;  %v6753_v56 = vpop.f32.mrb[15].mxu1  ;;  %v8882_v58 = vadd.f32 %v1953_v55, %v888_v53  ;;  %v100_v53 = vld [vmem:[%s12303_s0 + $0x220] sm:$0xff] }
  0xf9   :  { %6913 = vmatprep.mubr.msk.f32.mxu1 %vm8036_vm0, %v8037_v6 }
  0xfa   :  { %v893_v60 = vpop.f32.mrb[16].mxu0 }
  0xfb   :  { %v6377_v61 = vpop.f32.mrb[17].mxu0  ;;  %6535 = vmatmul.mubr.msk.f32.gmra.mrb[122].mxu0 %vm411_vm1, %v218_v57  ;;  %v1958_v62 = vpop.f32.mrb[16].mxu1 }
  0xfc   :  { %6914 = vmatmul.mubr.msk.f32.gmra.mrb[122].mxu1 %vm411_vm1, %v93_v59  ;;  %6537 = vmatprep.mubr.msk.f32.mxu0 %vm8036_vm0, %v8037_v6  ;;  %v6756_v63 = vpop.f32.mrb[17].mxu1  ;;  %v8896_v2 = vadd.f32 %v1958_v62, %v893_v60  ;;  %v226_v59 = vld [vmem:[%s12302_s1 + $0x228] sm:$0xff] }
  0xfd   :  { %6916 = vmatprep.mubr.msk.f32.mxu1 %vm8036_vm0, %v8037_v6  ;;  %v101_v61 = vld [vmem:[%s12303_s0 + $0x228] sm:$0xff] }
  0xfe   :  { %v898_v4 = vpop.f32.mrb[18].mxu0 }
  0xff   :  { %v6380_v7 = vpop.f32.mrb[19].mxu0  ;;  %6538 = vmatmul.mubr.msk.f32.gmra.mrb[124].mxu0 %vm411_vm1, %v219_v1  ;;  %v1963_v8 = vpop.f32.mrb[18].mxu1 }
 0x100   :  { %6917 = vmatmul.mubr.msk.f32.gmra.mrb[124].mxu1 %vm411_vm1, %v94_v3  ;;  %6540 = vmatprep.mubr.msk.f32.mxu0 %vm8036_vm0, %v8037_v6  ;;  %v6759_v9 = vpop.f32.mrb[19].mxu1  ;;  %v8910_v11 = vadd.f32 %v1963_v8, %v898_v4  ;;  %v227_v4 = vld [vmem:[%s12302_s1 + $0x230] sm:$0xff] }
 0x101   :  { %6919 = vmatprep.mubr.msk.f32.mxu1 %vm8036_vm0, %v8037_v6  ;;  %v102_v8 = vld [vmem:[%s12303_s0 + $0x230] sm:$0xff] }
 0x102   :  { %v903_v13 = vpop.f32.mrb[20].mxu0 }
 0x103   :  { %v6383_v14 = vpop.f32.mrb[21].mxu0  ;;  %6541 = vmatmul.mubr.msk.f32.gmra.mrb[126].mxu0 %vm411_vm1, %v220_v10  ;;  %v1968_v15 = vpop.f32.mrb[20].mxu1 }
 0x104   :  { %6920 = vmatmul.mubr.msk.f32.gmra.mrb[126].mxu1 %vm411_vm1, %v95_v12  ;;  %6543 = vmatprep.mubr.msk.f32.mxu0 %vm8036_vm0, %v8037_v6  ;;  %v6762_v17 = vpop.f32.mrb[21].mxu1  ;;  %v8924_v19 = vadd.f32 %v1968_v15, %v903_v13  ;;  %v228_v14 = vld [vmem:[%s12302_s1 + $0x238] sm:$0xff] }
 0x105   :  { %6922 = vmatprep.mubr.msk.f32.mxu1 %vm8036_vm0, %v8037_v6  ;;  %v103_v17 = vld [vmem:[%s12303_s0 + $0x238] sm:$0xff] }
 0x106   :  { %v908_v21 = vpop.f32.mrb[22].mxu0 }
 0x107   :  { %v6386_v22 = vpop.f32.mrb[23].mxu0  ;;  %6544 = vmatmul.mubr.msk.f32.gmra.mrb[128].mxu0 %vm411_vm1, %v221_v18  ;;  %v1973_v24 = vpop.f32.mrb[22].mxu1 }
 0x108   :  { %6923 = vmatmul.mubr.msk.f32.gmra.mrb[128].mxu1 %vm411_vm1, %v96_v20  ;;  %6546 = vmatprep.mubr.msk.f32.mxu0 %vm8036_vm0, %v8037_v6  ;;  %v6765_v25 = vpop.f32.mrb[23].mxu1  ;;  %v8938_v27 = vadd.f32 %v1973_v24, %v908_v21  ;;  %v229_v24 = vld [vmem:[%s12302_s1 + $0x240] sm:$0xff] }
 0x109   :  { %6925 = vmatprep.mubr.msk.f32.mxu1 %vm8036_vm0, %v8037_v6 }
 0x10a   :  { %v913_v29 = vpop.f32.mrb[24].mxu0 }
 0x10b   :  { %v6389_v31 = vpop.f32.mrb[25].mxu0  ;;  %6547 = vmatmul.mubr.msk.f32.gmra.mrb[130].mxu0 %vm411_vm1, %v222_v26  ;;  %v1978_v32 = vpop.f32.mrb[24].mxu1  ;;  %v104_v26 = vld [vmem:[%s12303_s0 + $0x240] sm:$0xff] }
 0x10c   :  { %6926 = vmatmul.mubr.msk.f32.gmra.mrb[130].mxu1 %vm411_vm1, %v97_v28  ;;  %6549 = vmatprep.mubr.msk.f32.mxu0 %vm8036_vm0, %v8037_v6  ;;  %v6768_v33 = vpop.f32.mrb[25].mxu1  ;;  %v8952_v35 = vadd.f32 %v1978_v32, %v913_v29 }
 0x10d   :  { %6928 = vmatprep.mubr.msk.f32.mxu1 %vm8036_vm0, %v8037_v6  ;;  %v230_v33 = vld [vmem:[%s12302_s1 + $0x248] sm:$0xff] }
 0x10e   :  { %v918_v38 = vpop.f32.mrb[26].mxu0 }
 0x10f   :  { %v6392_v39 = vpop.f32.mrb[27].mxu0  ;;  %6550 = vmatmul.mubr.msk.f32.gmra.mrb[132].mxu0 %vm411_vm1, %v223_v34  ;;  %v1983_v40 = vpop.f32.mrb[26].mxu1 }
 0x110   :  { %6929 = vmatmul.mubr.msk.f32.gmra.mrb[132].mxu1 %vm411_vm1, %v98_v36  ;;  %6552 = vmatprep.mubr.msk.f32.mxu0 %vm8036_vm0, %v8037_v6  ;;  %v6771_v41 = vpop.f32.mrb[27].mxu1  ;;  %v8966_v43 = vadd.f32 %v1983_v40, %v918_v38  ;;  %v105_v36 = vld [vmem:[%s12303_s0 + $0x248] sm:$0xff] }
 0x111   :  { %6931 = vmatprep.mubr.msk.f32.mxu1 %vm8036_vm0, %v8037_v6 }
 0x112   :  { %v923_v46 = vpop.f32.mrb[28].mxu0 }
 0x113   :  { %v6395_v47 = vpop.f32.mrb[29].mxu0  ;;  %6553 = vmatmul.mubr.msk.f32.gmra.mrb[134].mxu0 %vm411_vm1, %v224_v42  ;;  %v1988_v48 = vpop.f32.mrb[28].mxu1  ;;  %v231_v42 = vld [vmem:[%s12302_s1 + $0x250] sm:$0xff] }
 0x114   :  { %6932 = vmatmul.mubr.msk.f32.gmra.mrb[134].mxu1 %vm411_vm1, %v99_v45  ;;  %6555 = vmatprep.mubr.msk.f32.mxu0 %vm8036_vm0, %v8037_v6  ;;  %v6774_v49 = vpop.f32.mrb[29].mxu1  ;;  %v8980_v52 = vadd.f32 %v1988_v48, %v923_v46  ;;  %v106_v46 = vld [vmem:[%s12303_s0 + $0x250] sm:$0xff] }
 0x115   :  { %6934 = vmatprep.mubr.msk.f32.mxu1 %vm8036_vm0, %v8037_v6 }
 0x116   :  { %v928_v54 = vpop.f32.mrb[30].mxu0 }
 0x117   :  { %v6398_v55 = vpop.f32.mrb[31].mxu0  ;;  %6556 = vmatmul.mubr.msk.f32.gmra.mrb[136].mxu0 %vm411_vm1, %v225_v50  ;;  %v1993_v56 = vpop.f32.mrb[30].mxu1 }
 0x118   :  { %6935 = vmatmul.mubr.msk.f32.gmra.mrb[136].mxu1 %vm411_vm1, %v100_v53  ;;  %6558 = vmatprep.mubr.msk.f32.mxu0 %vm8036_vm0, %v8037_v6  ;;  %v6777_v57 = vpop.f32.mrb[31].mxu1  ;;  %v8994_v60 = vadd.f32 %v1993_v56, %v928_v54  ;;  %v232_v53 = vld [vmem:[%s12302_s1 + $0x258] sm:$0xff] }
 0x119   :  { %6937 = vmatprep.mubr.msk.f32.mxu1 %vm8036_vm0, %v8037_v6  ;;  %v107_v55 = vld [vmem:[%s12303_s0 + $0x258] sm:$0xff] }
 0x11a   :  { %v933_v62 = vpop.f32.mrb[32].mxu0 }
 0x11b   :  { %v6401_v63 = vpop.f32.mrb[33].mxu0  ;;  %6559 = vmatmul.mubr.msk.f32.gmra.mrb[138].mxu0 %vm411_vm1, %v226_v59  ;;  %v1998_v1 = vpop.f32.mrb[32].mxu1 }
 0x11c   :  { %6938 = vmatmul.mubr.msk.f32.gmra.mrb[138].mxu1 %vm411_vm1, %v101_v61  ;;  %6561 = vmatprep.mubr.msk.f32.mxu0 %vm8036_vm0, %v8037_v6  ;;  %v6780_v3 = vpop.f32.mrb[33].mxu1  ;;  %v9008_v7 = vadd.f32 %v1998_v1, %v933_v62  ;;  %v233_v62 = vld [vmem:[%s12302_s1 + $0x260] sm:$0xff] }
 0x11d   :  { %6940 = vmatprep.mubr.msk.f32.mxu1 %vm8036_vm0, %v8037_v6  ;;  %v108_v1 = vld [vmem:[%s12303_s0 + $0x260] sm:$0xff] }
 0x11e   :  { %v938_v9 = vpop.f32.mrb[34].mxu0 }
 0x11f   :  { %v6404_v10 = vpop.f32.mrb[35].mxu0  ;;  %6562 = vmatmul.mubr.msk.f32.gmra.mrb[140].mxu0 %vm411_vm1, %v227_v4  ;;  %v2003_v12 = vpop.f32.mrb[34].mxu1 }
 0x120   :  { %6941 = vmatmul.mubr.msk.f32.gmra.mrb[140].mxu1 %vm411_vm1, %v102_v8  ;;  %6564 = vmatprep.mubr.msk.f32.mxu0 %vm8036_vm0, %v8037_v6  ;;  %v6783_v13 = vpop.f32.mrb[35].mxu1  ;;  %v9022_v15 = vadd.f32 %v2003_v12, %v938_v9  ;;  %v234_v10 = vld [vmem:[%s12302_s1 + $0x268] sm:$0xff] }
 0x121   :  { %6943 = vmatprep.mubr.msk.f32.mxu1 %vm8036_vm0, %v8037_v6  ;;  %v109_v13 = vld [vmem:[%s12303_s0 + $0x268] sm:$0xff] }
 0x122   :  { %v943_v18 = vpop.f32.mrb[36].mxu0 }
 0x123   :  { %v6407_v20 = vpop.f32.mrb[37].mxu0  ;;  %6565 = vmatmul.mubr.msk.f32.gmra.mrb[142].mxu0 %vm411_vm1, %v228_v14  ;;  %v2008_v21 = vpop.f32.mrb[36].mxu1 }
 0x124   :  { %6944 = vmatmul.mubr.msk.f32.gmra.mrb[142].mxu1 %vm411_vm1, %v103_v17  ;;  %6567 = vmatprep.mubr.msk.f32.mxu0 %vm8036_vm0, %v8037_v6  ;;  %v6786_v22 = vpop.f32.mrb[37].mxu1  ;;  %v9036_v25 = vadd.f32 %v2008_v21, %v943_v18  ;;  %v235_v21 = vld [vmem:[%s12302_s1 + $0x270] sm:$0xff] }
 0x125   :  { %6946 = vmatprep.mubr.msk.f32.mxu1 %vm8036_vm0, %v8037_v6 }
 0x126   :  { %v948_v28 = vpop.f32.mrb[38].mxu0 }
 0x127   :  { %v6410_v29 = vpop.f32.mrb[39].mxu0  ;;  %6568 = vmatmul.mubr.msk.f32.gmra.mrb[144].mxu0 %vm411_vm1, %v229_v24  ;;  %v2013_v31 = vpop.f32.mrb[38].mxu1  ;;  %v110_v24 = vld [vmem:[%s12303_s0 + $0x270] sm:$0xff] }
 0x128   :  { %6947 = vmatmul.mubr.msk.f32.gmra.mrb[144].mxu1 %vm411_vm1, %v104_v26  ;;  %6570 = vmatprep.mubr.msk.f32.mxu0 %vm8036_vm0, %v8037_v6  ;;  %v6789_v32 = vpop.f32.mrb[39].mxu1  ;;  %v9050_v34 = vadd.f32 %v2013_v31, %v948_v28 }
 0x129   :  { %6949 = vmatprep.mubr.msk.f32.mxu1 %vm8036_vm0, %v8037_v6  ;;  %v236_v32 = vld [vmem:[%s12302_s1 + $0x278] sm:$0xff] }
 0x12a   :  { %v953_v38 = vpop.f32.mrb[40].mxu0 }
 0x12b   :  { %v6413_v39 = vpop.f32.mrb[41].mxu0  ;;  %6571 = vmatmul.mubr.msk.f32.gmra.mrb[146].mxu0 %vm411_vm1, %v230_v33  ;;  %v2018_v40 = vpop.f32.mrb[40].mxu1 }
 0x12c   :  { %6950 = vmatmul.mubr.msk.f32.gmra.mrb[146].mxu1 %vm411_vm1, %v105_v36  ;;  %6573 = vmatprep.mubr.msk.f32.mxu0 %vm8036_vm0, %v8037_v6  ;;  %v6792_v41 = vpop.f32.mrb[41].mxu1  ;;  %v9064_v45 = vadd.f32 %v2018_v40, %v953_v38  ;;  %v111_v36 = vld [vmem:[%s12303_s0 + $0x278] sm:$0xff] }
 0x12d   :  { %6952 = vmatprep.mubr.msk.f32.mxu1 %vm8036_vm0, %v8037_v6 }
 0x12e   :  { %v958_v47 = vpop.f32.mrb[42].mxu0 }
 0x12f   :  { %v6416_v48 = vpop.f32.mrb[43].mxu0  ;;  %6574 = vmatmul.mubr.msk.f32.gmra.mrb[148].mxu0 %vm411_vm1, %v231_v42  ;;  %v2023_v49 = vpop.f32.mrb[42].mxu1  ;;  %v237_v42 = vld [vmem:[%s12302_s1 + $0x280] sm:$0xff] }
 0x130   :  { %6953 = vmatmul.mubr.msk.f32.gmra.mrb[148].mxu1 %vm411_vm1, %v106_v46  ;;  %6576 = vmatprep.mubr.msk.f32.mxu0 %vm8036_vm0, %v8037_v6  ;;  %v6795_v50 = vpop.f32.mrb[43].mxu1  ;;  %v9078_v54 = vadd.f32 %v2023_v49, %v958_v47  ;;  %v112_v47 = vld [vmem:[%s12303_s0 + $0x280] sm:$0xff] }
 0x131   :  { %6955 = vmatprep.mubr.msk.f32.mxu1 %vm8036_vm0, %v8037_v6 }
 0x132   :  { %v963_v56 = vpop.f32.mrb[44].mxu0 }
 0x133   :  { %v6419_v57 = vpop.f32.mrb[45].mxu0  ;;  %6577 = vmatmul.mubr.msk.f32.gmra.mrb[150].mxu0 %vm411_vm1, %v232_v53  ;;  %v2028_v59 = vpop.f32.mrb[44].mxu1 }
 0x134   :  { %6956 = vmatmul.mubr.msk.f32.gmra.mrb[150].mxu1 %vm411_vm1, %v107_v55  ;;  %6579 = vmatprep.mubr.msk.f32.mxu0 %vm8036_vm0, %v8037_v6  ;;  %v6798_v61 = vpop.f32.mrb[45].mxu1  ;;  %v9092_v63 = vadd.f32 %v2028_v59, %v963_v56  ;;  %v238_v55 = vld [vmem:[%s12302_s1 + $0x288] sm:$0xff] }
 0x135   :  { %6958 = vmatprep.mubr.msk.f32.mxu1 %vm8036_vm0, %v8037_v6  ;;  %v113_v57 = vld [vmem:[%s12303_s0 + $0x288] sm:$0xff] }
 0x136   :  { %v968_v3 = vpop.f32.mrb[46].mxu0 }
 0x137   :  { %v6422_v4 = vpop.f32.mrb[47].mxu0  ;;  %6580 = vmatmul.mubr.msk.f32.gmra.mrb[152].mxu0 %vm411_vm1, %v233_v62  ;;  %v2033_v8 = vpop.f32.mrb[46].mxu1 }
 0x138   :  { %6959 = vmatmul.mubr.msk.f32.gmra.mrb[152].mxu1 %vm411_vm1, %v108_v1  ;;  %6582 = vmatprep.mubr.msk.f32.mxu0 %vm8036_vm0, %v8037_v6  ;;  %v6801_v9 = vpop.f32.mrb[47].mxu1  ;;  %v9106_v12 = vadd.f32 %v2033_v8, %v968_v3  ;;  %v239_v3 = vld [vmem:[%s12302_s1 + $0x290] sm:$0xff] }
 0x139   :  { %6961 = vmatprep.mubr.msk.f32.mxu1 %vm8036_vm0, %v8037_v6  ;;  %v114_v8 = vld [vmem:[%s12303_s0 + $0x290] sm:$0xff] }
 0x13a   :  { %v973_v14 = vpop.f32.mrb[48].mxu0 }
 0x13b   :  { %v6425_v17 = vpop.f32.mrb[49].mxu0  ;;  %6583 = vmatmul.mubr.msk.f32.gmra.mrb[154].mxu0 %vm411_vm1, %v234_v10  ;;  %v2038_v18 = vpop.f32.mrb[48].mxu1 }
 0x13c   :  { %6962 = vmatmul.mubr.msk.f32.gmra.mrb[154].mxu1 %vm411_vm1, %v109_v13  ;;  %6585 = vmatprep.mubr.msk.f32.mxu0 %vm8036_vm0, %v8037_v6  ;;  %v6804_v20 = vpop.f32.mrb[49].mxu1  ;;  %v9120_v22 = vadd.f32 %v2038_v18, %v973_v14  ;;  %v240_v17 = vld [vmem:[%s12302_s1 + $0x298] sm:$0xff] }
 0x13d   :  { %6964 = vmatprep.mubr.msk.f32.mxu1 %vm8036_vm0, %v8037_v6  ;;  %v115_v20 = vld [vmem:[%s12303_s0 + $0x298] sm:$0xff] }
 0x13e   :  { %v978_v26 = vpop.f32.mrb[50].mxu0 }
 0x13f   :  { %v6428_v28 = vpop.f32.mrb[51].mxu0  ;;  %6586 = vmatmul.mubr.msk.f32.gmra.mrb[156].mxu0 %vm411_vm1, %v235_v21  ;;  %v2043_v29 = vpop.f32.mrb[50].mxu1 }
 0x140   :  { %6965 = vmatmul.mubr.msk.f32.gmra.mrb[156].mxu1 %vm411_vm1, %v110_v24  ;;  %6588 = vmatprep.mubr.msk.f32.mxu0 %vm8036_vm0, %v8037_v6  ;;  %v6807_v31 = vpop.f32.mrb[51].mxu1  ;;  %v9134_v33 = vadd.f32 %v2043_v29, %v978_v26  ;;  %v241_v29 = vld [vmem:[%s12302_s1 + $0x2a0] sm:$0xff] }
 0x141   :  { %6967 = vmatprep.mubr.msk.f32.mxu1 %vm8036_vm0, %v8037_v6 }
 0x142   :  { %v983_v38 = vpop.f32.mrb[52].mxu0 }
 0x143   :  { %v6431_v39 = vpop.f32.mrb[53].mxu0  ;;  %6589 = vmatmul.mubr.msk.f32.gmra.mrb[158].mxu0 %vm411_vm1, %v236_v32  ;;  %v2048_v40 = vpop.f32.mrb[52].mxu1  ;;  %v116_v32 = vld [vmem:[%s12303_s0 + $0x2a0] sm:$0xff] }
 0x144   :  { %6968 = vmatmul.mubr.msk.f32.gmra.mrb[158].mxu1 %vm411_vm1, %v111_v36  ;;  %6591 = vmatprep.mubr.msk.f32.mxu0 %vm8036_vm0, %v8037_v6  ;;  %v6810_v41 = vpop.f32.mrb[53].mxu1  ;;  %v9148_v46 = vadd.f32 %v2048_v40, %v983_v38 }
 0x145   :  { %6970 = vmatprep.mubr.msk.f32.mxu1 %vm8036_vm0, %v8037_v6  ;;  %v242_v41 = vld [vmem:[%s12302_s1 + $0x2a8] sm:$0xff] }
 0x146   :  { %v988_v48 = vpop.f32.mrb[54].mxu0 }
 0x147   :  { %v6434_v49 = vpop.f32.mrb[55].mxu0  ;;  %6592 = vmatmul.mubr.msk.f32.gmra.mrb[160].mxu0 %vm411_vm1, %v237_v42  ;;  %v2053_v50 = vpop.f32.mrb[54].mxu1 }
 0x148   :  { %6971 = vmatmul.mubr.msk.f32.gmra.mrb[160].mxu1 %vm411_vm1, %v112_v47  ;;  %6594 = vmatprep.mubr.msk.f32.mxu0 %vm8036_vm0, %v8037_v6  ;;  %v6813_v53 = vpop.f32.mrb[55].mxu1  ;;  %v9162_v56 = vadd.f32 %v2053_v50, %v988_v48  ;;  %v117_v47 = vld [vmem:[%s12303_s0 + $0x2a8] sm:$0xff] }
 0x149   :  { %6973 = vmatprep.mubr.msk.f32.mxu1 %vm8036_vm0, %v8037_v6 }
 0x14a   :  { %v993_v59 = vpop.f32.mrb[56].mxu0 }
 0x14b   :  { %v6437_v61 = vpop.f32.mrb[57].mxu0  ;;  %6595 = vmatmul.mubr.msk.f32.gmra.mrb[162].mxu0 %vm411_vm1, %v238_v55  ;;  %v2058_v62 = vpop.f32.mrb[56].mxu1  ;;  %v243_v55 = vld [vmem:[%s12302_s1 + $0x2b0] sm:$0xff] }
 0x14c   :  { %6974 = vmatmul.mubr.msk.f32.gmra.mrb[162].mxu1 %vm411_vm1, %v113_v57  ;;  %6597 = vmatprep.mubr.msk.f32.mxu0 %vm8036_vm0, %v8037_v6  ;;  %v6816_v1 = vpop.f32.mrb[57].mxu1  ;;  %v9176_v4 = vadd.f32 %v2058_v62, %v993_v59  ;;  %v3998_v57 = vld [vmem:[%s12304_s7 + $0x20] sm:$0xff]  ;;  %v3999_v59 = vld [vmem:[%s12304_s7 + $0x28] sm:$0xff]  ;;  %v118_v62 = vld [vmem:[%s12303_s0 + $0x2b0] sm:$0xff] }
 0x14d   :  { %6976 = vmatprep.mubr.msk.f32.mxu1 %vm8036_vm0, %v8037_v6  ;;  %v7898_v1 = vpack.c.bf16 %v3999_v59, %v3998_v57  ;;  %v122_v59 = vld [vmem:[%s12303_s0 + $0x2d0] sm:$0xff] }
 0x14e   :  { %v998_v9 = vpop.f32.mrb[58].mxu0 }
 0x14f   :  { %v6440_v10 = vpop.f32.mrb[59].mxu0  ;;  %6598 = vmatmul.mubr.msk.f32.gmra.mrb[164].mxu0 %vm411_vm1, %v239_v3  ;;  %v2063_v13 = vpop.f32.mrb[58].mxu1  ;;  %7899 = vmatpush3.bf16.msra.mxu1 %v7898_v1 }
 0x150   :  { %6977 = vmatmul.mubr.msk.f32.gmra.mrb[164].mxu1 %vm411_vm1, %v114_v8  ;;  %6600 = vmatprep.mubr.msk.f32.mxu0 %vm8036_vm0, %v8037_v6  ;;  %v6819_v14 = vpop.f32.mrb[59].mxu1  ;;  %v9190_v18 = vadd.f32 %v2063_v13, %v998_v9  ;;  %v244_v13 = vld [vmem:[%s12302_s1 + $0x2b8] sm:$0xff] }
 0x151   :  { %6979 = vmatprep.mubr.msk.f32.mxu1 %vm8036_vm0, %v8037_v6  ;;  %7900 = vmatprep.subr.bf16.mxu1 %v8035_v0  ;;  %v120_v0 = vld [vmem:[%s12303_s0 + $0x2c0] sm:$0xff] }
 0x152   :  { %v1003_v21 = vpop.f32.mrb[60].mxu0 }
 0x153   :  { %v6443_v24 = vpop.f32.mrb[61].mxu0  ;;  %6601 = vmatmul.mubr.msk.f32.gmra.mrb[166].mxu0 %vm411_vm1, %v240_v17  ;;  %v2068_v26 = vpop.f32.mrb[60].mxu1  ;;  %v119_v17 = vld [vmem:[%s12303_s0 + $0x2b8] sm:$0xff] }
 0x154   :  { %6980 = vmatmul.mubr.msk.f32.gmra.mrb[166].mxu1 %vm411_vm1, %v115_v20  ;;  %6603 = vmatprep.mubr.msk.f32.mxu0 %vm8036_vm0, %v8037_v6  ;;  %v6822_v28 = vpop.f32.mrb[61].mxu1  ;;  %v9204_v31 = vadd.f32 %v2068_v26, %v1003_v21 }
 0x155   :  { %6982 = vmatprep.mubr.msk.f32.mxu1 %vm8036_vm0, %v8037_v6  ;;  %v245_v28 = vld [vmem:[%s12302_s1 + $0x2c0] sm:$0xff] }
 0x156   :  { %v1008_v36 = vpop.f32.mrb[62].mxu0 }
 0x157   :  { %v6446_v38 = vpop.f32.mrb[63].mxu0  ;;  %6604 = vmatmul.mubr.msk.f32.gmra.mrb[168].mxu0 %vm411_vm1, %v241_v29  ;;  %v2073_v39 = vpop.f32.mrb[62].mxu1 }
 0x158   :  { %6983 = vmatmul.mubr.msk.f32.gmra.mrb[168].mxu1 %vm411_vm1, %v116_v32  ;;  %6606 = vmatprep.mubr.msk.f32.mxu0 %vm8036_vm0, %v8037_v6  ;;  %v6825_v40 = vpop.f32.mrb[63].mxu1  ;;  %v9218_v42 = vadd.f32 %v2073_v39, %v1008_v36 }
 0x159   :  { %6985 = vmatprep.mubr.msk.f32.mxu1 %vm8036_vm0, %v8037_v6  ;;  %v246_v40 = vld [vmem:[%s12302_s1 + $0x2c8] sm:$0xff] }
 0x15a   :  { %v1013_v48 = vpop.f32.mrb[64].mxu0 }
 0x15b   :  { %v6449_v49 = vpop.f32.mrb[65].mxu0  ;;  %6607 = vmatmul.mubr.msk.f32.gmra.mrb[170].mxu0 %vm411_vm1, %v242_v41  ;;  %v2078_v50 = vpop.f32.mrb[64].mxu1 }
 0x15c   :  { %6986 = vmatmul.mubr.msk.f32.gmra.mrb[170].mxu1 %vm411_vm1, %v117_v47  ;;  %6609 = vmatprep.mubr.msk.f32.mxu0 %vm8036_vm0, %v8037_v6  ;;  %v6828_v53 = vpop.f32.mrb[65].mxu1  ;;  %v9238_v61 = vadd.f32 %v2078_v50, %v1013_v48  ;;  %v121_v47 = vld [vmem:[%s12303_s0 + $0x2c8] sm:$0xff] }
 0x15d   :  { %6988 = vmatprep.mubr.msk.f32.mxu1 %vm8036_vm0, %v8037_v6 }
 0x15e   :  { %v1018_v3 = vpop.f32.mrb[66].mxu0 }
 0x15f   :  { %v6452_v8 = vpop.f32.mrb[67].mxu0  ;;  %6610 = vmatmul.mubr.msk.f32.gmra.mrb[172].mxu0 %vm411_vm1, %v243_v55  ;;  %v2083_v9 = vpop.f32.mrb[66].mxu1  ;;  %v247_v55 = vld [vmem:[%s12302_s1 + $0x2d0] sm:$0xff] }
 0x160   :  { %6989 = vmatmul.mubr.msk.f32.gmra.mrb[172].mxu1 %vm411_vm1, %v118_v62  ;;  %6612 = vmatprep.mubr.msk.f32.mxu0 %vm8036_vm0, %v8037_v6  ;;  %v6831_v10 = vpop.f32.mrb[67].mxu1  ;;  %v9252_v14 = vadd.f32 %v2083_v9, %v1018_v3  ;;  %v248_v9 = vld [vmem:[%s12302_s1 + $0x2d8] sm:$0xff] }
 0x161   :  { %6991 = vmatprep.mubr.msk.f32.mxu1 %vm8036_vm0, %v8037_v6 }
 0x162   :  { %v1023_v20 = vpop.f32.mrb[68].mxu0 }
 0x163   :  { %v6455_v21 = vpop.f32.mrb[69].mxu0  ;;  %6613 = vmatmul.mubr.msk.f32.gmra.mrb[174].mxu0 %vm411_vm1, %v244_v13  ;;  %v2088_v24 = vpop.f32.mrb[68].mxu1  ;;  %v123_v13 = vld [vmem:[%s12303_s0 + $0x2d8] sm:$0xff] }
 0x164   :  { %6992 = vmatmul.mubr.msk.f32.gmra.mrb[174].mxu1 %vm411_vm1, %v119_v17  ;;  %6615 = vmatprep.mubr.msk.f32.mxu0 %vm8036_vm0, %v8037_v6  ;;  %v6834_v26 = vpop.f32.mrb[69].mxu1  ;;  %v9267_v29 = vadd.f32 %v2088_v24, %v1023_v20 }
 0x165   :  { %6994 = vmatprep.mubr.msk.f32.mxu1 %vm8036_vm0, %v8037_v6  ;;  %v249_v26 = vld [vmem:[%s12302_s1 + $0x2e0] sm:$0xff] }
 0x166   :  { %v1028_v32 = vpop.f32.mrb[70].mxu0 }
 0x167   :  { %v6458_v36 = vpop.f32.mrb[71].mxu0  ;;  %6616 = vmatmul.mubr.msk.f32.gmra.mrb[176].mxu0 %vm411_vm1, %v245_v28  ;;  %v2093_v38 = vpop.f32.mrb[70].mxu1 }
 0x168   :  { %6995 = vmatmul.mubr.msk.f32.gmra.mrb[176].mxu1 %vm411_vm1, %v120_v0  ;;  %6618 = vmatprep.mubr.msk.f32.mxu0 %vm8036_vm0, %v8037_v6  ;;  %v6837_v39 = vpop.f32.mrb[71].mxu1  ;;  %v9281_v41 = vadd.f32 %v2093_v38, %v1028_v32  ;;  %v124_v0 = vld [vmem:[%s12303_s0 + $0x2e0] sm:$0xff] }
 0x169   :  { %6997 = vmatprep.mubr.msk.f32.mxu1 %vm8036_vm0, %v8037_v6 }
 0x16a   :  { %v1033_v48 = vpop.f32.mrb[72].mxu0 }
 0x16b   :  { %v6461_v49 = vpop.f32.mrb[73].mxu0  ;;  %6619 = vmatmul.mubr.msk.f32.gmra.mrb[178].mxu0 %vm411_vm1, %v246_v40  ;;  %v2098_v50 = vpop.f32.mrb[72].mxu1  ;;  %v250_v40 = vld [vmem:[%s12302_s1 + $0x2e8] sm:$0xff] }
 0x16c   :  { %6998 = vmatmul.mubr.msk.f32.gmra.mrb[178].mxu1 %vm411_vm1, %v121_v47  ;;  %6621 = vmatprep.mubr.msk.f32.mxu0 %vm8036_vm0, %v8037_v6  ;;  %v6840_v53 = vpop.f32.mrb[73].mxu1  ;;  %v9295_v57 = vadd.f32 %v2098_v50, %v1033_v48  ;;  %v125_v48 = vld [vmem:[%s12303_s0 + $0x2e8] sm:$0xff] }
 0x16d   :  { %7000 = vmatprep.mubr.msk.f32.mxu1 %vm8036_vm0, %v8037_v6 }
 0x16e   :  { %v1038_v62 = vpop.f32.mrb[74].mxu0 }
 0x16f   :  { %v6464_v1 = vpop.f32.mrb[75].mxu0  ;;  %6622 = vmatmul.mubr.msk.f32.gmra.mrb[180].mxu0 %vm411_vm1, %v247_v55  ;;  %v2103_v3 = vpop.f32.mrb[74].mxu1 }
 0x170   :  { %7001 = vmatmul.mubr.msk.f32.gmra.mrb[180].mxu1 %vm411_vm1, %v122_v59  ;;  %6624 = vmatprep.mubr.msk.f32.mxu0 %vm8036_vm0, %v8037_v6  ;;  %v6843_v8 = vpop.f32.mrb[75].mxu1  ;;  %v9309_v10 = vadd.f32 %v2103_v3, %v1038_v62  ;;  %v251_v59 = vld [vmem:[%s12302_s1 + $0x2f0] sm:$0xff] }
 0x171   :  { %7003 = vmatprep.mubr.msk.f32.mxu1 %vm8036_vm0, %v8037_v6  ;;  %v126_v1 = vld [vmem:[%s12303_s0 + $0x2f0] sm:$0xff] }
 0x172   :  { %v1043_v17 = vpop.f32.mrb[76].mxu0 }
 0x173   :  { %v6467_v20 = vpop.f32.mrb[77].mxu0  ;;  %6625 = vmatmul.mubr.msk.f32.gmra.mrb[182].mxu0 %vm411_vm1, %v248_v9  ;;  %v2108_v21 = vpop.f32.mrb[76].mxu1 }
 0x174   :  { %7004 = vmatmul.mubr.msk.f32.gmra.mrb[182].mxu1 %vm411_vm1, %v123_v13  ;;  %6627 = vmatprep.mubr.msk.f32.mxu0 %vm8036_vm0, %v8037_v6  ;;  %v6846_v24 = vpop.f32.mrb[77].mxu1  ;;  %v9323_v28 = vadd.f32 %v2108_v21, %v1043_v17  ;;  %v252_v17 = vld [vmem:[%s12302_s1 + $0x2f8] sm:$0xff] }
 0x175   :  { %7006 = vmatprep.mubr.msk.f32.mxu1 %vm8036_vm0, %v8037_v6  ;;  %v127_v21 = vld [vmem:[%s12303_s0 + $0x2f8] sm:$0xff] }
 0x176   :  { %v1048_v32 = vpop.f32.mrb[78].mxu0 }
 0x177   :  { %v6470_v36 = vpop.f32.mrb[79].mxu0  ;;  %6628 = vmatmul.mubr.msk.f32.gmra.mrb[184].mxu0 %vm411_vm1, %v249_v26  ;;  %v2113_v38 = vpop.f32.mrb[78].mxu1 }
 0x178   :  { %7007 = vmatmul.mubr.msk.f32.gmra.mrb[184].mxu1 %vm411_vm1, %v124_v0  ;;  %6630 = vmatprep.mubr.msk.f32.mxu0 %vm8036_vm0, %v8037_v6  ;;  %v6849_v39 = vpop.f32.mrb[79].mxu1  ;;  %v9337_v47 = vadd.f32 %v2113_v38, %v1048_v32  ;;  %v253_v36 = vld [vmem:[%s12302_s1 + $0x300] sm:$0xff] }
 0x179   :  { %7009 = vmatprep.mubr.msk.f32.mxu1 %vm8036_vm0, %v8037_v6  ;;  %v128_v39 = vld [vmem:[%s12303_s0 + $0x300] sm:$0xff] }
 0x17a   :  { %v1053_v49 = vpop.f32.mrb[80].mxu0 }
 0x17b   :  { %v6473_v50 = vpop.f32.mrb[81].mxu0  ;;  %6631 = vmatmul.mubr.msk.f32.gmra.mrb[186].mxu0 %vm411_vm1, %v250_v40  ;;  %v2118_v53 = vpop.f32.mrb[80].mxu1 }
 0x17c   :  { %7010 = vmatmul.mubr.msk.f32.gmra.mrb[186].mxu1 %vm411_vm1, %v125_v48  ;;  %6633 = vmatprep.mubr.msk.f32.mxu0 %vm8036_vm0, %v8037_v6  ;;  %v6852_v55 = vpop.f32.mrb[81].mxu1  ;;  %v9351_v62 = vadd.f32 %v2118_v53, %v1053_v49  ;;  %v254_v53 = vld [vmem:[%s12302_s1 + $0x308] sm:$0xff] }
 0x17d   :  { %7012 = vmatprep.mubr.msk.f32.mxu1 %vm8036_vm0, %v8037_v6 }
 0x17e   :  { %v1058_v3 = vpop.f32.mrb[82].mxu0 }
 0x17f   :  { %v6476_v8 = vpop.f32.mrb[83].mxu0  ;;  %6634 = vmatmul.mubr.msk.f32.gmra.mrb[188].mxu0 %vm411_vm1, %v251_v59  ;;  %v2123_v9 = vpop.f32.mrb[82].mxu1  ;;  %v129_v59 = vld [vmem:[%s12303_s0 + $0x308] sm:$0xff] }
 0x180   :  { %7013 = vmatmul.mubr.msk.f32.gmra.mrb[188].mxu1 %vm411_vm1, %v126_v1  ;;  %6636 = vmatprep.mubr.msk.f32.mxu0 %vm8036_vm0, %v8037_v6  ;;  %v6855_v13 = vpop.f32.mrb[83].mxu1  ;;  %v9365_v20 = vadd.f32 %v2123_v9, %v1058_v3 }
 0x181   :  { %7015 = vmatprep.mubr.msk.f32.mxu1 %vm8036_vm0, %v8037_v6  ;;  %v255_v13 = vld [vmem:[%s12302_s1 + $0x310] sm:$0xff] }
 0x182   :  { %v1063_v24 = vpop.f32.mrb[84].mxu0 }
 0x183   :  { %v6479_v26 = vpop.f32.mrb[85].mxu0  ;;  %6637 = vmatmul.mubr.msk.f32.gmra.mrb[190].mxu0 %vm411_vm1, %v252_v17  ;;  %v2128_v0 = vpop.f32.mrb[84].mxu1 }
 0x184   :  { %7016 = vmatmul.mubr.msk.f32.gmra.mrb[190].mxu1 %vm411_vm1, %v127_v21  ;;  %6639 = vmatprep.mubr.msk.f32.mxu0 %vm8036_vm0, %v8037_v6  ;;  %v6858_v32 = vpop.f32.mrb[85].mxu1  ;;  %v9379_v38 = vadd.f32 %v2128_v0, %v1063_v24  ;;  %v130_v21 = vld [vmem:[%s12303_s0 + $0x310] sm:$0xff] }
 0x185   :  { %7018 = vmatprep.mubr.msk.f32.mxu1 %vm8036_vm0, %v8037_v6 }
 0x186   :  { %v1068_v40 = vpop.f32.mrb[86].mxu0 }
 0x187   :  { %v6482_v48 = vpop.f32.mrb[87].mxu0  ;;  %6640 = vmatmul.mubr.msk.f32.gmra.mrb[192].mxu0 %vm411_vm1, %v253_v36  ;;  %v2133_v49 = vpop.f32.mrb[86].mxu1  ;;  %v256_v36 = vld [vmem:[%s12302_s1 + $0x318] sm:$0xff] }
 0x188   :  { %7019 = vmatmul.mubr.msk.f32.gmra.mrb[192].mxu1 %vm411_vm1, %v128_v39  ;;  %6642 = vmatprep.mubr.msk.f32.mxu0 %vm8036_vm0, %v8037_v6  ;;  %v6861_v50 = vpop.f32.mrb[87].mxu1  ;;  %v9393_v55 = vadd.f32 %v2133_v49, %v1068_v40  ;;  %v131_v40 = vld [vmem:[%s12303_s0 + $0x318] sm:$0xff] }
 0x189   :  { %7021 = vmatprep.mubr.msk.f32.mxu1 %vm8036_vm0, %v8037_v6 }
 0x18a   :  { %v1073_v1 = vpop.f32.mrb[88].mxu0 }
 0x18b   :  { %v6485_v3 = vpop.f32.mrb[89].mxu0  ;;  %6643 = vmatmul.mubr.msk.f32.gmra.mrb[194].mxu0 %vm411_vm1, %v254_v53  ;;  %v2138_v8 = vpop.f32.mrb[88].mxu1 }
 0x18c   :  { %7022 = vmatmul.mubr.msk.f32.gmra.mrb[194].mxu1 %vm411_vm1, %v129_v59  ;;  %6645 = vmatprep.mubr.msk.f32.mxu0 %vm8036_vm0, %v8037_v6  ;;  %v6864_v9 = vpop.f32.mrb[89].mxu1  ;;  %v9407_v17 = vadd.f32 %v2138_v8, %v1073_v1  ;;  %v257_v59 = vld [vmem:[%s12302_s1 + $0x320] sm:$0xff] }
 0x18d   :  { %7024 = vmatprep.mubr.msk.f32.mxu1 %vm8036_vm0, %v8037_v6  ;;  %v132_v3 = vld [vmem:[%s12303_s0 + $0x320] sm:$0xff] }
 0x18e   :  { %v1078_v24 = vpop.f32.mrb[90].mxu0 }
 0x18f   :  { %v6488_v26 = vpop.f32.mrb[91].mxu0  ;;  %6646 = vmatmul.mubr.msk.f32.gmra.mrb[196].mxu0 %vm411_vm1, %v255_v13  ;;  %v2143_v0 = vpop.f32.mrb[90].mxu1 }
 0x190   :  { %7025 = vmatmul.mubr.msk.f32.gmra.mrb[196].mxu1 %vm411_vm1, %v130_v21  ;;  %6648 = vmatprep.mubr.msk.f32.mxu0 %vm8036_vm0, %v8037_v6  ;;  %v6867_v32 = vpop.f32.mrb[91].mxu1  ;;  %v9421_v39 = vadd.f32 %v2143_v0, %v1078_v24  ;;  %v258_v24 = vld [vmem:[%s12302_s1 + $0x328] sm:$0xff] }
 0x191   :  { %7027 = vmatprep.mubr.msk.f32.mxu1 %vm8036_vm0, %v8037_v6  ;;  %v133_v0 = vld [vmem:[%s12303_s0 + $0x328] sm:$0xff] }
 0x192   :  { %v1083_v48 = vpop.f32.mrb[92].mxu0 }
 0x193   :  { %v6491_v49 = vpop.f32.mrb[93].mxu0  ;;  %6649 = vmatmul.mubr.msk.f32.gmra.mrb[198].mxu0 %vm411_vm1, %v256_v36  ;;  %v2148_v50 = vpop.f32.mrb[92].mxu1 }
 0x194   :  { %7028 = vmatmul.mubr.msk.f32.gmra.mrb[198].mxu1 %vm411_vm1, %v131_v40  ;;  %6651 = vmatprep.mubr.msk.f32.mxu0 %vm8036_vm0, %v8037_v6  ;;  %v6870_v53 = vpop.f32.mrb[93].mxu1  ;;  %v9435_v1 = vadd.f32 %v2148_v50, %v1083_v48  ;;  %v259_v49 = vld [vmem:[%s12302_s1 + $0x330] sm:$0xff] }
 0x195   :  { %7030 = vmatprep.mubr.msk.f32.mxu1 %vm8036_vm0, %v8037_v6  ;;  %v134_v53 = vld [vmem:[%s12303_s0 + $0x330] sm:$0xff] }
 0x196   :  { %v1088_v8 = vpop.f32.mrb[94].mxu0 }
 0x197   :  { %v6494_v9 = vpop.f32.mrb[95].mxu0  ;;  %6652 = vmatmul.mubr.msk.f32.gmra.mrb[200].mxu0 %vm411_vm1, %v257_v59  ;;  %v2153_v13 = vpop.f32.mrb[94].mxu1 }
 0x198   :  { %7031 = vmatmul.mubr.msk.f32.gmra.mrb[200].mxu1 %vm411_vm1, %v132_v3  ;;  %6654 = vmatprep.mubr.msk.f32.mxu0 %vm8036_vm0, %v8037_v6  ;;  %v6873_v21 = vpop.f32.mrb[95].mxu1  ;;  %v9449_v26 = vadd.f32 %v2153_v13, %v1088_v8  ;;  %v260_v13 = vld [vmem:[%s12302_s1 + $0x338] sm:$0xff] }
 0x199   :  { %7033 = vmatprep.mubr.msk.f32.mxu1 %vm8036_vm0, %v8037_v6 }
 0x19a   :  { %v1093_v32 = vpop.f32.mrb[96].mxu0 }
 0x19b   :  { %v6497_v36 = vpop.f32.mrb[97].mxu0  ;;  %6655 = vmatmul.mubr.msk.f32.gmra.mrb[202].mxu0 %vm411_vm1, %v258_v24  ;;  %v2158_v40 = vpop.f32.mrb[96].mxu1  ;;  %v135_v24 = vld [vmem:[%s12303_s0 + $0x338] sm:$0xff] }
 0x19c   :  { %7034 = vmatmul.mubr.msk.f32.gmra.mrb[202].mxu1 %vm411_vm1, %v133_v0  ;;  %6657 = vmatprep.mubr.msk.f32.mxu0 %vm8036_vm0, %v8037_v6  ;;  %v6876_v48 = vpop.f32.mrb[97].mxu1  ;;  %v9463_v50 = vadd.f32 %v2158_v40, %v1093_v32 }
 0x19d   :  { %7036 = vmatprep.mubr.msk.f32.mxu1 %vm8036_vm0, %v8037_v6  ;;  %v261_v48 = vld [vmem:[%s12302_s1 + $0x340] sm:$0xff] }
 0x19e   :  { %v1098_v59 = vpop.f32.mrb[98].mxu0 }
 0x19f   :  { %v6500_v3 = vpop.f32.mrb[99].mxu0  ;;  %6658 = vmatmul.mubr.msk.f32.gmra.mrb[204].mxu0 %vm411_vm1, %v259_v49  ;;  %v2163_v8 = vpop.f32.mrb[98].mxu1 }
 0x1a0   :  { %7037 = vmatmul.mubr.msk.f32.gmra.mrb[204].mxu1 %vm411_vm1, %v134_v53  ;;  %6660 = vmatprep.mubr.msk.f32.mxu0 %vm8036_vm0, %v8037_v6  ;;  %v6879_v9 = vpop.f32.mrb[99].mxu1  ;;  %v9477_v21 = vadd.f32 %v2163_v8, %v1098_v59  ;;  %v136_v53 = vld [vmem:[%s12303_s0 + $0x340] sm:$0xff] }
 0x1a1   :  { %7039 = vmatprep.mubr.msk.f32.mxu1 %vm8036_vm0, %v8037_v6 }
 0x1a2   :  { %v1103_v0 = vpop.f32.mrb[100].mxu0 }
 0x1a3   :  { %v6503_v32 = vpop.f32.mrb[101].mxu0  ;;  %6661 = vmatmul.mubr.msk.f32.gmra.mrb[206].mxu0 %vm411_vm1, %v260_v13  ;;  %v2168_v36 = vpop.f32.mrb[100].mxu1  ;;  %v262_v13 = vld [vmem:[%s12302_s1 + $0x348] sm:$0xff] }
 0x1a4   :  { %7040 = vmatmul.mubr.msk.f32.gmra.mrb[206].mxu1 %vm411_vm1, %v135_v24  ;;  %6663 = vmatprep.mubr.msk.f32.mxu0 %vm8036_vm0, %v8037_v6  ;;  %v6882_v40 = vpop.f32.mrb[101].mxu1  ;;  %v9491_v49 = vadd.f32 %v2168_v36, %v1103_v0  ;;  %v137_v0 = vld [vmem:[%s12303_s0 + $0x348] sm:$0xff] }
 0x1a5   :  { %7042 = vmatprep.mubr.msk.f32.mxu1 %vm8036_vm0, %v8037_v6 }
 0x1a6   :  { %12309 = vst [vmem:[#allocation2_spill] sm:$0xff] %v9491_v49  ;;  %v1108_v59 = vpop.f32.mrb[102].mxu0 }
 0x1a7   :  { %v6506_v3 = vpop.f32.mrb[103].mxu0  ;;  %6664 = vmatmul.mubr.msk.f32.gmra.mrb[208].mxu0 %vm411_vm1, %v261_v48  ;;  %v2173_v8 = vpop.f32.mrb[102].mxu1 }
 0x1a8   :  { %7043 = vmatmul.mubr.msk.f32.gmra.mrb[208].mxu1 %vm411_vm1, %v136_v53  ;;  %6666 = vmatprep.mubr.msk.f32.mxu0 %vm8036_vm0, %v8037_v6  ;;  %v6885_v9 = vpop.f32.mrb[103].mxu1  ;;  %v9505_v24 = vadd.f32 %v2173_v8, %v1108_v59  ;;  %v263_v53 = vld [vmem:[%s12302_s1 + $0x350] sm:$0xff] }
 0x1a9   :  { %7045 = vmatprep.mubr.msk.f32.mxu1 %vm8036_vm0, %v8037_v6  ;;  %v138_v3 = vld [vmem:[%s12303_s0 + $0x350] sm:$0xff] }
 0x1aa   :  { %12310 = vst [vmem:[#allocation3_spill] sm:$0xff] %v9505_v24  ;;  %v1113_v32 = vpop.f32.mrb[104].mxu0 }
 0x1ab   :  { %v6509_v36 = vpop.f32.mrb[105].mxu0  ;;  %6667 = vmatmul.mubr.msk.f32.gmra.mrb[210].mxu0 %vm411_vm1, %v262_v13  ;;  %v2178_v40 = vpop.f32.mrb[104].mxu1 }
 0x1ac   :  { %7046 = vmatmul.mubr.msk.f32.gmra.mrb[210].mxu1 %vm411_vm1, %v137_v0  ;;  %6669 = vmatprep.mubr.msk.f32.mxu0 %vm8036_vm0, %v8037_v6  ;;  %v6888_v48 = vpop.f32.mrb[105].mxu1  ;;  %v9519_v59 = vadd.f32 %v2178_v40, %v1113_v32  ;;  %v264_v32 = vld [vmem:[%s12302_s1 + $0x358] sm:$0xff] }
 0x1ad   :  { %7048 = vmatprep.mubr.msk.f32.mxu1 %vm8036_vm0, %v8037_v6  ;;  %v139_v40 = vld [vmem:[%s12303_s0 + $0x358] sm:$0xff] }
 0x1ae   :  { %12311 = vst [vmem:[#allocation4_spill] sm:$0xff] %v9519_v59  ;;  %v1118_v8 = vpop.f32.mrb[106].mxu0 }
 0x1af   :  { %v6512_v9 = vpop.f32.mrb[107].mxu0  ;;  %6670 = vmatmul.mubr.msk.f32.gmra.mrb[212].mxu0 %vm411_vm1, %v263_v53  ;;  %v2183_v13 = vpop.f32.mrb[106].mxu1 }
 0x1b0   :  { %7049 = vmatmul.mubr.msk.f32.gmra.mrb[212].mxu1 %vm411_vm1, %v138_v3  ;;  %6672 = vmatprep.mubr.msk.f32.mxu0 %vm8036_vm0, %v8037_v6  ;;  %v6891_v0 = vpop.f32.mrb[107].mxu1  ;;  %v9533_v36 = vadd.f32 %v2183_v13, %v1118_v8  ;;  %v265_v8 = vld [vmem:[%s12302_s1 + $0x360] sm:$0xff] }
 0x1b1   :  { %7051 = vmatprep.mubr.msk.f32.mxu1 %vm8036_vm0, %v8037_v6  ;;  %v140_v0 = vld [vmem:[%s12303_s0 + $0x360] sm:$0xff] }
 0x1b2   :  { %12312 = vst [vmem:[#allocation5_spill] sm:$0xff] %v9533_v36  ;;  %v1123_v48 = vpop.f32.mrb[108].mxu0  ;;  %v149_v36 = vld [vmem:[%s12303_s0 + $0x3a8] sm:$0xff] }
 0x1b3   :  { %v6515_v53 = vpop.f32.mrb[109].mxu0  ;;  %6673 = vmatmul.mubr.msk.f32.gmra.mrb[214].mxu0 %vm411_vm1, %v264_v32  ;;  %v2188_v3 = vpop.f32.mrb[108].mxu1 }
 0x1b4   :  { %7052 = vmatmul.mubr.msk.f32.gmra.mrb[214].mxu1 %vm411_vm1, %v139_v40  ;;  %6675 = vmatprep.mubr.msk.f32.mxu0 %vm8036_vm0, %v8037_v6  ;;  %v6894_v9 = vpop.f32.mrb[109].mxu1  ;;  %v9547_v13 = vadd.f32 %v2188_v3, %v1123_v48  ;;  %v266_v48 = vld [vmem:[%s12302_s1 + $0x368] sm:$0xff] }
 0x1b5   :  { %7054 = vmatprep.mubr.msk.f32.mxu1 %vm8036_vm0, %v8037_v6 }
 0x1b6   :  { %12313 = vst [vmem:[#allocation6_spill] sm:$0xff] %v9547_v13  ;;  %v1128_v32 = vpop.f32.mrb[110].mxu0 }
 0x1b7   :  { %v6518_v53 = vpop.f32.mrb[111].mxu0  ;;  %6676 = vmatmul.mubr.msk.f32.gmra.mrb[216].mxu0 %vm411_vm1, %v265_v8  ;;  %v2193_v40 = vpop.f32.mrb[110].mxu1  ;;  %v141_v8 = vld [vmem:[%s12303_s0 + $0x368] sm:$0xff] }
 0x1b8   :  { %7055 = vmatmul.mubr.msk.f32.gmra.mrb[216].mxu1 %vm411_vm1, %v140_v0  ;;  %6678 = vmatprep.mubr.msk.f32.mxu0 %vm8036_vm0, %v8037_v6  ;;  %v6897_v9 = vpop.f32.mrb[111].mxu1  ;;  %v9561_v3 = vadd.f32 %v2193_v40, %v1128_v32  ;;  %v267_v32 = vld [vmem:[%s12302_s1 + $0x370] sm:$0xff] }
 0x1b9   :  { %7057 = vmatprep.mubr.msk.f32.mxu1 %vm8036_vm0, %v8037_v6 }
 0x1ba   :  { %12314 = vst [vmem:[#allocation7_spill] sm:$0xff] %v9561_v3  ;;  %v1133_v53 = vpop.f32.mrb[112].mxu0 }
 0x1bb   :  { %v6521_v13 = vpop.f32.mrb[113].mxu0  ;;  %6679 = vmatmul.mubr.msk.f32.gmra.mrb[218].mxu0 %vm411_vm1, %v266_v48  ;;  %v2198_v0 = vpop.f32.mrb[112].mxu1 }
 0x1bc   :  { %7058 = vmatmul.mubr.msk.f32.gmra.mrb[218].mxu1 %vm411_vm1, %v141_v8  ;;  %6681 = vmatprep.mubr.msk.f32.mxu0 %vm8036_vm0, %v8037_v6  ;;  %v6900_v9 = vpop.f32.mrb[113].mxu1  ;;  %v9575_v40 = vadd.f32 %v2198_v0, %v1133_v53  ;;  %v142_v13 = vld [vmem:[%s12303_s0 + $0x370] sm:$0xff]  ;;  %v268_v53 = vld [vmem:[%s12302_s1 + $0x378] sm:$0xff] }
 0x1bd   :  { %7060 = vmatprep.mubr.msk.f32.mxu1 %vm8036_vm0, %v8037_v6 }
 0x1be   :  { %12315 = vst [vmem:[#allocation8_spill] sm:$0xff] %v9575_v40  ;;  %v1138_v48 = vpop.f32.mrb[114].mxu0 }
 0x1bf   :  { %v6524_v3 = vpop.f32.mrb[115].mxu0  ;;  %6682 = vmatmul.mubr.msk.f32.gmra.mrb[220].mxu0 %vm411_vm1, %v267_v32  ;;  %v2203_v8 = vpop.f32.mrb[114].mxu1 }
 0x1c0   :  { %7061 = vmatmul.mubr.msk.f32.gmra.mrb[220].mxu1 %vm411_vm1, %v142_v13  ;;  %6684 = vmatprep.mubr.msk.f32.mxu0 %vm8036_vm0, %v8037_v6  ;;  %v6903_v9 = vpop.f32.mrb[115].mxu1  ;;  %v9589_v0 = vadd.f32 %v2203_v8, %v1138_v48  ;;  %v143_v3 = vld [vmem:[%s12303_s0 + $0x378] sm:$0xff]  ;;  %v269_v48 = vld [vmem:[%s12302_s1 + $0x380] sm:$0xff] }
 0x1c1   :  { %7063 = vmatprep.mubr.msk.f32.mxu1 %vm8036_vm0, %v8037_v6 }
 0x1c2   :  { %12316 = vst [vmem:[#allocation9_spill] sm:$0xff] %v9589_v0  ;;  %v1143_v32 = vpop.f32.mrb[116].mxu0 }
 0x1c3   :  { %v6527_v40 = vpop.f32.mrb[117].mxu0  ;;  %6685 = vmatmul.mubr.msk.f32.gmra.mrb[222].mxu0 %vm411_vm1, %v268_v53  ;;  %v2208_v13 = vpop.f32.mrb[116].mxu1 }
 0x1c4   :  { %7064 = vmatmul.mubr.msk.f32.gmra.mrb[222].mxu1 %vm411_vm1, %v143_v3  ;;  %6687 = vmatprep.mubr.msk.f32.mxu0 %vm8036_vm0, %v8037_v6  ;;  %v6906_v9 = vpop.f32.mrb[117].mxu1  ;;  %v9603_v8 = vadd.f32 %v2208_v13, %v1143_v32  ;;  %v144_v40 = vld [vmem:[%s12303_s0 + $0x380] sm:$0xff]  ;;  %v270_v32 = vld [vmem:[%s12302_s1 + $0x388] sm:$0xff] }
 0x1c5   :  { %7066 = vmatprep.mubr.msk.f32.mxu1 %vm8036_vm0, %v8037_v6 }
 0x1c6   :  { %12317 = vst [vmem:[#allocation10_spill] sm:$0xff] %v9603_v8  ;;  %v1148_v53 = vpop.f32.mrb[118].mxu0 }
 0x1c7   :  { %v6530_v0 = vpop.f32.mrb[119].mxu0  ;;  %6688 = vmatmul.mubr.msk.f32.gmra.mrb[224].mxu0 %vm411_vm1, %v269_v48  ;;  %v2213_v3 = vpop.f32.mrb[118].mxu1 }
 0x1c8   :  { %7067 = vmatmul.mubr.msk.f32.gmra.mrb[224].mxu1 %vm411_vm1, %v144_v40  ;;  %6690 = vmatprep.mubr.msk.f32.mxu0 %vm8036_vm0, %v8037_v6  ;;  %v6909_v9 = vpop.f32.mrb[119].mxu1  ;;  %v9617_v13 = vadd.f32 %v2213_v3, %v1148_v53  ;;  %v145_v0 = vld [vmem:[%s12303_s0 + $0x388] sm:$0xff]  ;;  %v271_v53 = vld [vmem:[%s12302_s1 + $0x390] sm:$0xff] }
 0x1c9   :  { %7069 = vmatprep.mubr.msk.f32.mxu1 %vm8036_vm0, %v8037_v6 }
 0x1ca   :  { %12318 = vst [vmem:[#allocation11_spill] sm:$0xff] %v9617_v13  ;;  %v1153_v48 = vpop.f32.mrb[120].mxu0 }
 0x1cb   :  { %v6533_v8 = vpop.f32.mrb[121].mxu0  ;;  %6691 = vmatmul.mubr.msk.f32.gmra.mrb[226].mxu0 %vm411_vm1, %v270_v32  ;;  %v2218_v40 = vpop.f32.mrb[120].mxu1 }
 0x1cc   :  { %7070 = vmatmul.mubr.msk.f32.gmra.mrb[226].mxu1 %vm411_vm1, %v145_v0  ;;  %6693 = vmatprep.mubr.msk.f32.mxu0 %vm8036_vm0, %v8037_v6  ;;  %v6912_v9 = vpop.f32.mrb[121].mxu1  ;;  %v9631_v3 = vadd.f32 %v2218_v40, %v1153_v48  ;;  %v146_v8 = vld [vmem:[%s12303_s0 + $0x390] sm:$0xff]  ;;  %v272_v48 = vld [vmem:[%s12302_s1 + $0x398] sm:$0xff] }
 0x1cd   :  { %7072 = vmatprep.mubr.msk.f32.mxu1 %vm8036_vm0, %v8037_v6 }
 0x1ce   :  { %12319 = vst [vmem:[#allocation12_spill] sm:$0xff] %v9631_v3  ;;  %v1158_v32 = vpop.f32.mrb[122].mxu0 }
 0x1cf   :  { %v6536_v13 = vpop.f32.mrb[123].mxu0  ;;  %6694 = vmatmul.mubr.msk.f32.gmra.mrb[228].mxu0 %vm411_vm1, %v271_v53  ;;  %v2223_v0 = vpop.f32.mrb[122].mxu1 }
 0x1d0   :  { %7073 = vmatmul.mubr.msk.f32.gmra.mrb[228].mxu1 %vm411_vm1, %v146_v8  ;;  %6696 = vmatprep.mubr.msk.f32.mxu0 %vm8036_vm0, %v8037_v6  ;;  %v6915_v9 = vpop.f32.mrb[123].mxu1  ;;  %v9645_v40 = vadd.f32 %v2223_v0, %v1158_v32  ;;  %v147_v13 = vld [vmem:[%s12303_s0 + $0x398] sm:$0xff]  ;;  %v273_v32 = vld [vmem:[%s12302_s1 + $0x3a0] sm:$0xff] }
 0x1d1   :  { %7075 = vmatprep.mubr.msk.f32.mxu1 %vm8036_vm0, %v8037_v6 }
 0x1d2   :  { %12320 = vst [vmem:[#allocation13_spill] sm:$0xff] %v9645_v40  ;;  %v1163_v53 = vpop.f32.mrb[124].mxu0 }
 0x1d3   :  { %v6539_v3 = vpop.f32.mrb[125].mxu0  ;;  %6697 = vmatmul.mubr.msk.f32.gmra.mrb[230].mxu0 %vm411_vm1, %v272_v48  ;;  %v2228_v8 = vpop.f32.mrb[124].mxu1 }
 0x1d4   :  { %7076 = vmatmul.mubr.msk.f32.gmra.mrb[230].mxu1 %vm411_vm1, %v147_v13  ;;  %6699 = vmatprep.mubr.msk.f32.mxu0 %vm8036_vm0, %v8037_v6  ;;  %v6918_v9 = vpop.f32.mrb[125].mxu1  ;;  %v9659_v0 = vadd.f32 %v2228_v8, %v1163_v53  ;;  %v148_v3 = vld [vmem:[%s12303_s0 + $0x3a0] sm:$0xff]  ;;  %v4001_v53 = vld [vmem:[%s12304_s7 + $0x38] sm:$0xff] }
 0x1d5   :  { %7078 = vmatprep.mubr.msk.f32.mxu1 %vm8036_vm0, %v8037_v6  ;;  %v4000_v9 = vld [vmem:[%s12304_s7 + $0x30] sm:$0xff] }
 0x1d6   :  { %12321 = vst [vmem:[#allocation14_spill] sm:$0xff] %v9659_v0  ;;  %v1168_v48 = vpop.f32.mrb[126].mxu0 }
 0x1d7   :  { %v6542_v40 = vpop.f32.mrb[127].mxu0  ;;  %6700 = vmatmul.mubr.msk.f32.gmra.mrb[232].mxu0 %vm411_vm1, %v273_v32  ;;  %v2233_v13 = vpop.f32.mrb[126].mxu1  ;;  %v7901_v32 = vpack.c.bf16 %v4001_v53, %v4000_v9  ;;  %v150_v53 = vld [vmem:[%s12303_s0 + $0x3b0] sm:$0xff] }
 0x1d8   :  { %7079 = vmatmul.mubr.msk.f32.gmra.mrb[232].mxu1 %vm411_vm1, %v148_v3  ;;  %6702 = vmatprep.mubr.msk.f32.mxu0 %vm8036_vm0, %v8037_v6  ;;  %v6921_v8 = vpop.f32.mrb[127].mxu1  ;;  %v274_v40 = vld [vmem:[%s12302_s1 + $0x3a8] sm:$0xff]  ;;  %v9679_v0 = vadd.f32 %v2233_v13, %v1168_v48  ;;  %v275_v13 = vld [vmem:[%s12302_s1 + $0x3b0] sm:$0xff] }
 0x1d9   :  { %7081 = vmatprep.mubr.msk.f32.mxu1 %vm8036_vm0, %v8037_v6  ;;  %7902 = vmatpush3.bf16.msra.mxu1 %v7901_v32 }
 0x1da   :  { %12322 = vst [vmem:[#allocation15_spill] sm:$0xff] %v9679_v0  ;;  %v1173_v59 = vpop.f32.mrb[128].mxu0 }
 0x1db   :  { %v6545_v3 = vpop.f32.mrb[129].mxu0  ;;  %6703 = vmatmul.mubr.msk.f32.gmra.mrb[234].mxu0 %vm411_vm1, %v274_v40  ;;  %v2238_v8 = vpop.f32.mrb[128].mxu1 }
 0x1dc   :  { %7082 = vmatmul.mubr.msk.f32.gmra.mrb[234].mxu1 %vm411_vm1, %v149_v36  ;;  %6705 = vmatprep.mubr.msk.f32.mxu0 %vm8036_vm0, %v8037_v6  ;;  %v6924_v48 = vpop.f32.mrb[129].mxu1  ;;  %v9693_v9 = vadd.f32 %v2238_v8, %v1173_v59  ;;  %v276_v59 = vld [vmem:[%s12302_s1 + $0x3b8] sm:$0xff] }
 0x1dd   :  { %7084 = vmatprep.mubr.msk.f32.mxu1 %vm8036_vm0, %v8037_v6  ;;  %v151_v48 = vld [vmem:[%s12303_s0 + $0x3b8] sm:$0xff] }
 0x1de   :  { %12323 = vst [vmem:[#allocation16_spill] sm:$0xff] %v9693_v9  ;;  %v1178_v40 = vpop.f32.mrb[130].mxu0 }
 0x1df   :  { %v6548_v32 = vpop.f32.mrb[131].mxu0  ;;  %6706 = vmatmul.mubr.msk.f32.gmra.mrb[236].mxu0 %vm411_vm1, %v275_v13  ;;  %v2243_v36 = vpop.f32.mrb[130].mxu1 }
 0x1e0   :  { %7085 = vmatmul.mubr.msk.f32.gmra.mrb[236].mxu1 %vm411_vm1, %v150_v53  ;;  %6708 = vmatprep.mubr.msk.f32.mxu0 %vm8036_vm0, %v8037_v6  ;;  %v6927_v3 = vpop.f32.mrb[131].mxu1  ;;  %v9707_v8 = vadd.f32 %v2243_v36, %v1178_v40  ;;  %v277_v40 = vld [vmem:[%s12302_s1 + $0x3c0] sm:$0xff] }
 0x1e1   :  { %7087 = vmatprep.mubr.msk.f32.mxu1 %vm8036_vm0, %v8037_v6 }
 0x1e2   :  { %12324 = vst [vmem:[#allocation17_spill] sm:$0xff] %v9707_v8  ;;  %v1183_v13 = vpop.f32.mrb[132].mxu0 }
 0x1e3   :  { %v6551_v32 = vpop.f32.mrb[133].mxu0  ;;  %6709 = vmatmul.mubr.msk.f32.gmra.mrb[238].mxu0 %vm411_vm1, %v276_v59  ;;  %v2248_v53 = vpop.f32.mrb[132].mxu1  ;;  %v152_v59 = vld [vmem:[%s12303_s0 + $0x3c0] sm:$0xff] }
 0x1e4   :  { %7088 = vmatmul.mubr.msk.f32.gmra.mrb[238].mxu1 %vm411_vm1, %v151_v48  ;;  %6711 = vmatprep.mubr.msk.f32.mxu0 %vm8036_vm0, %v8037_v6  ;;  %v6930_v3 = vpop.f32.mrb[133].mxu1  ;;  %v9721_v36 = vadd.f32 %v2248_v53, %v1183_v13  ;;  %v278_v13 = vld [vmem:[%s12302_s1 + $0x3c8] sm:$0xff] }
 0x1e5   :  { %7090 = vmatprep.mubr.msk.f32.mxu1 %vm8036_vm0, %v8037_v6 }
 0x1e6   :  { %12325 = vst [vmem:[#allocation18_spill] sm:$0xff] %v9721_v36  ;;  %v1188_v32 = vpop.f32.mrb[134].mxu0 }
 0x1e7   :  { %v6554_v8 = vpop.f32.mrb[135].mxu0  ;;  %6712 = vmatmul.mubr.msk.f32.gmra.mrb[240].mxu0 %vm411_vm1, %v277_v40  ;;  %v2253_v48 = vpop.f32.mrb[134].mxu1 }
 0x1e8   :  { %7091 = vmatmul.mubr.msk.f32.gmra.mrb[240].mxu1 %vm411_vm1, %v152_v59  ;;  %6714 = vmatprep.mubr.msk.f32.mxu0 %vm8036_vm0, %v8037_v6  ;;  %v6933_v3 = vpop.f32.mrb[135].mxu1  ;;  %v9735_v53 = vadd.f32 %v2253_v48, %v1188_v32  ;;  %v153_v8 = vld [vmem:[%s12303_s0 + $0x3c8] sm:$0xff]  ;;  %v279_v32 = vld [vmem:[%s12302_s1 + $0x3d0] sm:$0xff] }
 0x1e9   :  { %7093 = vmatprep.mubr.msk.f32.mxu1 %vm8036_vm0, %v8037_v6 }
 0x1ea   :  { %12326 = vst [vmem:[#allocation19_spill] sm:$0xff] %v9735_v53  ;;  %v1193_v40 = vpop.f32.mrb[136].mxu0 }
 0x1eb   :  { %v6557_v36 = vpop.f32.mrb[137].mxu0  ;;  %6715 = vmatmul.mubr.msk.f32.gmra.mrb[242].mxu0 %vm411_vm1, %v278_v13  ;;  %v2258_v59 = vpop.f32.mrb[136].mxu1 }
 0x1ec   :  { %7094 = vmatmul.mubr.msk.f32.gmra.mrb[242].mxu1 %vm411_vm1, %v153_v8  ;;  %6717 = vmatprep.mubr.msk.f32.mxu0 %vm8036_vm0, %v8037_v6  ;;  %v6936_v3 = vpop.f32.mrb[137].mxu1  ;;  %v9749_v48 = vadd.f32 %v2258_v59, %v1193_v40  ;;  %v154_v36 = vld [vmem:[%s12303_s0 + $0x3d0] sm:$0xff]  ;;  %v280_v40 = vld [vmem:[%s12302_s1 + $0x3d8] sm:$0xff] }
 0x1ed   :  { %7096 = vmatprep.mubr.msk.f32.mxu1 %vm8036_vm0, %v8037_v6 }
 0x1ee   :  { %12327 = vst [vmem:[#allocation20_spill] sm:$0xff] %v9749_v48  ;;  %v1198_v13 = vpop.f32.mrb[138].mxu0 }
 0x1ef   :  { %v6560_v53 = vpop.f32.mrb[139].mxu0  ;;  %6718 = vmatmul.mubr.msk.f32.gmra.mrb[244].mxu0 %vm411_vm1, %v279_v32  ;;  %v2263_v8 = vpop.f32.mrb[138].mxu1 }
 0x1f0   :  { %7097 = vmatmul.mubr.msk.f32.gmra.mrb[244].mxu1 %vm411_vm1, %v154_v36  ;;  %6720 = vmatprep.mubr.msk.f32.mxu0 %vm8036_vm0, %v8037_v6  ;;  %v6939_v3 = vpop.f32.mrb[139].mxu1  ;;  %v9763_v59 = vadd.f32 %v2263_v8, %v1198_v13  ;;  %v155_v53 = vld [vmem:[%s12303_s0 + $0x3d8] sm:$0xff]  ;;  %v281_v13 = vld [vmem:[%s12302_s1 + $0x3e0] sm:$0xff] }
 0x1f1   :  { %7099 = vmatprep.mubr.msk.f32.mxu1 %vm8036_vm0, %v8037_v6 }
 0x1f2   :  { %12328 = vst [vmem:[#allocation21_spill] sm:$0xff] %v9763_v59  ;;  %v1203_v32 = vpop.f32.mrb[140].mxu0 }
 0x1f3   :  { %v6563_v48 = vpop.f32.mrb[141].mxu0  ;;  %6721 = vmatmul.mubr.msk.f32.gmra.mrb[246].mxu0 %vm411_vm1, %v280_v40  ;;  %v2268_v36 = vpop.f32.mrb[140].mxu1 }
 0x1f4   :  { %7100 = vmatmul.mubr.msk.f32.gmra.mrb[246].mxu1 %vm411_vm1, %v155_v53  ;;  %6723 = vmatprep.mubr.msk.f32.mxu0 %vm8036_vm0, %v8037_v6  ;;  %v6942_v3 = vpop.f32.mrb[141].mxu1  ;;  %v9777_v8 = vadd.f32 %v2268_v36, %v1203_v32  ;;  %v156_v48 = vld [vmem:[%s12303_s0 + $0x3e0] sm:$0xff] }
 0x1f5   :  { %7102 = vmatprep.mubr.msk.f32.mxu1 %vm8036_vm0, %v8037_v6  ;;  %v282_v32 = vld [vmem:[%s12305_s2] sm:$0xff] }
 0x1f6   :  { %12329 = vst [vmem:[#allocation22_spill] sm:$0xff] %v9777_v8  ;;  %v1208_v40 = vpop.f32.mrb[142].mxu0 }
 0x1f7   :  { %v6566_v59 = vpop.f32.mrb[143].mxu0  ;;  %6724 = vmatmul.mubr.msk.f32.gmra.mrb[248].mxu0 %vm411_vm1, %v281_v13  ;;  %v2273_v53 = vpop.f32.mrb[142].mxu1 }
 0x1f8   :  { %7103 = vmatmul.mubr.msk.f32.gmra.mrb[248].mxu1 %vm411_vm1, %v156_v48  ;;  %v6945_v3 = vpop.f32.mrb[143].mxu1  ;;  %7113 = vmatprep.mubr.msk.f32.mxu0 %vm8036_vm0, %v8037_v6  ;;  %v9791_v36 = vadd.f32 %v2273_v53, %v1208_v40 }
 0x1f9   :  { %7504 = vmatprep.mubr.msk.f32.mxu1 %vm8036_vm0, %v8037_v6  ;;  %v283_v3 = vld [vmem:[%s12305_s2 + $0x8] sm:$0xff] }
 0x1fa   :  { %12330 = vst [vmem:[#allocation23_spill] sm:$0xff] %v9791_v36  ;;  %v1213_v59 = vpop.f32.mrb[144].mxu0 }
 0x1fb   :  { %v6569_v8 = vpop.f32.mrb[145].mxu0  ;;  %v2278_v13 = vpop.f32.mrb[144].mxu1  ;;  %7114 = vmatmul.mubr.msk.f32.vlgmr.msra.gmra.mrb[250].mxu0 %vm2546_vm2, %v282_v32 }
 0x1fc   :  { %v6948_v48 = vpop.f32.mrb[145].mxu1  ;;  %7116 = vmatprep.mubr.msk.f32.mxu0 %vm8036_vm0, %v8037_v6  ;;  %v9801_v9 = vadd.f32 %v2278_v13, %v1213_v59  ;;  %v284_v8 = vld [vmem:[%s12305_s2 + $0x10] sm:$0xff] }
 0x1fe   :  { %12331 = vst [vmem:[#allocation24_spill] sm:$0xff] %v9801_v9  ;;  %v1218_v40 = vpop.f32.mrb[146].mxu0 }
 0x1ff   :  { %v6572_v53 = vpop.f32.mrb[147].mxu0  ;;  %v2283_v36 = vpop.f32.mrb[146].mxu1  ;;  %7117 = vmatmul.mubr.msk.f32.gmra.mrb[252].mxu0 %vm2546_vm2, %v283_v3 }
 0x200   :  { %v6951_v0 = vpop.f32.mrb[147].mxu1  ;;  %7119 = vmatprep.mubr.msk.f32.mxu0 %vm8036_vm0, %v8037_v6  ;;  %v9809_v32 = vadd.f32 %v2283_v36, %v1218_v40 }
 0x201   :  { %v285_v0 = vld [vmem:[%s12305_s2 + $0x18] sm:$0xff] }
 0x202   :  { %12332 = vst [vmem:[#allocation25_spill] sm:$0xff] %v9809_v32  ;;  %v1223_v48 = vpop.f32.mrb[148].mxu0 }
 0x203   :  { %v6575_v24 = vpop.f32.mrb[149].mxu0  ;;  %v2288_v49 = vpop.f32.mrb[148].mxu1  ;;  %7120 = vmatmul.mubr.msk.f32.gmra.mrb[254].mxu0 %vm2546_vm2, %v284_v8 }
 0x204   :  { %v6954_v59 = vpop.f32.mrb[149].mxu1  ;;  %7122 = vmatprep.mubr.msk.f32.mxu0 %vm8036_vm0, %v8037_v6  ;;  %v9817_v13 = vadd.f32 %v2288_v49, %v1223_v48  ;;  %v286_v24 = vld [vmem:[%s12305_s2 + $0x20] sm:$0xff]  ;;  %v287_v48 = vld [vmem:[%s12305_s2 + $0x28] sm:$0xff] }
 0x206   :  { %12333 = vst [vmem:[#allocation26_spill] sm:$0xff] %v9817_v13  ;;  %v1228_v3 = vpop.f32.mrb[150].mxu0 }
 0x207   :  { %v6578_v53 = vpop.f32.mrb[151].mxu0  ;;  %v2293_v9 = vpop.f32.mrb[150].mxu1  ;;  %7123 = vmatmul.mubr.msk.f32.gmra.mrb[0].mxu0 %vm2546_vm2, %v285_v0 }
 0x208   :  { %v6957_v36 = vpop.f32.mrb[151].mxu1  ;;  %7125 = vmatprep.mubr.msk.f32.mxu0 %vm8036_vm0, %v8037_v6  ;;  %v9825_v40 = vadd.f32 %v2293_v9, %v1228_v3  ;;  %v288_v3 = vld [vmem:[%s12305_s2 + $0x30] sm:$0xff] }
 0x20a   :  { %12334 = vst [vmem:[#allocation27_spill] sm:$0xff] %v9825_v40  ;;  %v1233_v8 = vpop.f32.mrb[152].mxu0 }
 0x20b   :  { %v6581_v59 = vpop.f32.mrb[153].mxu0  ;;  %v2298_v32 = vpop.f32.mrb[152].mxu1  ;;  %7126 = vmatmul.mubr.msk.f32.gmra.mrb[2].mxu0 %vm2546_vm2, %v286_v24 }
 0x20c   :  { %v6960_v49 = vpop.f32.mrb[153].mxu1  ;;  %7128 = vmatprep.mubr.msk.f32.mxu0 %vm8036_vm0, %v8037_v6  ;;  %v9833_v0 = vadd.f32 %v2298_v32, %v1233_v8  ;;  %v289_v8 = vld [vmem:[%s12305_s2 + $0x38] sm:$0xff] }
 0x20e   :  { %12335 = vst [vmem:[#allocation28_spill] sm:$0xff] %v9833_v0  ;;  %v1238_v53 = vpop.f32.mrb[154].mxu0 }
 0x20f   :  { %v6584_v36 = vpop.f32.mrb[155].mxu0  ;;  %v2303_v13 = vpop.f32.mrb[154].mxu1  ;;  %7129 = vmatmul.mubr.msk.f32.gmra.mrb[4].mxu0 %vm2546_vm2, %v287_v48 }
 0x210   :  { %v6963_v9 = vpop.f32.mrb[155].mxu1  ;;  %7131 = vmatprep.mubr.msk.f32.mxu0 %vm8036_vm0, %v8037_v6  ;;  %v9841_v24 = vadd.f32 %v2303_v13, %v1238_v53  ;;  %v290_v53 = vld [vmem:[%s12305_s2 + $0x40] sm:$0xff] }
 0x212   :  { %12336 = vst [vmem:[#allocation29_spill] sm:$0xff] %v9841_v24  ;;  %v1243_v59 = vpop.f32.mrb[156].mxu0 }
 0x213   :  { %v6587_v49 = vpop.f32.mrb[157].mxu0  ;;  %v2308_v40 = vpop.f32.mrb[156].mxu1  ;;  %7132 = vmatmul.mubr.msk.f32.gmra.mrb[6].mxu0 %vm2546_vm2, %v288_v3 }
 0x214   :  { %v6966_v32 = vpop.f32.mrb[157].mxu1  ;;  %7134 = vmatprep.mubr.msk.f32.mxu0 %vm8036_vm0, %v8037_v6  ;;  %v9849_v48 = vadd.f32 %v2308_v40, %v1243_v59  ;;  %v291_v59 = vld [vmem:[%s12305_s2 + $0x48] sm:$0xff] }
 0x216   :  { %12337 = vst [vmem:[#allocation30_spill] sm:$0xff] %v9849_v48  ;;  %v1248_v36 = vpop.f32.mrb[158].mxu0 }
 0x217   :  { %v6590_v9 = vpop.f32.mrb[159].mxu0  ;;  %v2313_v0 = vpop.f32.mrb[158].mxu1  ;;  %7135 = vmatmul.mubr.msk.f32.gmra.mrb[8].mxu0 %vm2546_vm2, %v289_v8 }
 0x218   :  { %v6969_v13 = vpop.f32.mrb[159].mxu1  ;;  %7137 = vmatprep.mubr.msk.f32.mxu0 %vm8036_vm0, %v8037_v6  ;;  %v9857_v3 = vadd.f32 %v2313_v0, %v1248_v36  ;;  %v292_v36 = vld [vmem:[%s12305_s2 + $0x50] sm:$0xff] }
 0x21a   :  { %12338 = vst [vmem:[#allocation31_spill] sm:$0xff] %v9857_v3  ;;  %v1253_v49 = vpop.f32.mrb[160].mxu0 }
 0x21b   :  { %v6593_v32 = vpop.f32.mrb[161].mxu0  ;;  %v2318_v24 = vpop.f32.mrb[160].mxu1  ;;  %7138 = vmatmul.mubr.msk.f32.gmra.mrb[10].mxu0 %vm2546_vm2, %v290_v53 }
 0x21c   :  { %v6972_v40 = vpop.f32.mrb[161].mxu1  ;;  %7140 = vmatprep.mubr.msk.f32.mxu0 %vm8036_vm0, %v8037_v6  ;;  %v9865_v8 = vadd.f32 %v2318_v24, %v1253_v49  ;;  %v293_v49 = vld [vmem:[%s12305_s2 + $0x58] sm:$0xff] }
 0x21e   :  { %12339 = vst [vmem:[#allocation32_spill] sm:$0xff] %v9865_v8  ;;  %v1258_v9 = vpop.f32.mrb[162].mxu0 }
 0x21f   :  { %v6596_v13 = vpop.f32.mrb[163].mxu0  ;;  %v2323_v48 = vpop.f32.mrb[162].mxu1  ;;  %7141 = vmatmul.mubr.msk.f32.gmra.mrb[12].mxu0 %vm2546_vm2, %v291_v59 }
 0x220   :  { %v6975_v0 = vpop.f32.mrb[163].mxu1  ;;  %7143 = vmatprep.mubr.msk.f32.mxu0 %vm8036_vm0, %v8037_v6  ;;  %v9873_v53 = vadd.f32 %v2323_v48, %v1258_v9  ;;  %v294_v9 = vld [vmem:[%s12305_s2 + $0x60] sm:$0xff] }
 0x222   :  { %12340 = vst [vmem:[#allocation33_spill] sm:$0xff] %v9873_v53  ;;  %v1263_v32 = vpop.f32.mrb[164].mxu0 }
 0x223   :  { %v6599_v40 = vpop.f32.mrb[165].mxu0  ;;  %v2328_v3 = vpop.f32.mrb[164].mxu1  ;;  %7144 = vmatmul.mubr.msk.f32.gmra.mrb[14].mxu0 %vm2546_vm2, %v292_v36 }
 0x224   :  { %v6978_v24 = vpop.f32.mrb[165].mxu1  ;;  %7146 = vmatprep.mubr.msk.f32.mxu0 %vm8036_vm0, %v8037_v6  ;;  %v9881_v59 = vadd.f32 %v2328_v3, %v1263_v32  ;;  %v295_v32 = vld [vmem:[%s12305_s2 + $0x68] sm:$0xff] }
 0x226   :  { %12341 = vst [vmem:[#allocation34_spill] sm:$0xff] %v9881_v59  ;;  %v1268_v13 = vpop.f32.mrb[166].mxu0 }
 0x227   :  { %v6602_v0 = vpop.f32.mrb[167].mxu0  ;;  %v2333_v8 = vpop.f32.mrb[166].mxu1  ;;  %7147 = vmatmul.mubr.msk.f32.gmra.mrb[16].mxu0 %vm2546_vm2, %v293_v49 }
 0x228   :  { %v6981_v48 = vpop.f32.mrb[167].mxu1  ;;  %7149 = vmatprep.mubr.msk.f32.mxu0 %vm8036_vm0, %v8037_v6  ;;  %v9889_v36 = vadd.f32 %v2333_v8, %v1268_v13  ;;  %v296_v13 = vld [vmem:[%s12305_s2 + $0x70] sm:$0xff] }
 0x22a   :  { %12342 = vst [vmem:[#allocation35_spill] sm:$0xff] %v9889_v36  ;;  %v1273_v40 = vpop.f32.mrb[168].mxu0 }
 0x22b   :  { %v6605_v24 = vpop.f32.mrb[169].mxu0  ;;  %v2338_v53 = vpop.f32.mrb[168].mxu1  ;;  %7150 = vmatmul.mubr.msk.f32.gmra.mrb[18].mxu0 %vm2546_vm2, %v294_v9 }
 0x22c   :  { %v6984_v3 = vpop.f32.mrb[169].mxu1  ;;  %7152 = vmatprep.mubr.msk.f32.mxu0 %vm8036_vm0, %v8037_v6  ;;  %v9897_v49 = vadd.f32 %v2338_v53, %v1273_v40  ;;  %v297_v40 = vld [vmem:[%s12305_s2 + $0x78] sm:$0xff] }
 0x22e   :  { %12343 = vst [vmem:[#allocation36_spill] sm:$0xff] %v9897_v49  ;;  %v1278_v0 = vpop.f32.mrb[170].mxu0 }
 0x22f   :  { %v6608_v48 = vpop.f32.mrb[171].mxu0  ;;  %v2343_v59 = vpop.f32.mrb[170].mxu1  ;;  %7153 = vmatmul.mubr.msk.f32.gmra.mrb[20].mxu0 %vm2546_vm2, %v295_v32 }
 0x230   :  { %v6987_v8 = vpop.f32.mrb[171].mxu1  ;;  %7155 = vmatprep.mubr.msk.f32.mxu0 %vm8036_vm0, %v8037_v6  ;;  %v9905_v9 = vadd.f32 %v2343_v59, %v1278_v0  ;;  %v298_v0 = vld [vmem:[%s12305_s2 + $0x80] sm:$0xff] }
 0x232   :  { %12344 = vst [vmem:[#allocation37_spill] sm:$0xff] %v9905_v9  ;;  %v1283_v24 = vpop.f32.mrb[172].mxu0 }
 0x233   :  { %v6611_v3 = vpop.f32.mrb[173].mxu0  ;;  %v2348_v36 = vpop.f32.mrb[172].mxu1  ;;  %7156 = vmatmul.mubr.msk.f32.gmra.mrb[22].mxu0 %vm2546_vm2, %v296_v13 }
 0x234   :  { %v6990_v53 = vpop.f32.mrb[173].mxu1  ;;  %7158 = vmatprep.mubr.msk.f32.mxu0 %vm8036_vm0, %v8037_v6  ;;  %v9913_v32 = vadd.f32 %v2348_v36, %v1283_v24  ;;  %v299_v24 = vld [vmem:[%s12305_s2 + $0x88] sm:$0xff] }
 0x236   :  { %12345 = vst [vmem:[#allocation38_spill] sm:$0xff] %v9913_v32  ;;  %v1288_v48 = vpop.f32.mrb[174].mxu0 }
 0x237   :  { %v6614_v8 = vpop.f32.mrb[175].mxu0  ;;  %v2353_v49 = vpop.f32.mrb[174].mxu1  ;;  %7159 = vmatmul.mubr.msk.f32.gmra.mrb[24].mxu0 %vm2546_vm2, %v297_v40 }
 0x238   :  { %v6993_v59 = vpop.f32.mrb[175].mxu1  ;;  %7161 = vmatprep.mubr.msk.f32.mxu0 %vm8036_vm0, %v8037_v6  ;;  %v9921_v13 = vadd.f32 %v2353_v49, %v1288_v48  ;;  %v300_v48 = vld [vmem:[%s12305_s2 + $0x90] sm:$0xff] }
 0x23a   :  { %12346 = vst [vmem:[#allocation39_spill] sm:$0xff] %v9921_v13  ;;  %v1293_v3 = vpop.f32.mrb[176].mxu0 }
 0x23b   :  { %v6617_v53 = vpop.f32.mrb[177].mxu0  ;;  %v2358_v9 = vpop.f32.mrb[176].mxu1  ;;  %7162 = vmatmul.mubr.msk.f32.gmra.mrb[26].mxu0 %vm2546_vm2, %v298_v0 }
 0x23c   :  { %v6996_v36 = vpop.f32.mrb[177].mxu1  ;;  %7164 = vmatprep.mubr.msk.f32.mxu0 %vm8036_vm0, %v8037_v6  ;;  %v9929_v40 = vadd.f32 %v2358_v9, %v1293_v3  ;;  %v301_v3 = vld [vmem:[%s12305_s2 + $0x98] sm:$0xff] }
 0x23e   :  { %12347 = vst [vmem:[#allocation40_spill] sm:$0xff] %v9929_v40  ;;  %v1298_v8 = vpop.f32.mrb[178].mxu0 }
 0x23f   :  { %v6620_v59 = vpop.f32.mrb[179].mxu0  ;;  %v2363_v32 = vpop.f32.mrb[178].mxu1  ;;  %7165 = vmatmul.mubr.msk.f32.gmra.mrb[28].mxu0 %vm2546_vm2, %v299_v24 }
 0x240   :  { %v6999_v49 = vpop.f32.mrb[179].mxu1  ;;  %7167 = vmatprep.mubr.msk.f32.mxu0 %vm8036_vm0, %v8037_v6  ;;  %v9937_v0 = vadd.f32 %v2363_v32, %v1298_v8  ;;  %v302_v8 = vld [vmem:[%s12305_s2 + $0xa0] sm:$0xff] }
 0x242   :  { %12348 = vst [vmem:[#allocation41_spill] sm:$0xff] %v9937_v0  ;;  %v1303_v53 = vpop.f32.mrb[180].mxu0 }
 0x243   :  { %v6623_v36 = vpop.f32.mrb[181].mxu0  ;;  %v2368_v13 = vpop.f32.mrb[180].mxu1  ;;  %7168 = vmatmul.mubr.msk.f32.gmra.mrb[30].mxu0 %vm2546_vm2, %v300_v48 }
 0x244   :  { %v7002_v9 = vpop.f32.mrb[181].mxu1  ;;  %7170 = vmatprep.mubr.msk.f32.mxu0 %vm8036_vm0, %v8037_v6  ;;  %v9945_v24 = vadd.f32 %v2368_v13, %v1303_v53  ;;  %v303_v53 = vld [vmem:[%s12305_s2 + $0xa8] sm:$0xff] }
 0x246   :  { %12349 = vst [vmem:[#allocation42_spill] sm:$0xff] %v9945_v24  ;;  %v1308_v59 = vpop.f32.mrb[182].mxu0 }
 0x247   :  { %v6626_v49 = vpop.f32.mrb[183].mxu0  ;;  %v2373_v40 = vpop.f32.mrb[182].mxu1  ;;  %7171 = vmatmul.mubr.msk.f32.gmra.mrb[32].mxu0 %vm2546_vm2, %v301_v3 }
 0x248   :  { %v7005_v32 = vpop.f32.mrb[183].mxu1  ;;  %7173 = vmatprep.mubr.msk.f32.mxu0 %vm8036_vm0, %v8037_v6  ;;  %v9953_v48 = vadd.f32 %v2373_v40, %v1308_v59  ;;  %v304_v59 = vld [vmem:[%s12305_s2 + $0xb0] sm:$0xff] }
 0x24a   :  { %12350 = vst [vmem:[#allocation43_spill] sm:$0xff] %v9953_v48  ;;  %v1313_v36 = vpop.f32.mrb[184].mxu0 }
 0x24b   :  { %v6629_v9 = vpop.f32.mrb[185].mxu0  ;;  %v2378_v0 = vpop.f32.mrb[184].mxu1  ;;  %7174 = vmatmul.mubr.msk.f32.gmra.mrb[34].mxu0 %vm2546_vm2, %v302_v8 }
 0x24c   :  { %v7008_v13 = vpop.f32.mrb[185].mxu1  ;;  %7176 = vmatprep.mubr.msk.f32.mxu0 %vm8036_vm0, %v8037_v6  ;;  %v9961_v3 = vadd.f32 %v2378_v0, %v1313_v36  ;;  %v305_v36 = vld [vmem:[%s12305_s2 + $0xb8] sm:$0xff] }
 0x24e   :  { %12351 = vst [vmem:[#allocation44_spill] sm:$0xff] %v9961_v3  ;;  %v1318_v49 = vpop.f32.mrb[186].mxu0 }
 0x24f   :  { %v6632_v32 = vpop.f32.mrb[187].mxu0  ;;  %v2383_v24 = vpop.f32.mrb[186].mxu1  ;;  %7177 = vmatmul.mubr.msk.f32.gmra.mrb[36].mxu0 %vm2546_vm2, %v303_v53 }
 0x250   :  { %v7011_v40 = vpop.f32.mrb[187].mxu1  ;;  %7179 = vmatprep.mubr.msk.f32.mxu0 %vm8036_vm0, %v8037_v6  ;;  %v9969_v8 = vadd.f32 %v2383_v24, %v1318_v49  ;;  %v306_v49 = vld [vmem:[%s12305_s2 + $0xc0] sm:$0xff] }
 0x252   :  { %12352 = vst [vmem:[#allocation45_spill] sm:$0xff] %v9969_v8  ;;  %v1323_v9 = vpop.f32.mrb[188].mxu0 }
 0x253   :  { %v6635_v13 = vpop.f32.mrb[189].mxu0  ;;  %v2388_v48 = vpop.f32.mrb[188].mxu1  ;;  %7180 = vmatmul.mubr.msk.f32.gmra.mrb[38].mxu0 %vm2546_vm2, %v304_v59 }
 0x254   :  { %v7014_v0 = vpop.f32.mrb[189].mxu1  ;;  %7182 = vmatprep.mubr.msk.f32.mxu0 %vm8036_vm0, %v8037_v6  ;;  %v9977_v53 = vadd.f32 %v2388_v48, %v1323_v9  ;;  %v307_v9 = vld [vmem:[%s12305_s2 + $0xc8] sm:$0xff] }
 0x256   :  { %12353 = vst [vmem:[#allocation46_spill] sm:$0xff] %v9977_v53  ;;  %v1328_v32 = vpop.f32.mrb[190].mxu0 }
 0x257   :  { %v6638_v40 = vpop.f32.mrb[191].mxu0  ;;  %v2393_v3 = vpop.f32.mrb[190].mxu1  ;;  %7183 = vmatmul.mubr.msk.f32.gmra.mrb[40].mxu0 %vm2546_vm2, %v305_v36 }
 0x258   :  { %v7017_v24 = vpop.f32.mrb[191].mxu1  ;;  %7185 = vmatprep.mubr.msk.f32.mxu0 %vm8036_vm0, %v8037_v6  ;;  %v9985_v59 = vadd.f32 %v2393_v3, %v1328_v32  ;;  %v308_v32 = vld [vmem:[%s12305_s2 + $0xd0] sm:$0xff] }
 0x25a   :  { %12354 = vst [vmem:[#allocation47_spill] sm:$0xff] %v9985_v59  ;;  %v1333_v13 = vpop.f32.mrb[192].mxu0 }
 0x25b   :  { %v6641_v0 = vpop.f32.mrb[193].mxu0  ;;  %v2398_v8 = vpop.f32.mrb[192].mxu1  ;;  %7186 = vmatmul.mubr.msk.f32.gmra.mrb[42].mxu0 %vm2546_vm2, %v306_v49 }
 0x25c   :  { %v7020_v48 = vpop.f32.mrb[193].mxu1  ;;  %7188 = vmatprep.mubr.msk.f32.mxu0 %vm8036_vm0, %v8037_v6  ;;  %v9993_v36 = vadd.f32 %v2398_v8, %v1333_v13  ;;  %v309_v13 = vld [vmem:[%s12305_s2 + $0xd8] sm:$0xff] }
 0x25e   :  { %12355 = vst [vmem:[#allocation48_spill] sm:$0xff] %v9993_v36  ;;  %v1338_v40 = vpop.f32.mrb[194].mxu0 }
 0x25f   :  { %v6644_v24 = vpop.f32.mrb[195].mxu0  ;;  %v2403_v53 = vpop.f32.mrb[194].mxu1  ;;  %7189 = vmatmul.mubr.msk.f32.gmra.mrb[44].mxu0 %vm2546_vm2, %v307_v9 }
 0x260   :  { %v7023_v3 = vpop.f32.mrb[195].mxu1  ;;  %7191 = vmatprep.mubr.msk.f32.mxu0 %vm8036_vm0, %v8037_v6  ;;  %v10001_v49 = vadd.f32 %v2403_v53, %v1338_v40  ;;  %v310_v40 = vld [vmem:[%s12305_s2 + $0xe0] sm:$0xff] }
 0x262   :  { %12356 = vst [vmem:[#allocation49_spill] sm:$0xff] %v10001_v49  ;;  %v1343_v0 = vpop.f32.mrb[196].mxu0 }
 0x263   :  { %v6647_v48 = vpop.f32.mrb[197].mxu0  ;;  %v2408_v59 = vpop.f32.mrb[196].mxu1  ;;  %7192 = vmatmul.mubr.msk.f32.gmra.mrb[46].mxu0 %vm2546_vm2, %v308_v32 }
 0x264   :  { %v7026_v8 = vpop.f32.mrb[197].mxu1  ;;  %7194 = vmatprep.mubr.msk.f32.mxu0 %vm8036_vm0, %v8037_v6  ;;  %v10009_v9 = vadd.f32 %v2408_v59, %v1343_v0  ;;  %v311_v0 = vld [vmem:[%s12305_s2 + $0xe8] sm:$0xff] }
 0x266   :  { %12357 = vst [vmem:[#allocation50_spill] sm:$0xff] %v10009_v9  ;;  %v1348_v24 = vpop.f32.mrb[198].mxu0 }
 0x267   :  { %v6650_v3 = vpop.f32.mrb[199].mxu0  ;;  %v2413_v36 = vpop.f32.mrb[198].mxu1  ;;  %7195 = vmatmul.mubr.msk.f32.gmra.mrb[48].mxu0 %vm2546_vm2, %v309_v13 }
 0x268   :  { %v7029_v53 = vpop.f32.mrb[199].mxu1  ;;  %7197 = vmatprep.mubr.msk.f32.mxu0 %vm8036_vm0, %v8037_v6  ;;  %v10017_v32 = vadd.f32 %v2413_v36, %v1348_v24  ;;  %v312_v24 = vld [vmem:[%s12305_s2 + $0xf0] sm:$0xff] }
 0x26a   :  { %12358 = vst [vmem:[#allocation51_spill] sm:$0xff] %v10017_v32  ;;  %v1353_v48 = vpop.f32.mrb[200].mxu0 }
 0x26b   :  { %v6653_v8 = vpop.f32.mrb[201].mxu0  ;;  %v2418_v49 = vpop.f32.mrb[200].mxu1  ;;  %7198 = vmatmul.mubr.msk.f32.gmra.mrb[50].mxu0 %vm2546_vm2, %v310_v40 }
 0x26c   :  { %v7032_v59 = vpop.f32.mrb[201].mxu1  ;;  %7200 = vmatprep.mubr.msk.f32.mxu0 %vm8036_vm0, %v8037_v6  ;;  %v10025_v13 = vadd.f32 %v2418_v49, %v1353_v48  ;;  %v313_v48 = vld [vmem:[%s12305_s2 + $0xf8] sm:$0xff] }
 0x26e   :  { %12359 = vst [vmem:[#allocation52_spill] sm:$0xff] %v10025_v13  ;;  %v1358_v3 = vpop.f32.mrb[202].mxu0 }
 0x26f   :  { %v6656_v53 = vpop.f32.mrb[203].mxu0  ;;  %v2423_v9 = vpop.f32.mrb[202].mxu1  ;;  %7201 = vmatmul.mubr.msk.f32.gmra.mrb[52].mxu0 %vm2546_vm2, %v311_v0 }
 0x270   :  { %v7035_v36 = vpop.f32.mrb[203].mxu1  ;;  %7203 = vmatprep.mubr.msk.f32.mxu0 %vm8036_vm0, %v8037_v6  ;;  %v10033_v40 = vadd.f32 %v2423_v9, %v1358_v3  ;;  %v314_v3 = vld [vmem:[%s12305_s2 + $0x100] sm:$0xff] }
 0x272   :  { %12360 = vst [vmem:[#allocation53_spill] sm:$0xff] %v10033_v40  ;;  %v1363_v8 = vpop.f32.mrb[204].mxu0 }
 0x273   :  { %v6659_v59 = vpop.f32.mrb[205].mxu0  ;;  %v2428_v32 = vpop.f32.mrb[204].mxu1  ;;  %7204 = vmatmul.mubr.msk.f32.gmra.mrb[54].mxu0 %vm2546_vm2, %v312_v24 }
 0x274   :  { %v7038_v49 = vpop.f32.mrb[205].mxu1  ;;  %7206 = vmatprep.mubr.msk.f32.mxu0 %vm8036_vm0, %v8037_v6  ;;  %v10041_v0 = vadd.f32 %v2428_v32, %v1363_v8  ;;  %v315_v8 = vld [vmem:[%s12305_s2 + $0x108] sm:$0xff] }
 0x276   :  { %12361 = vst [vmem:[#allocation54_spill] sm:$0xff] %v10041_v0  ;;  %v1368_v53 = vpop.f32.mrb[206].mxu0 }
 0x277   :  { %v6662_v36 = vpop.f32.mrb[207].mxu0  ;;  %v2433_v13 = vpop.f32.mrb[206].mxu1  ;;  %7207 = vmatmul.mubr.msk.f32.gmra.mrb[56].mxu0 %vm2546_vm2, %v313_v48 }
 0x278   :  { %v7041_v9 = vpop.f32.mrb[207].mxu1  ;;  %7209 = vmatprep.mubr.msk.f32.mxu0 %vm8036_vm0, %v8037_v6  ;;  %v10049_v24 = vadd.f32 %v2433_v13, %v1368_v53  ;;  %v316_v53 = vld [vmem:[%s12305_s2 + $0x110] sm:$0xff] }
 0x27a   :  { %12362 = vst [vmem:[#allocation55_spill] sm:$0xff] %v10049_v24  ;;  %v1373_v59 = vpop.f32.mrb[208].mxu0 }
 0x27b   :  { %v6665_v49 = vpop.f32.mrb[209].mxu0  ;;  %v2438_v40 = vpop.f32.mrb[208].mxu1  ;;  %7210 = vmatmul.mubr.msk.f32.gmra.mrb[58].mxu0 %vm2546_vm2, %v314_v3 }
 0x27c   :  { %v7044_v32 = vpop.f32.mrb[209].mxu1  ;;  %7212 = vmatprep.mubr.msk.f32.mxu0 %vm8036_vm0, %v8037_v6  ;;  %v10057_v48 = vadd.f32 %v2438_v40, %v1373_v59  ;;  %v317_v59 = vld [vmem:[%s12305_s2 + $0x118] sm:$0xff] }
 0x27e   :  { %12363 = vst [vmem:[#allocation56_spill] sm:$0xff] %v10057_v48  ;;  %v1378_v36 = vpop.f32.mrb[210].mxu0 }
 0x27f   :  { %v6668_v9 = vpop.f32.mrb[211].mxu0  ;;  %v2443_v0 = vpop.f32.mrb[210].mxu1  ;;  %7213 = vmatmul.mubr.msk.f32.gmra.mrb[60].mxu0 %vm2546_vm2, %v315_v8 }
 0x280   :  { %v7047_v13 = vpop.f32.mrb[211].mxu1  ;;  %7215 = vmatprep.mubr.msk.f32.mxu0 %vm8036_vm0, %v8037_v6  ;;  %v10065_v3 = vadd.f32 %v2443_v0, %v1378_v36  ;;  %v318_v36 = vld [vmem:[%s12305_s2 + $0x120] sm:$0xff] }
 0x282   :  { %12364 = vst [vmem:[#allocation57_spill] sm:$0xff] %v10065_v3  ;;  %v1383_v49 = vpop.f32.mrb[212].mxu0 }
 0x283   :  { %v6671_v32 = vpop.f32.mrb[213].mxu0  ;;  %v2448_v24 = vpop.f32.mrb[212].mxu1  ;;  %7216 = vmatmul.mubr.msk.f32.gmra.mrb[62].mxu0 %vm2546_vm2, %v316_v53 }
 0x284   :  { %v7050_v40 = vpop.f32.mrb[213].mxu1  ;;  %7218 = vmatprep.mubr.msk.f32.mxu0 %vm8036_vm0, %v8037_v6  ;;  %v10073_v8 = vadd.f32 %v2448_v24, %v1383_v49  ;;  %v319_v49 = vld [vmem:[%s12305_s2 + $0x128] sm:$0xff] }
 0x286   :  { %12365 = vst [vmem:[#allocation58_spill] sm:$0xff] %v10073_v8  ;;  %v1388_v9 = vpop.f32.mrb[214].mxu0 }
 0x287   :  { %v6674_v13 = vpop.f32.mrb[215].mxu0  ;;  %v2453_v48 = vpop.f32.mrb[214].mxu1  ;;  %7219 = vmatmul.mubr.msk.f32.gmra.mrb[64].mxu0 %vm2546_vm2, %v317_v59 }
 0x288   :  { %v7053_v0 = vpop.f32.mrb[215].mxu1  ;;  %7221 = vmatprep.mubr.msk.f32.mxu0 %vm8036_vm0, %v8037_v6  ;;  %v10081_v53 = vadd.f32 %v2453_v48, %v1388_v9  ;;  %v320_v9 = vld [vmem:[%s12305_s2 + $0x130] sm:$0xff] }
 0x28a   :  { %12366 = vst [vmem:[#allocation59_spill] sm:$0xff] %v10081_v53  ;;  %v1393_v32 = vpop.f32.mrb[216].mxu0 }
 0x28b   :  { %v6677_v40 = vpop.f32.mrb[217].mxu0  ;;  %v2458_v3 = vpop.f32.mrb[216].mxu1  ;;  %7222 = vmatmul.mubr.msk.f32.gmra.mrb[66].mxu0 %vm2546_vm2, %v318_v36 }
 0x28c   :  { %v7056_v24 = vpop.f32.mrb[217].mxu1  ;;  %7224 = vmatprep.mubr.msk.f32.mxu0 %vm8036_vm0, %v8037_v6  ;;  %v10089_v59 = vadd.f32 %v2458_v3, %v1393_v32  ;;  %v321_v32 = vld [vmem:[%s12305_s2 + $0x138] sm:$0xff] }
 0x28e   :  { %12367 = vst [vmem:[#allocation60_spill] sm:$0xff] %v10089_v59  ;;  %v1398_v13 = vpop.f32.mrb[218].mxu0 }
 0x28f   :  { %v6680_v0 = vpop.f32.mrb[219].mxu0  ;;  %v2463_v8 = vpop.f32.mrb[218].mxu1  ;;  %7225 = vmatmul.mubr.msk.f32.gmra.mrb[68].mxu0 %vm2546_vm2, %v319_v49 }
 0x290   :  { %v7059_v48 = vpop.f32.mrb[219].mxu1  ;;  %7227 = vmatprep.mubr.msk.f32.mxu0 %vm8036_vm0, %v8037_v6  ;;  %v10097_v36 = vadd.f32 %v2463_v8, %v1398_v13  ;;  %v322_v13 = vld [vmem:[%s12305_s2 + $0x140] sm:$0xff] }
 0x292   :  { %12368 = vst [vmem:[#allocation61_spill] sm:$0xff] %v10097_v36  ;;  %v1403_v40 = vpop.f32.mrb[220].mxu0 }
 0x293   :  { %v6683_v24 = vpop.f32.mrb[221].mxu0  ;;  %v2468_v53 = vpop.f32.mrb[220].mxu1  ;;  %7228 = vmatmul.mubr.msk.f32.gmra.mrb[70].mxu0 %vm2546_vm2, %v320_v9 }
 0x294   :  { %v7062_v3 = vpop.f32.mrb[221].mxu1  ;;  %7230 = vmatprep.mubr.msk.f32.mxu0 %vm8036_vm0, %v8037_v6  ;;  %v10105_v49 = vadd.f32 %v2468_v53, %v1403_v40  ;;  %v323_v40 = vld [vmem:[%s12305_s2 + $0x148] sm:$0xff] }
 0x296   :  { %12369 = vst [vmem:[#allocation62_spill] sm:$0xff] %v10105_v49  ;;  %v1408_v0 = vpop.f32.mrb[222].mxu0 }
 0x297   :  { %v6686_v48 = vpop.f32.mrb[223].mxu0  ;;  %v2473_v59 = vpop.f32.mrb[222].mxu1  ;;  %7231 = vmatmul.mubr.msk.f32.gmra.mrb[72].mxu0 %vm2546_vm2, %v321_v32 }
 0x298   :  { %v7065_v8 = vpop.f32.mrb[223].mxu1  ;;  %7233 = vmatprep.mubr.msk.f32.mxu0 %vm8036_vm0, %v8037_v6  ;;  %v10113_v9 = vadd.f32 %v2473_v59, %v1408_v0  ;;  %v324_v0 = vld [vmem:[%s12305_s2 + $0x150] sm:$0xff] }
 0x29a   :  { %12370 = vst [vmem:[#allocation63_spill] sm:$0xff] %v10113_v9  ;;  %v1413_v24 = vpop.f32.mrb[224].mxu0 }
 0x29b   :  { %v6689_v3 = vpop.f32.mrb[225].mxu0  ;;  %v2478_v36 = vpop.f32.mrb[224].mxu1  ;;  %7234 = vmatmul.mubr.msk.f32.gmra.mrb[74].mxu0 %vm2546_vm2, %v322_v13 }
 0x29c   :  { %v7068_v53 = vpop.f32.mrb[225].mxu1  ;;  %7236 = vmatprep.mubr.msk.f32.mxu0 %vm8036_vm0, %v8037_v6  ;;  %v10121_v32 = vadd.f32 %v2478_v36, %v1413_v24  ;;  %v325_v24 = vld [vmem:[%s12305_s2 + $0x158] sm:$0xff] }
 0x29e   :  { %12371 = vst [vmem:[#allocation64_spill] sm:$0xff] %v10121_v32  ;;  %v1418_v48 = vpop.f32.mrb[226].mxu0 }
 0x29f   :  { %v6692_v8 = vpop.f32.mrb[227].mxu0  ;;  %v2483_v49 = vpop.f32.mrb[226].mxu1  ;;  %7237 = vmatmul.mubr.msk.f32.gmra.mrb[76].mxu0 %vm2546_vm2, %v323_v40 }
 0x2a0   :  { %v7071_v59 = vpop.f32.mrb[227].mxu1  ;;  %7239 = vmatprep.mubr.msk.f32.mxu0 %vm8036_vm0, %v8037_v6  ;;  %v10129_v13 = vadd.f32 %v2483_v49, %v1418_v48  ;;  %v326_v48 = vld [vmem:[%s12305_s2 + $0x160] sm:$0xff] }
 0x2a2   :  { %12372 = vst [vmem:[#allocation65_spill] sm:$0xff] %v10129_v13  ;;  %v1423_v3 = vpop.f32.mrb[228].mxu0 }
 0x2a3   :  { %v6695_v53 = vpop.f32.mrb[229].mxu0  ;;  %v2488_v9 = vpop.f32.mrb[228].mxu1  ;;  %7240 = vmatmul.mubr.msk.f32.gmra.mrb[78].mxu0 %vm2546_vm2, %v324_v0 }
 0x2a4   :  { %v7074_v36 = vpop.f32.mrb[229].mxu1  ;;  %7242 = vmatprep.mubr.msk.f32.mxu0 %vm8036_vm0, %v8037_v6  ;;  %v10137_v40 = vadd.f32 %v2488_v9, %v1423_v3  ;;  %v327_v3 = vld [vmem:[%s12305_s2 + $0x168] sm:$0xff] }
 0x2a6   :  { %12373 = vst [vmem:[#allocation66_spill] sm:$0xff] %v10137_v40  ;;  %v1428_v8 = vpop.f32.mrb[230].mxu0 }
 0x2a7   :  { %v6698_v59 = vpop.f32.mrb[231].mxu0  ;;  %v2493_v32 = vpop.f32.mrb[230].mxu1  ;;  %7243 = vmatmul.mubr.msk.f32.gmra.mrb[80].mxu0 %vm2546_vm2, %v325_v24 }
 0x2a8   :  { %v7077_v49 = vpop.f32.mrb[231].mxu1  ;;  %7245 = vmatprep.mubr.msk.f32.mxu0 %vm8036_vm0, %v8037_v6  ;;  %v10145_v0 = vadd.f32 %v2493_v32, %v1428_v8  ;;  %v328_v8 = vld [vmem:[%s12305_s2 + $0x170] sm:$0xff] }
 0x2aa   :  { %12374 = vst [vmem:[#allocation67_spill] sm:$0xff] %v10145_v0  ;;  %v1433_v53 = vpop.f32.mrb[232].mxu0 }
 0x2ab   :  { %v6701_v36 = vpop.f32.mrb[233].mxu0  ;;  %v2498_v13 = vpop.f32.mrb[232].mxu1  ;;  %7246 = vmatmul.mubr.msk.f32.gmra.mrb[82].mxu0 %vm2546_vm2, %v326_v48 }
 0x2ac   :  { %v7080_v9 = vpop.f32.mrb[233].mxu1  ;;  %7248 = vmatprep.mubr.msk.f32.mxu0 %vm8036_vm0, %v8037_v6  ;;  %v10153_v24 = vadd.f32 %v2498_v13, %v1433_v53  ;;  %v329_v53 = vld [vmem:[%s12305_s2 + $0x178] sm:$0xff] }
 0x2ae   :  { %12375 = vst [vmem:[#allocation68_spill] sm:$0xff] %v10153_v24  ;;  %v1438_v59 = vpop.f32.mrb[234].mxu0 }
 0x2af   :  { %v6704_v49 = vpop.f32.mrb[235].mxu0  ;;  %v2503_v40 = vpop.f32.mrb[234].mxu1  ;;  %7249 = vmatmul.mubr.msk.f32.gmra.mrb[84].mxu0 %vm2546_vm2, %v327_v3 }
 0x2b0   :  { %v7083_v32 = vpop.f32.mrb[235].mxu1  ;;  %7251 = vmatprep.mubr.msk.f32.mxu0 %vm8036_vm0, %v8037_v6  ;;  %v10161_v48 = vadd.f32 %v2503_v40, %v1438_v59  ;;  %v330_v59 = vld [vmem:[%s12305_s2 + $0x180] sm:$0xff] }
 0x2b2   :  { %12376 = vst [vmem:[#allocation69_spill] sm:$0xff] %v10161_v48  ;;  %v1443_v36 = vpop.f32.mrb[236].mxu0 }
 0x2b3   :  { %v6707_v9 = vpop.f32.mrb[237].mxu0  ;;  %v2508_v0 = vpop.f32.mrb[236].mxu1  ;;  %7252 = vmatmul.mubr.msk.f32.gmra.mrb[86].mxu0 %vm2546_vm2, %v328_v8 }
 0x2b4   :  { %v7086_v13 = vpop.f32.mrb[237].mxu1  ;;  %7254 = vmatprep.mubr.msk.f32.mxu0 %vm8036_vm0, %v8037_v6  ;;  %v10169_v3 = vadd.f32 %v2508_v0, %v1443_v36  ;;  %v331_v36 = vld [vmem:[%s12305_s2 + $0x188] sm:$0xff] }
 0x2b6   :  { %12377 = vst [vmem:[#allocation70_spill] sm:$0xff] %v10169_v3  ;;  %v1448_v49 = vpop.f32.mrb[238].mxu0 }
 0x2b7   :  { %v6710_v32 = vpop.f32.mrb[239].mxu0  ;;  %v2513_v24 = vpop.f32.mrb[238].mxu1  ;;  %7255 = vmatmul.mubr.msk.f32.gmra.mrb[88].mxu0 %vm2546_vm2, %v329_v53 }
 0x2b8   :  { %v7089_v40 = vpop.f32.mrb[239].mxu1  ;;  %7257 = vmatprep.mubr.msk.f32.mxu0 %vm8036_vm0, %v8037_v6  ;;  %v10177_v8 = vadd.f32 %v2513_v24, %v1448_v49  ;;  %v332_v49 = vld [vmem:[%s12305_s2 + $0x190] sm:$0xff] }
 0x2ba   :  { %12378 = vst [vmem:[#allocation71_spill] sm:$0xff] %v10177_v8  ;;  %v1453_v9 = vpop.f32.mrb[240].mxu0 }
 0x2bb   :  { %v6713_v13 = vpop.f32.mrb[241].mxu0  ;;  %v2518_v48 = vpop.f32.mrb[240].mxu1  ;;  %7258 = vmatmul.mubr.msk.f32.gmra.mrb[90].mxu0 %vm2546_vm2, %v330_v59 }
 0x2bc   :  { %v7092_v0 = vpop.f32.mrb[241].mxu1  ;;  %7260 = vmatprep.mubr.msk.f32.mxu0 %vm8036_vm0, %v8037_v6  ;;  %v10185_v53 = vadd.f32 %v2518_v48, %v1453_v9 }
 0x2be   :  { %12379 = vst [vmem:[#allocation72_spill] sm:$0xff] %v10185_v53  ;;  %v1458_v32 = vpop.f32.mrb[242].mxu0 }
 0x2bf   :  { %v6716_v40 = vpop.f32.mrb[243].mxu0  ;;  %v2523_v3 = vpop.f32.mrb[242].mxu1  ;;  %7261 = vmatmul.mubr.msk.f32.gmra.mrb[92].mxu0 %vm2546_vm2, %v331_v36  ;;  %v333_v36 = vld [vmem:[%s12305_s2 + $0x198] sm:$0xff] }
 0x2c0   :  { %v7095_v24 = vpop.f32.mrb[243].mxu1  ;;  %7263 = vmatprep.mubr.msk.f32.mxu0 %vm8036_vm0, %v8037_v6  ;;  %v10193_v59 = vadd.f32 %v2523_v3, %v1458_v32 }
 0x2c2   :  { %v1463_v13 = vpop.f32.mrb[244].mxu0 }
 0x2c3   :  { %v6719_v0 = vpop.f32.mrb[245].mxu0  ;;  %v2528_v8 = vpop.f32.mrb[244].mxu1  ;;  %7264 = vmatmul.mubr.msk.f32.gmra.mrb[94].mxu0 %vm2546_vm2, %v332_v49 }
 0x2c4   :  { %v10196_v48 = vadd.f32 %v2528_v8, %v1463_v13  ;;  %v7098_v9 = vpop.f32.mrb[245].mxu1  ;;  %7266 = vmatprep.mubr.msk.f32.mxu0 %vm8036_vm0, %v8037_v6  ;;  %v334_v8 = vld [vmem:[%s12305_s2 + $0x1a0] sm:$0xff] }
 0x2c6   :  { %v1468_v40 = vpop.f32.mrb[246].mxu0 }
 0x2c7   :  { %v6722_v24 = vpop.f32.mrb[247].mxu0  ;;  %v2533_v53 = vpop.f32.mrb[246].mxu1  ;;  %7267 = vmatmul.mubr.msk.f32.gmra.mrb[96].mxu0 %vm2546_vm2, %v333_v36 }
 0x2c8   :  { %v10204_v3 = vadd.f32 %v2533_v53, %v1468_v40  ;;  %v7101_v32 = vpop.f32.mrb[247].mxu1  ;;  %7269 = vmatprep.mubr.msk.f32.mxu0 %vm8036_vm0, %v8037_v6  ;;  %v335_v53 = vld [vmem:[%s12305_s2 + $0x1a8] sm:$0xff]  ;;  %v10222_v24 = vld [vmem:[%s12306_s6] ss:$0 sm:$0xff] }
 0x2ca   :  { %12380 = vst [vmem:[#allocation73_spill] sm:$0xff] %v10204_v3  ;;  %v1473_v49 = vpop.f32.mrb[248].mxu0 }
 0x2cb   :  { %v6725_v13 = vpop.f32.mrb[249].mxu0  ;;  %v2538_v0 = vpop.f32.mrb[248].mxu1  ;;  %7270 = vmatmul.mubr.msk.f32.gmra.mrb[98].mxu0 %vm2546_vm2, %v334_v8  ;;  %v336_v8 = vld [vmem:[%s12305_s2 + $0x1b0] sm:$0xff] }
 0x2cc   :  { %v10212_v9 = vadd.f32 %v2538_v0, %v1473_v49  ;;  %7272 = vmatprep.mubr.msk.f32.mxu0 %vm8036_vm0, %v8037_v6  ;;  %v7104_v36 = vpop.f32.mrb[249].mxu1 }
 0x2ce   :  { %12381 = vst [vmem:[#allocation74_spill] sm:$0xff] %v10212_v9  ;;  %v2988_v40 = vpop.f32.mrb[250].mxu0 }
 0x2cf   :  { %v3612_v32 = vadd.f32 %v2988_v40, %v8777_v5  ;;  %v7115_v13 = vpop.f32.mrb[251].mxu0  ;;  %7273 = vmatmul.mubr.msk.f32.gmra.mrb[100].mxu0 %vm2546_vm2, %v335_v53  ;;  %v337_v5 = vld [vmem:[%s12305_s2 + $0x1b8] sm:$0xff] }
 0x2d0   :  { %7275 = vmatprep.mubr.msk.f32.mxu0 %vm8036_vm0, %v8037_v6  ;;  %v338_v13 = vld [vmem:[%s12305_s2 + $0x1c0] sm:$0xff] }
 0x2d1   :  { %v3744_v49 = vadd.f32 %v10222_v24, %v3612_v32 }
 0x2d2   :  { %v2993_v0 = vpop.f32.mrb[252].mxu0 }
 0x2d3   :  { %v3869_v36 = vmax.f32 %v3744_v49, 0.0  ;;  %v3613_v9 = vadd.f32 %v2993_v0, %v8797_v16  ;;  %v7118_v3 = vpop.f32.mrb[253].mxu0  ;;  %7276 = vmatmul.mubr.msk.f32.gmra.mrb[102].mxu0 %vm2546_vm2, %v336_v8 }
 0x2d4   :  { %7278 = vmatprep.mubr.msk.f32.mxu0 %vm8036_vm0, %v8037_v6 }
 0x2d5   :  { %v3745_v53 = vadd.f32 %v10222_v24, %v3613_v9  ;;  %7505 = vmatmul.mubr.msk.f32.vlgmr.msra.gmra.mrb[250].mxu1 %vm4009_vm3, %v3869_v36  ;;  %v339_v36 = vld [vmem:[%s12305_s2 + $0x1c8] sm:$0xff] }
 0x2d6   :  { %v2998_v40 = vpop.f32.mrb[254].mxu0  ;;  %7507 = vmatprep.mubr.msk.f32.mxu1 %vm8036_vm0, %v8037_v6 }
 0x2d7   :  { %v3870_v32 = vmax.f32 %v3745_v53, 0.0  ;;  %v3614_v16 = vadd.f32 %v2998_v40, %v8812_v23  ;;  %v7121_v3 = vpop.f32.mrb[255].mxu0  ;;  %7279 = vmatmul.mubr.msk.f32.gmra.mrb[104].mxu0 %vm2546_vm2, %v337_v5 }
 0x2d8   :  { %7281 = vmatprep.mubr.msk.f32.mxu0 %vm8036_vm0, %v8037_v6 }
 0x2d9   :  { %v3746_v9 = vadd.f32 %v10222_v24, %v3614_v16  ;;  %7508 = vmatmul.mubr.msk.f32.gmra.mrb[252].mxu1 %vm4009_vm3, %v3870_v32  ;;  %v340_v16 = vld [vmem:[%s12305_s2 + $0x1d0] sm:$0xff] }
 0x2da   :  { %v3003_v8 = vpop.f32.mrb[0].mxu0  ;;  %7510 = vmatprep.mubr.msk.f32.mxu1 %vm8036_vm0, %v8037_v6 }
 0x2db   :  { %v3871_v49 = vmax.f32 %v3746_v9, 0.0  ;;  %v3615_v23 = vadd.f32 %v3003_v8, %v8826_v30  ;;  %v7124_v0 = vpop.f32.mrb[1].mxu0  ;;  %7282 = vmatmul.mubr.msk.f32.gmra.mrb[106].mxu0 %vm2546_vm2, %v338_v13 }
 0x2dc   :  { %7284 = vmatprep.mubr.msk.f32.mxu0 %vm8036_vm0, %v8037_v6 }
 0x2dd   :  { %v3747_v5 = vadd.f32 %v10222_v24, %v3615_v23  ;;  %7511 = vmatmul.mubr.msk.f32.gmra.mrb[254].mxu1 %vm4009_vm3, %v3871_v49  ;;  %v341_v49 = vld [vmem:[%s12305_s2 + $0x1d8] sm:$0xff] }
 0x2de   :  { %v3008_v53 = vpop.f32.mrb[2].mxu0  ;;  %7513 = vmatprep.mubr.msk.f32.mxu1 %vm8036_vm0, %v8037_v6 }
 0x2df   :  { %v3872_v40 = vmax.f32 %v3747_v5, 0.0  ;;  %v3616_v30 = vadd.f32 %v3008_v53, %v8840_v37  ;;  %v7127_v32 = vpop.f32.mrb[3].mxu0  ;;  %7285 = vmatmul.mubr.msk.f32.gmra.mrb[108].mxu0 %vm2546_vm2, %v339_v36  ;;  %v342_v53 = vld [vmem:[%s12305_s2 + $0x1e0] sm:$0xff] }
 0x2e0   :  { %7287 = vmatprep.mubr.msk.f32.mxu0 %vm8036_vm0, %v8037_v6 }
 0x2e1   :  { %v3748_v3 = vadd.f32 %v10222_v24, %v3616_v30  ;;  %7514 = vmatmul.mubr.msk.f32.gmra.mrb[0].mxu1 %vm4009_vm3, %v3872_v40 }
 0x2e2   :  { %v3013_v13 = vpop.f32.mrb[4].mxu0  ;;  %7516 = vmatprep.mubr.msk.f32.mxu1 %vm8036_vm0, %v8037_v6 }
 0x2e3   :  { %v3873_v9 = vmax.f32 %v3748_v3, 0.0  ;;  %v3617_v37 = vadd.f32 %v3013_v13, %v8854_v44  ;;  %v7130_v8 = vpop.f32.mrb[5].mxu0  ;;  %7288 = vmatmul.mubr.msk.f32.gmra.mrb[110].mxu0 %vm2546_vm2, %v340_v16  ;;  %v343_v3 = vld [vmem:[%s12305_s2 + $0x1e8] sm:$0xff] }
 0x2e4   :  { %7290 = vmatprep.mubr.msk.f32.mxu0 %vm8036_vm0, %v8037_v6 }
 0x2e5   :  { %v3749_v23 = vadd.f32 %v10222_v24, %v3617_v37  ;;  %7517 = vmatmul.mubr.msk.f32.gmra.mrb[2].mxu1 %vm4009_vm3, %v3873_v9 }
 0x2e6   :  { %v3018_v0 = vpop.f32.mrb[6].mxu0  ;;  %7519 = vmatprep.mubr.msk.f32.mxu1 %vm8036_vm0, %v8037_v6 }
 0x2e7   :  { %v3874_v36 = vmax.f32 %v3749_v23, 0.0  ;;  %v3618_v44 = vadd.f32 %v3018_v0, %v8868_v51  ;;  %v7133_v5 = vpop.f32.mrb[7].mxu0  ;;  %7291 = vmatmul.mubr.msk.f32.gmra.mrb[112].mxu0 %vm2546_vm2, %v341_v49  ;;  %v344_v49 = vld [vmem:[%s12305_s2 + $0x1f0] sm:$0xff] }
 0x2e8   :  { %7293 = vmatprep.mubr.msk.f32.mxu0 %vm8036_vm0, %v8037_v6  ;;  %v345_v5 = vld [vmem:[%s12305_s2 + $0x1f8] sm:$0xff] }
 0x2e9   :  { %v3750_v40 = vadd.f32 %v10222_v24, %v3618_v44  ;;  %7520 = vmatmul.mubr.msk.f32.gmra.mrb[4].mxu1 %vm4009_vm3, %v3874_v36 }
 0x2ea   :  { %v3023_v30 = vpop.f32.mrb[8].mxu0  ;;  %7522 = vmatprep.mubr.msk.f32.mxu1 %vm8036_vm0, %v8037_v6 }
 0x2eb   :  { %v3875_v32 = vmax.f32 %v3750_v40, 0.0  ;;  %v3619_v51 = vadd.f32 %v3023_v30, %v8882_v58  ;;  %v7136_v16 = vpop.f32.mrb[9].mxu0  ;;  %7294 = vmatmul.mubr.msk.f32.gmra.mrb[114].mxu0 %vm2546_vm2, %v342_v53 }
 0x2ec   :  { %7296 = vmatprep.mubr.msk.f32.mxu0 %vm8036_vm0, %v8037_v6 }
 0x2ed   :  { %v3751_v13 = vadd.f32 %v10222_v24, %v3619_v51  ;;  %7523 = vmatmul.mubr.msk.f32.gmra.mrb[6].mxu1 %vm4009_vm3, %v3875_v32  ;;  %v346_v51 = vld [vmem:[%s12305_s2 + $0x200] sm:$0xff] }
 0x2ee   :  { %v3028_v9 = vpop.f32.mrb[10].mxu0  ;;  %7525 = vmatprep.mubr.msk.f32.mxu1 %vm8036_vm0, %v8037_v6 }
 0x2ef   :  { %v3876_v37 = vmax.f32 %v3751_v13, 0.0  ;;  %v3620_v58 = vadd.f32 %v3028_v9, %v8896_v2  ;;  %v7139_v8 = vpop.f32.mrb[11].mxu0  ;;  %7297 = vmatmul.mubr.msk.f32.gmra.mrb[116].mxu0 %vm2546_vm2, %v343_v3 }
 0x2f0   :  { %7299 = vmatprep.mubr.msk.f32.mxu0 %vm8036_vm0, %v8037_v6 }
 0x2f1   :  { %v3752_v23 = vadd.f32 %v10222_v24, %v3620_v58  ;;  %7526 = vmatmul.mubr.msk.f32.gmra.mrb[8].mxu1 %vm4009_vm3, %v3876_v37  ;;  %v347_v37 = vld [vmem:[%s12305_s2 + $0x208] sm:$0xff] }
 0x2f2   :  { %v3033_v0 = vpop.f32.mrb[12].mxu0  ;;  %7528 = vmatprep.mubr.msk.f32.mxu1 %vm8036_vm0, %v8037_v6 }
 0x2f3   :  { %v3877_v36 = vmax.f32 %v3752_v23, 0.0  ;;  %v3621_v2 = vadd.f32 %v3033_v0, %v8910_v11  ;;  %v7142_v44 = vpop.f32.mrb[13].mxu0  ;;  %7300 = vmatmul.mubr.msk.f32.gmra.mrb[118].mxu0 %vm2546_vm2, %v344_v49  ;;  %v348_v0 = vld [vmem:[%s12305_s2 + $0x210] sm:$0xff] }
 0x2f4   :  { %7302 = vmatprep.mubr.msk.f32.mxu0 %vm8036_vm0, %v8037_v6 }
 0x2f5   :  { %v3753_v53 = vadd.f32 %v10222_v24, %v3621_v2  ;;  %7529 = vmatmul.mubr.msk.f32.gmra.mrb[10].mxu1 %vm4009_vm3, %v3877_v36 }
 0x2f6   :  { %v3038_v40 = vpop.f32.mrb[14].mxu0  ;;  %7531 = vmatprep.mubr.msk.f32.mxu1 %vm8036_vm0, %v8037_v6 }
 0x2f7   :  { %v3878_v30 = vmax.f32 %v3753_v53, 0.0  ;;  %v3622_v11 = vadd.f32 %v3038_v40, %v8924_v19  ;;  %v7145_v32 = vpop.f32.mrb[15].mxu0  ;;  %7303 = vmatmul.mubr.msk.f32.gmra.mrb[120].mxu0 %vm2546_vm2, %v345_v5  ;;  %v349_v53 = vld [vmem:[%s12305_s2 + $0x218] sm:$0xff] }
 0x2f8   :  { %7305 = vmatprep.mubr.msk.f32.mxu0 %vm8036_vm0, %v8037_v6 }
 0x2f9   :  { %v3754_v16 = vadd.f32 %v10222_v24, %v3622_v11  ;;  %7532 = vmatmul.mubr.msk.f32.gmra.mrb[12].mxu1 %vm4009_vm3, %v3878_v30 }
 0x2fa   :  { %v3043_v3 = vpop.f32.mrb[16].mxu0  ;;  %7534 = vmatprep.mubr.msk.f32.mxu1 %vm8036_vm0, %v8037_v6 }
 0x2fb   :  { %v3879_v13 = vmax.f32 %v3754_v16, 0.0  ;;  %v3623_v19 = vadd.f32 %v3043_v3, %v8938_v27  ;;  %v7148_v9 = vpop.f32.mrb[17].mxu0  ;;  %7306 = vmatmul.mubr.msk.f32.gmra.mrb[122].mxu0 %vm2546_vm2, %v346_v51  ;;  %v350_v51 = vld [vmem:[%s12305_s2 + $0x220] sm:$0xff] }
 0x2fc   :  { %7308 = vmatprep.mubr.msk.f32.mxu0 %vm8036_vm0, %v8037_v6  ;;  %v351_v9 = vld [vmem:[%s12305_s2 + $0x228] sm:$0xff] }
 0x2fd   :  { %v3755_v58 = vadd.f32 %v10222_v24, %v3623_v19  ;;  %7535 = vmatmul.mubr.msk.f32.gmra.mrb[14].mxu1 %vm4009_vm3, %v3879_v13 }
 0x2fe   :  { %v3048_v8 = vpop.f32.mrb[18].mxu0  ;;  %7537 = vmatprep.mubr.msk.f32.mxu1 %vm8036_vm0, %v8037_v6 }
 0x2ff   :  { %v3880_v49 = vmax.f32 %v3755_v58, 0.0  ;;  %v3624_v27 = vadd.f32 %v3048_v8, %v8952_v35  ;;  %v7151_v23 = vpop.f32.mrb[19].mxu0  ;;  %7309 = vmatmul.mubr.msk.f32.gmra.mrb[124].mxu0 %vm2546_vm2, %v347_v37 }
 0x300   :  { %7311 = vmatprep.mubr.msk.f32.mxu0 %vm8036_vm0, %v8037_v6 }
 0x301   :  { %v3756_v36 = vadd.f32 %v10222_v24, %v3624_v27  ;;  %7538 = vmatmul.mubr.msk.f32.gmra.mrb[16].mxu1 %vm4009_vm3, %v3880_v49  ;;  %v352_v27 = vld [vmem:[%s12305_s2 + $0x230] sm:$0xff] }
 0x302   :  { %v3053_v2 = vpop.f32.mrb[20].mxu0  ;;  %7540 = vmatprep.mubr.msk.f32.mxu1 %vm8036_vm0, %v8037_v6 }
 0x303   :  { %v3881_v44 = vmax.f32 %v3756_v36, 0.0  ;;  %v3625_v35 = vadd.f32 %v3053_v2, %v8966_v43  ;;  %v7154_v5 = vpop.f32.mrb[21].mxu0  ;;  %7312 = vmatmul.mubr.msk.f32.gmra.mrb[126].mxu0 %vm2546_vm2, %v348_v0 }
 0x304   :  { %7314 = vmatprep.mubr.msk.f32.mxu0 %vm8036_vm0, %v8037_v6 }
 0x305   :  { %v3757_v40 = vadd.f32 %v10222_v24, %v3625_v35  ;;  %7541 = vmatmul.mubr.msk.f32.gmra.mrb[18].mxu1 %vm4009_vm3, %v3881_v44  ;;  %v353_v44 = vld [vmem:[%s12305_s2 + $0x238] sm:$0xff] }
 0x306   :  { %v3058_v30 = vpop.f32.mrb[22].mxu0  ;;  %7543 = vmatprep.mubr.msk.f32.mxu1 %vm8036_vm0, %v8037_v6 }
 0x307   :  { %v3882_v11 = vmax.f32 %v3757_v40, 0.0  ;;  %v3626_v43 = vadd.f32 %v3058_v30, %v8980_v52  ;;  %v7157_v32 = vpop.f32.mrb[23].mxu0  ;;  %7315 = vmatmul.mubr.msk.f32.gmra.mrb[128].mxu0 %vm2546_vm2, %v349_v53  ;;  %v354_v30 = vld [vmem:[%s12305_s2 + $0x240] sm:$0xff] }
 0x308   :  { %7317 = vmatprep.mubr.msk.f32.mxu0 %vm8036_vm0, %v8037_v6 }
 0x309   :  { %v3758_v16 = vadd.f32 %v10222_v24, %v3626_v43  ;;  %7544 = vmatmul.mubr.msk.f32.gmra.mrb[20].mxu1 %vm4009_vm3, %v3882_v11 }
 0x30a   :  { %v3063_v3 = vpop.f32.mrb[24].mxu0  ;;  %7546 = vmatprep.mubr.msk.f32.mxu1 %vm8036_vm0, %v8037_v6 }
 0x30b   :  { %v3883_v13 = vmax.f32 %v3758_v16, 0.0  ;;  %v3627_v52 = vadd.f32 %v3063_v3, %v8994_v60  ;;  %v7160_v19 = vpop.f32.mrb[25].mxu0  ;;  %7318 = vmatmul.mubr.msk.f32.gmra.mrb[130].mxu0 %vm2546_vm2, %v350_v51  ;;  %v355_v16 = vld [vmem:[%s12305_s2 + $0x248] sm:$0xff] }
 0x30c   :  { %7320 = vmatprep.mubr.msk.f32.mxu0 %vm8036_vm0, %v8037_v6 }
 0x30d   :  { %v3759_v37 = vadd.f32 %v10222_v24, %v3627_v52  ;;  %7547 = vmatmul.mubr.msk.f32.gmra.mrb[22].mxu1 %vm4009_vm3, %v3883_v13 }
 0x30e   :  { %v3068_v58 = vpop.f32.mrb[26].mxu0  ;;  %7549 = vmatprep.mubr.msk.f32.mxu1 %vm8036_vm0, %v8037_v6 }
 0x30f   :  { %v3884_v8 = vmax.f32 %v3759_v37, 0.0  ;;  %v3628_v60 = vadd.f32 %v3068_v58, %v9008_v7  ;;  %v7163_v49 = vpop.f32.mrb[27].mxu0  ;;  %7321 = vmatmul.mubr.msk.f32.gmra.mrb[132].mxu0 %vm2546_vm2, %v351_v9  ;;  %v356_v9 = vld [vmem:[%s12305_s2 + $0x250] sm:$0xff] }
 0x310   :  { %7323 = vmatprep.mubr.msk.f32.mxu0 %vm8036_vm0, %v8037_v6  ;;  %v357_v49 = vld [vmem:[%s12305_s2 + $0x258] sm:$0xff] }
 0x311   :  { %v3760_v23 = vadd.f32 %v10222_v24, %v3628_v60  ;;  %7550 = vmatmul.mubr.msk.f32.gmra.mrb[24].mxu1 %vm4009_vm3, %v3884_v8 }
 0x312   :  { %v3073_v0 = vpop.f32.mrb[28].mxu0  ;;  %7552 = vmatprep.mubr.msk.f32.mxu1 %vm8036_vm0, %v8037_v6 }
 0x313   :  { %v3885_v36 = vmax.f32 %v3760_v23, 0.0  ;;  %v3629_v7 = vadd.f32 %v3073_v0, %v9022_v15  ;;  %v7166_v2 = vpop.f32.mrb[29].mxu0  ;;  %7324 = vmatmul.mubr.msk.f32.gmra.mrb[134].mxu0 %vm2546_vm2, %v352_v27 }
 0x314   :  { %7326 = vmatprep.mubr.msk.f32.mxu0 %vm8036_vm0, %v8037_v6 }
 0x315   :  { %v3761_v35 = vadd.f32 %v10222_v24, %v3629_v7  ;;  %7553 = vmatmul.mubr.msk.f32.gmra.mrb[26].mxu1 %vm4009_vm3, %v3885_v36  ;;  %v358_v7 = vld [vmem:[%s12305_s2 + $0x260] sm:$0xff] }
 0x316   :  { %v3078_v5 = vpop.f32.mrb[30].mxu0  ;;  %7555 = vmatprep.mubr.msk.f32.mxu1 %vm8036_vm0, %v8037_v6 }
 0x317   :  { %v3886_v53 = vmax.f32 %v3761_v35, 0.0  ;;  %v3630_v15 = vadd.f32 %v3078_v5, %v9036_v25  ;;  %v7169_v40 = vpop.f32.mrb[31].mxu0  ;;  %7327 = vmatmul.mubr.msk.f32.gmra.mrb[136].mxu0 %vm2546_vm2, %v353_v44 }
 0x318   :  { %7329 = vmatprep.mubr.msk.f32.mxu0 %vm8036_vm0, %v8037_v6 }
 0x319   :  { %v3762_v11 = vadd.f32 %v10222_v24, %v3630_v15  ;;  %7556 = vmatmul.mubr.msk.f32.gmra.mrb[28].mxu1 %vm4009_vm3, %v3886_v53  ;;  %v359_v53 = vld [vmem:[%s12305_s2 + $0x268] sm:$0xff] }
 0x31a   :  { %v3083_v43 = vpop.f32.mrb[32].mxu0  ;;  %7558 = vmatprep.mubr.msk.f32.mxu1 %vm8036_vm0, %v8037_v6 }
 0x31b   :  { %v3887_v32 = vmax.f32 %v3762_v11, 0.0  ;;  %v3631_v25 = vadd.f32 %v3083_v43, %v9050_v34  ;;  %v7172_v51 = vpop.f32.mrb[33].mxu0  ;;  %7330 = vmatmul.mubr.msk.f32.gmra.mrb[138].mxu0 %vm2546_vm2, %v354_v30  ;;  %v360_v43 = vld [vmem:[%s12305_s2 + $0x270] sm:$0xff] }
 0x31c   :  { %7332 = vmatprep.mubr.msk.f32.mxu0 %vm8036_vm0, %v8037_v6 }
 0x31d   :  { %v3763_v3 = vadd.f32 %v10222_v24, %v3631_v25  ;;  %7559 = vmatmul.mubr.msk.f32.gmra.mrb[30].mxu1 %vm4009_vm3, %v3887_v32 }
 0x31e   :  { %v3088_v13 = vpop.f32.mrb[34].mxu0  ;;  %7561 = vmatprep.mubr.msk.f32.mxu1 %vm8036_vm0, %v8037_v6 }
 0x31f   :  { %v3888_v52 = vmax.f32 %v3763_v3, 0.0  ;;  %v3632_v34 = vadd.f32 %v3088_v13, %v9064_v45  ;;  %v7175_v19 = vpop.f32.mrb[35].mxu0  ;;  %7333 = vmatmul.mubr.msk.f32.gmra.mrb[140].mxu0 %vm2546_vm2, %v355_v16  ;;  %v361_v3 = vld [vmem:[%s12305_s2 + $0x278] sm:$0xff] }
 0x320   :  { %7335 = vmatprep.mubr.msk.f32.mxu0 %vm8036_vm0, %v8037_v6 }
 0x321   :  { %v3764_v37 = vadd.f32 %v10222_v24, %v3632_v34  ;;  %7562 = vmatmul.mubr.msk.f32.gmra.mrb[32].mxu1 %vm4009_vm3, %v3888_v52 }
 0x322   :  { %v3093_v58 = vpop.f32.mrb[36].mxu0  ;;  %7564 = vmatprep.mubr.msk.f32.mxu1 %vm8036_vm0, %v8037_v6 }
 0x323   :  { %v3889_v8 = vmax.f32 %v3764_v37, 0.0  ;;  %v3633_v45 = vadd.f32 %v3093_v58, %v9078_v54  ;;  %v7178_v60 = vpop.f32.mrb[37].mxu0  ;;  %7336 = vmatmul.mubr.msk.f32.gmra.mrb[142].mxu0 %vm2546_vm2, %v356_v9  ;;  %v362_v9 = vld [vmem:[%s12305_s2 + $0x280] sm:$0xff] }
 0x324   :  { %7338 = vmatprep.mubr.msk.f32.mxu0 %vm8036_vm0, %v8037_v6  ;;  %v363_v60 = vld [vmem:[%s12305_s2 + $0x288] sm:$0xff] }
 0x325   :  { %v3765_v27 = vadd.f32 %v10222_v24, %v3633_v45  ;;  %7565 = vmatmul.mubr.msk.f32.gmra.mrb[34].mxu1 %vm4009_vm3, %v3889_v8 }
 0x326   :  { %v3098_v23 = vpop.f32.mrb[38].mxu0  ;;  %7567 = vmatprep.mubr.msk.f32.mxu1 %vm8036_vm0, %v8037_v6 }
 0x327   :  { %v3890_v0 = vmax.f32 %v3765_v27, 0.0  ;;  %v3634_v54 = vadd.f32 %v3098_v23, %v9092_v63  ;;  %v7181_v36 = vpop.f32.mrb[39].mxu0  ;;  %7339 = vmatmul.mubr.msk.f32.gmra.mrb[144].mxu0 %vm2546_vm2, %v357_v49 }
 0x328   :  { %7341 = vmatprep.mubr.msk.f32.mxu0 %vm8036_vm0, %v8037_v6 }
 0x329   :  { %v3766_v2 = vadd.f32 %v10222_v24, %v3634_v54  ;;  %7568 = vmatmul.mubr.msk.f32.gmra.mrb[36].mxu1 %vm4009_vm3, %v3890_v0  ;;  %v364_v54 = vld [vmem:[%s12305_s2 + $0x290] sm:$0xff] }
 0x32a   :  { %v3103_v44 = vpop.f32.mrb[40].mxu0  ;;  %7570 = vmatprep.mubr.msk.f32.mxu1 %vm8036_vm0, %v8037_v6 }
 0x32b   :  { %v3891_v35 = vmax.f32 %v3766_v2, 0.0  ;;  %v3635_v63 = vadd.f32 %v3103_v44, %v9106_v12  ;;  %v7184_v5 = vpop.f32.mrb[41].mxu0  ;;  %7342 = vmatmul.mubr.msk.f32.gmra.mrb[146].mxu0 %vm2546_vm2, %v358_v7 }
 0x32c   :  { %7344 = vmatprep.mubr.msk.f32.mxu0 %vm8036_vm0, %v8037_v6 }
 0x32d   :  { %v3767_v15 = vadd.f32 %v10222_v24, %v3635_v63  ;;  %7571 = vmatmul.mubr.msk.f32.gmra.mrb[38].mxu1 %vm4009_vm3, %v3891_v35  ;;  %v365_v35 = vld [vmem:[%s12305_s2 + $0x298] sm:$0xff] }
 0x32e   :  { %v3108_v40 = vpop.f32.mrb[42].mxu0  ;;  %7573 = vmatprep.mubr.msk.f32.mxu1 %vm8036_vm0, %v8037_v6 }
 0x32f   :  { %v3892_v30 = vmax.f32 %v3767_v15, 0.0  ;;  %v3636_v12 = vadd.f32 %v3108_v40, %v9120_v22  ;;  %v7187_v11 = vpop.f32.mrb[43].mxu0  ;;  %7345 = vmatmul.mubr.msk.f32.gmra.mrb[148].mxu0 %vm2546_vm2, %v359_v53  ;;  %v366_v40 = vld [vmem:[%s12305_s2 + $0x2a0] sm:$0xff] }
 0x330   :  { %7347 = vmatprep.mubr.msk.f32.mxu0 %vm8036_vm0, %v8037_v6 }
 0x331   :  { %v3768_v32 = vadd.f32 %v10222_v24, %v3636_v12  ;;  %7574 = vmatmul.mubr.msk.f32.gmra.mrb[40].mxu1 %vm4009_vm3, %v3892_v30 }
 0x332   :  { %v3113_v25 = vpop.f32.mrb[44].mxu0  ;;  %7576 = vmatprep.mubr.msk.f32.mxu1 %vm8036_vm0, %v8037_v6 }
 0x333   :  { %v3893_v51 = vmax.f32 %v3768_v32, 0.0  ;;  %v3637_v22 = vadd.f32 %v3113_v25, %v9134_v33  ;;  %v7190_v16 = vpop.f32.mrb[45].mxu0  ;;  %7348 = vmatmul.mubr.msk.f32.gmra.mrb[150].mxu0 %vm2546_vm2, %v360_v43  ;;  %v367_v32 = vld [vmem:[%s12305_s2 + $0x2a8] sm:$0xff] }
 0x334   :  { %7350 = vmatprep.mubr.msk.f32.mxu0 %vm8036_vm0, %v8037_v6 }
 0x335   :  { %v3769_v13 = vadd.f32 %v10222_v24, %v3637_v22  ;;  %7577 = vmatmul.mubr.msk.f32.gmra.mrb[42].mxu1 %vm4009_vm3, %v3893_v51 }
 0x336   :  { %v3118_v52 = vpop.f32.mrb[46].mxu0  ;;  %7579 = vmatprep.mubr.msk.f32.mxu1 %vm8036_vm0, %v8037_v6 }
 0x337   :  { %v3894_v34 = vmax.f32 %v3769_v13, 0.0  ;;  %v3638_v33 = vadd.f32 %v3118_v52, %v9148_v46  ;;  %v7193_v19 = vpop.f32.mrb[47].mxu0  ;;  %7351 = vmatmul.mubr.msk.f32.gmra.mrb[152].mxu0 %vm2546_vm2, %v361_v3  ;;  %v368_v3 = vld [vmem:[%s12305_s2 + $0x2b0] sm:$0xff] }
 0x338   :  { %7353 = vmatprep.mubr.msk.f32.mxu0 %vm8036_vm0, %v8037_v6  ;;  %v369_v19 = vld [vmem:[%s12305_s2 + $0x2b8] sm:$0xff] }
 0x339   :  { %v3770_v37 = vadd.f32 %v10222_v24, %v3638_v33  ;;  %7580 = vmatmul.mubr.msk.f32.gmra.mrb[44].mxu1 %vm4009_vm3, %v3894_v34 }
 0x33a   :  { %v3123_v58 = vpop.f32.mrb[48].mxu0  ;;  %7582 = vmatprep.mubr.msk.f32.mxu1 %vm8036_vm0, %v8037_v6 }
 0x33b   :  { %v3895_v8 = vmax.f32 %v3770_v37, 0.0  ;;  %v3639_v46 = vadd.f32 %v3123_v58, %v9162_v56  ;;  %v7196_v45 = vpop.f32.mrb[49].mxu0  ;;  %7354 = vmatmul.mubr.msk.f32.gmra.mrb[154].mxu0 %vm2546_vm2, %v362_v9 }
 0x33c   :  { %7356 = vmatprep.mubr.msk.f32.mxu0 %vm8036_vm0, %v8037_v6 }
 0x33d   :  { %v3771_v49 = vadd.f32 %v10222_v24, %v3639_v46  ;;  %7583 = vmatmul.mubr.msk.f32.gmra.mrb[46].mxu1 %vm4009_vm3, %v3895_v8  ;;  %v370_v46 = vld [vmem:[%s12305_s2 + $0x2c0] sm:$0xff] }
 0x33e   :  { %v3128_v27 = vpop.f32.mrb[50].mxu0  ;;  %7585 = vmatprep.mubr.msk.f32.mxu1 %vm8036_vm0, %v8037_v6 }
 0x33f   :  { %v3896_v23 = vmax.f32 %v3771_v49, 0.0  ;;  %v3640_v56 = vadd.f32 %v3128_v27, %v9176_v4  ;;  %v7199_v0 = vpop.f32.mrb[51].mxu0  ;;  %7357 = vmatmul.mubr.msk.f32.gmra.mrb[156].mxu0 %vm2546_vm2, %v363_v60 }
 0x340   :  { %7359 = vmatprep.mubr.msk.f32.mxu0 %vm8036_vm0, %v8037_v6 }
 0x341   :  { %v3772_v36 = vadd.f32 %v10222_v24, %v3640_v56  ;;  %7586 = vmatmul.mubr.msk.f32.gmra.mrb[48].mxu1 %vm4009_vm3, %v3896_v23  ;;  %v371_v23 = vld [vmem:[%s12305_s2 + $0x2c8] sm:$0xff] }
 0x342   :  { %v3133_v7 = vpop.f32.mrb[52].mxu0  ;;  %7588 = vmatprep.mubr.msk.f32.mxu1 %vm8036_vm0, %v8037_v6 }
 0x343   :  { %v3897_v2 = vmax.f32 %v3772_v36, 0.0  ;;  %v3641_v4 = vadd.f32 %v3133_v7, %v9190_v18  ;;  %v7202_v44 = vpop.f32.mrb[53].mxu0  ;;  %7360 = vmatmul.mubr.msk.f32.gmra.mrb[158].mxu0 %vm2546_vm2, %v364_v54  ;;  %v372_v7 = vld [vmem:[%s12305_s2 + $0x2d0] sm:$0xff] }
 0x344   :  { %7362 = vmatprep.mubr.msk.f32.mxu0 %vm8036_vm0, %v8037_v6 }
 0x345   :  { %v3773_v63 = vadd.f32 %v10222_v24, %v3641_v4  ;;  %7589 = vmatmul.mubr.msk.f32.gmra.mrb[50].mxu1 %vm4009_vm3, %v3897_v2 }
 0x346   :  { %v3138_v5 = vpop.f32.mrb[54].mxu0  ;;  %7591 = vmatprep.mubr.msk.f32.mxu1 %vm8036_vm0, %v8037_v6 }
 0x347   :  { %v3898_v53 = vmax.f32 %v3773_v63, 0.0  ;;  %v3642_v18 = vadd.f32 %v3138_v5, %v9204_v31  ;;  %v7205_v15 = vpop.f32.mrb[55].mxu0  ;;  %7363 = vmatmul.mubr.msk.f32.gmra.mrb[160].mxu0 %vm2546_vm2, %v365_v35  ;;  %v373_v63 = vld [vmem:[%s12305_s2 + $0x2d8] sm:$0xff] }
 0x348   :  { %7365 = vmatprep.mubr.msk.f32.mxu0 %vm8036_vm0, %v8037_v6 }
 0x349   :  { %v3774_v30 = vadd.f32 %v10222_v24, %v3642_v18  ;;  %7592 = vmatmul.mubr.msk.f32.gmra.mrb[52].mxu1 %vm4009_vm3, %v3898_v53 }
 0x34a   :  { %v3143_v12 = vpop.f32.mrb[56].mxu0  ;;  %7594 = vmatprep.mubr.msk.f32.mxu1 %vm8036_vm0, %v8037_v6 }
 0x34b   :  { %v3899_v11 = vmax.f32 %v3774_v30, 0.0  ;;  %v3643_v31 = vadd.f32 %v3143_v12, %v9218_v42  ;;  %v7208_v43 = vpop.f32.mrb[57].mxu0  ;;  %7366 = vmatmul.mubr.msk.f32.gmra.mrb[162].mxu0 %vm2546_vm2, %v366_v40  ;;  %v374_v40 = vld [vmem:[%s12305_s2 + $0x2e0] sm:$0xff] }
 0x34c   :  { %7368 = vmatprep.mubr.msk.f32.mxu0 %vm8036_vm0, %v8037_v6  ;;  %v375_v43 = vld [vmem:[%s12305_s2 + $0x2e8] sm:$0xff] }
 0x34d   :  { %v3775_v25 = vadd.f32 %v10222_v24, %v3643_v31  ;;  %7595 = vmatmul.mubr.msk.f32.gmra.mrb[54].mxu1 %vm4009_vm3, %v3899_v11 }
 0x34e   :  { %v3148_v51 = vpop.f32.mrb[58].mxu0  ;;  %7597 = vmatprep.mubr.msk.f32.mxu1 %vm8036_vm0, %v8037_v6 }
 0x34f   :  { %v3900_v22 = vmax.f32 %v3775_v25, 0.0  ;;  %v3644_v42 = vadd.f32 %v3148_v51, %v9238_v61  ;;  %v7211_v16 = vpop.f32.mrb[59].mxu0  ;;  %7369 = vmatmul.mubr.msk.f32.gmra.mrb[164].mxu0 %vm2546_vm2, %v367_v32 }
 0x350   :  { %7371 = vmatprep.mubr.msk.f32.mxu0 %vm8036_vm0, %v8037_v6 }
 0x351   :  { %v3776_v13 = vadd.f32 %v10222_v24, %v3644_v42  ;;  %7598 = vmatmul.mubr.msk.f32.gmra.mrb[56].mxu1 %vm4009_vm3, %v3900_v22  ;;  %v376_v42 = vld [vmem:[%s12305_s2 + $0x2f0] sm:$0xff] }
 0x352   :  { %v3153_v52 = vpop.f32.mrb[60].mxu0  ;;  %7600 = vmatprep.mubr.msk.f32.mxu1 %vm8036_vm0, %v8037_v6 }
 0x353   :  { %v3901_v34 = vmax.f32 %v3776_v13, 0.0  ;;  %v3645_v61 = vadd.f32 %v3153_v52, %v9252_v14  ;;  %v7214_v33 = vpop.f32.mrb[61].mxu0  ;;  %7372 = vmatmul.mubr.msk.f32.gmra.mrb[166].mxu0 %vm2546_vm2, %v368_v3 }
 0x354   :  { %7374 = vmatprep.mubr.msk.f32.mxu0 %vm8036_vm0, %v8037_v6 }
 0x355   :  { %v3777_v9 = vadd.f32 %v10222_v24, %v3645_v61  ;;  %7601 = vmatmul.mubr.msk.f32.gmra.mrb[58].mxu1 %vm4009_vm3, %v3901_v34  ;;  %v377_v34 = vld [vmem:[%s12305_s2 + $0x2f8] sm:$0xff] }
 0x356   :  { %v3158_v37 = vpop.f32.mrb[62].mxu0  ;;  %7603 = vmatprep.mubr.msk.f32.mxu1 %vm8036_vm0, %v8037_v6 }
 0x357   :  { %v3902_v58 = vmax.f32 %v3777_v9, 0.0  ;;  %v3646_v14 = vadd.f32 %v3158_v37, %v9267_v29  ;;  %v7217_v8 = vpop.f32.mrb[63].mxu0  ;;  %7375 = vmatmul.mubr.msk.f32.gmra.mrb[168].mxu0 %vm2546_vm2, %v369_v19  ;;  %v378_v37 = vld [vmem:[%s12305_s2 + $0x300] sm:$0xff] }
 0x358   :  { %7377 = vmatprep.mubr.msk.f32.mxu0 %vm8036_vm0, %v8037_v6 }
 0x359   :  { %v3778_v45 = vadd.f32 %v10222_v24, %v3646_v14  ;;  %7604 = vmatmul.mubr.msk.f32.gmra.mrb[60].mxu1 %vm4009_vm3, %v3902_v58 }
 0x35a   :  { %v3163_v60 = vpop.f32.mrb[64].mxu0  ;;  %7606 = vmatprep.mubr.msk.f32.mxu1 %vm8036_vm0, %v8037_v6 }
 0x35b   :  { %v3903_v49 = vmax.f32 %v3778_v45, 0.0  ;;  %v3647_v29 = vadd.f32 %v3163_v60, %v9281_v41  ;;  %v7220_v27 = vpop.f32.mrb[65].mxu0  ;;  %7378 = vmatmul.mubr.msk.f32.gmra.mrb[170].mxu0 %vm2546_vm2, %v370_v46  ;;  %v379_v45 = vld [vmem:[%s12305_s2 + $0x308] sm:$0xff] }
 0x35c   :  { %7380 = vmatprep.mubr.msk.f32.mxu0 %vm8036_vm0, %v8037_v6 }
 0x35d   :  { %v3779_v56 = vadd.f32 %v10222_v24, %v3647_v29  ;;  %7607 = vmatmul.mubr.msk.f32.gmra.mrb[62].mxu1 %vm4009_vm3, %v3903_v49 }
 0x35e   :  { %v3168_v0 = vpop.f32.mrb[66].mxu0  ;;  %7609 = vmatprep.mubr.msk.f32.mxu1 %vm8036_vm0, %v8037_v6 }
 0x35f   :  { %v3904_v54 = vmax.f32 %v3779_v56, 0.0  ;;  %v3648_v41 = vadd.f32 %v3168_v0, %v9295_v57  ;;  %v7223_v36 = vpop.f32.mrb[67].mxu0  ;;  %7381 = vmatmul.mubr.msk.f32.gmra.mrb[172].mxu0 %vm2546_vm2, %v371_v23  ;;  %v380_v23 = vld [vmem:[%s12305_s2 + $0x310] sm:$0xff] }
 0x360   :  { %7383 = vmatprep.mubr.msk.f32.mxu0 %vm8036_vm0, %v8037_v6  ;;  %v381_v36 = vld [vmem:[%s12305_s2 + $0x318] sm:$0xff] }
 0x361   :  { %v3780_v2 = vadd.f32 %v10222_v24, %v3648_v41  ;;  %7610 = vmatmul.mubr.msk.f32.gmra.mrb[64].mxu1 %vm4009_vm3, %v3904_v54 }
 0x362   :  { %v3173_v4 = vpop.f32.mrb[68].mxu0  ;;  %7612 = vmatprep.mubr.msk.f32.mxu1 %vm8036_vm0, %v8037_v6 }
 0x363   :  { %v3905_v44 = vmax.f32 %v3780_v2, 0.0  ;;  %v3649_v57 = vadd.f32 %v3173_v4, %v9309_v10  ;;  %v7226_v35 = vpop.f32.mrb[69].mxu0  ;;  %7384 = vmatmul.mubr.msk.f32.gmra.mrb[174].mxu0 %vm2546_vm2, %v372_v7 }
 0x364   :  { %7386 = vmatprep.mubr.msk.f32.mxu0 %vm8036_vm0, %v8037_v6 }
 0x365   :  { %v3781_v5 = vadd.f32 %v10222_v24, %v3649_v57  ;;  %7613 = vmatmul.mubr.msk.f32.gmra.mrb[66].mxu1 %vm4009_vm3, %v3905_v44  ;;  %v382_v57 = vld [vmem:[%s12305_s2 + $0x320] sm:$0xff] }
 0x366   :  { %v3178_v53 = vpop.f32.mrb[70].mxu0  ;;  %7615 = vmatprep.mubr.msk.f32.mxu1 %vm8036_vm0, %v8037_v6 }
 0x367   :  { %v3906_v18 = vmax.f32 %v3781_v5, 0.0  ;;  %v3650_v10 = vadd.f32 %v3178_v53, %v9323_v28  ;;  %v7229_v15 = vpop.f32.mrb[71].mxu0  ;;  %7387 = vmatmul.mubr.msk.f32.gmra.mrb[176].mxu0 %vm2546_vm2, %v373_v63 }
 0x368   :  { %7389 = vmatprep.mubr.msk.f32.mxu0 %vm8036_vm0, %v8037_v6 }
 0x369   :  { %v3782_v30 = vadd.f32 %v10222_v24, %v3650_v10  ;;  %7616 = vmatmul.mubr.msk.f32.gmra.mrb[68].mxu1 %vm4009_vm3, %v3906_v18  ;;  %v383_v18 = vld [vmem:[%s12305_s2 + $0x328] sm:$0xff] }
 0x36a   :  { %v3183_v12 = vpop.f32.mrb[72].mxu0  ;;  %7618 = vmatprep.mubr.msk.f32.mxu1 %vm8036_vm0, %v8037_v6 }
 0x36b   :  { %v3907_v11 = vmax.f32 %v3782_v30, 0.0  ;;  %v3651_v28 = vadd.f32 %v3183_v12, %v9337_v47  ;;  %v7232_v31 = vpop.f32.mrb[73].mxu0  ;;  %7390 = vmatmul.mubr.msk.f32.gmra.mrb[178].mxu0 %vm2546_vm2, %v374_v40  ;;  %v384_v12 = vld [vmem:[%s12305_s2 + $0x330] sm:$0xff] }
 0x36c   :  { %7392 = vmatprep.mubr.msk.f32.mxu0 %vm8036_vm0, %v8037_v6 }
 0x36d   :  { %v3783_v32 = vadd.f32 %v10222_v24, %v3651_v28  ;;  %7619 = vmatmul.mubr.msk.f32.gmra.mrb[70].mxu1 %vm4009_vm3, %v3907_v11 }
 0x36e   :  { %v3188_v25 = vpop.f32.mrb[74].mxu0  ;;  %7621 = vmatprep.mubr.msk.f32.mxu1 %vm8036_vm0, %v8037_v6 }
 0x36f   :  { %v3908_v51 = vmax.f32 %v3783_v32, 0.0  ;;  %v3652_v47 = vadd.f32 %v3188_v25, %v9351_v62  ;;  %v7235_v22 = vpop.f32.mrb[75].mxu0  ;;  %7393 = vmatmul.mubr.msk.f32.gmra.mrb[180].mxu0 %vm2546_vm2, %v375_v43  ;;  %v385_v32 = vld [vmem:[%s12305_s2 + $0x338] sm:$0xff] }
 0x370   :  { %7395 = vmatprep.mubr.msk.f32.mxu0 %vm8036_vm0, %v8037_v6 }
 0x371   :  { %v3784_v16 = vadd.f32 %v10222_v24, %v3652_v47  ;;  %7622 = vmatmul.mubr.msk.f32.gmra.mrb[72].mxu1 %vm4009_vm3, %v3908_v51 }
 0x372   :  { %v3193_v3 = vpop.f32.mrb[76].mxu0  ;;  %7624 = vmatprep.mubr.msk.f32.mxu1 %vm8036_vm0, %v8037_v6 }
 0x373   :  { %v3909_v13 = vmax.f32 %v3784_v16, 0.0  ;;  %v3653_v62 = vadd.f32 %v3193_v3, %v9365_v20  ;;  %v7238_v52 = vpop.f32.mrb[77].mxu0  ;;  %7396 = vmatmul.mubr.msk.f32.gmra.mrb[182].mxu0 %vm2546_vm2, %v376_v42  ;;  %v386_v16 = vld [vmem:[%s12305_s2 + $0x340] sm:$0xff] }
 0x374   :  { %7398 = vmatprep.mubr.msk.f32.mxu0 %vm8036_vm0, %v8037_v6  ;;  %v12383_v52 = vld [vmem:[#allocation3_spill] sm:$0xff] }
 0x375   :  { %v3785_v61 = vadd.f32 %v10222_v24, %v3653_v62  ;;  %7625 = vmatmul.mubr.msk.f32.gmra.mrb[74].mxu1 %vm4009_vm3, %v3909_v13 }
 0x376   :  { %v3198_v33 = vpop.f32.mrb[78].mxu0  ;;  %7627 = vmatprep.mubr.msk.f32.mxu1 %vm8036_vm0, %v8037_v6 }
 0x377   :  { %v3910_v19 = vmax.f32 %v3785_v61, 0.0  ;;  %v3654_v20 = vadd.f32 %v3198_v33, %v9379_v38  ;;  %v7241_v9 = vpop.f32.mrb[79].mxu0  ;;  %7399 = vmatmul.mubr.msk.f32.gmra.mrb[184].mxu0 %vm2546_vm2, %v377_v34  ;;  %v387_v33 = vld [vmem:[%s12305_s2 + $0x348] sm:$0xff] }
 0x378   :  { %7401 = vmatprep.mubr.msk.f32.mxu0 %vm8036_vm0, %v8037_v6 }
 0x379   :  { %v3786_v58 = vadd.f32 %v10222_v24, %v3654_v20  ;;  %7628 = vmatmul.mubr.msk.f32.gmra.mrb[76].mxu1 %vm4009_vm3, %v3910_v19 }
 0x37a   :  { %v3203_v14 = vpop.f32.mrb[80].mxu0  ;;  %7630 = vmatprep.mubr.msk.f32.mxu1 %vm8036_vm0, %v8037_v6 }
 0x37b   :  { %v3911_v8 = vmax.f32 %v3786_v58, 0.0  ;;  %v3655_v38 = vadd.f32 %v3203_v14, %v9393_v55  ;;  %v7244_v46 = vpop.f32.mrb[81].mxu0  ;;  %7402 = vmatmul.mubr.msk.f32.gmra.mrb[186].mxu0 %vm2546_vm2, %v378_v37  ;;  %v12384_v37 = vld [vmem:[#allocation4_spill] sm:$0xff] }
 0x37c   :  { %7404 = vmatprep.mubr.msk.f32.mxu0 %vm8036_vm0, %v8037_v6 }
 0x37d   :  { %v3787_v60 = vadd.f32 %v10222_v24, %v3655_v38  ;;  %7631 = vmatmul.mubr.msk.f32.gmra.mrb[78].mxu1 %vm4009_vm3, %v3911_v8  ;;  %v388_v8 = vld [vmem:[%s12305_s2 + $0x350] sm:$0xff] }
 0x37e   :  { %v3208_v49 = vpop.f32.mrb[82].mxu0  ;;  %7633 = vmatprep.mubr.msk.f32.mxu1 %vm8036_vm0, %v8037_v6 }
 0x37f   :  { %v3912_v29 = vmax.f32 %v3787_v60, 0.0  ;;  %v3656_v55 = vadd.f32 %v3208_v49, %v9407_v17  ;;  %v7247_v27 = vpop.f32.mrb[83].mxu0  ;;  %7405 = vmatmul.mubr.msk.f32.gmra.mrb[188].mxu0 %vm2546_vm2, %v379_v45  ;;  %v12385_v60 = vld [vmem:[#allocation5_spill] sm:$0xff] }
 0x380   :  { %7407 = vmatprep.mubr.msk.f32.mxu0 %vm8036_vm0, %v8037_v6 }
 0x381   :  { %v3788_v56 = vadd.f32 %v10222_v24, %v3656_v55  ;;  %7634 = vmatmul.mubr.msk.f32.gmra.mrb[80].mxu1 %vm4009_vm3, %v3912_v29  ;;  %v389_v55 = vld [vmem:[%s12305_s2 + $0x358] sm:$0xff] }
 0x382   :  { %v3213_v0 = vpop.f32.mrb[84].mxu0  ;;  %7636 = vmatprep.mubr.msk.f32.mxu1 %vm8036_vm0, %v8037_v6 }
 0x383   :  { %v3913_v54 = vmax.f32 %v3788_v56, 0.0  ;;  %v3657_v17 = vadd.f32 %v3213_v0, %v9421_v39  ;;  %v7250_v41 = vpop.f32.mrb[85].mxu0  ;;  %7408 = vmatmul.mubr.msk.f32.gmra.mrb[190].mxu0 %vm2546_vm2, %v380_v23  ;;  %v10821_v56 = vld [vmem:[%s12307_s8] ss:$0 sm:$0xff] }
 0x384   :  { %7410 = vmatprep.mubr.msk.f32.mxu0 %vm8036_vm0, %v8037_v6 }
 0x385   :  { %v3789_v7 = vadd.f32 %v10222_v24, %v3657_v17  ;;  %7637 = vmatmul.mubr.msk.f32.gmra.mrb[82].mxu1 %vm4009_vm3, %v3913_v54  ;;  %v12386_v54 = vld [vmem:[#allocation6_spill] sm:$0xff] }
 0x386   :  { %v3218_v2 = vpop.f32.mrb[86].mxu0  ;;  %7639 = vmatprep.mubr.msk.f32.mxu1 %vm8036_vm0, %v8037_v6 }
 0x387   :  { %v3914_v4 = vmax.f32 %v3789_v7, 0.0  ;;  %v3658_v39 = vadd.f32 %v3218_v2, %v9435_v1  ;;  %v7253_v44 = vpop.f32.mrb[87].mxu0  ;;  %7411 = vmatmul.mubr.msk.f32.gmra.mrb[192].mxu0 %vm2546_vm2, %v381_v36  ;;  %v390_v7 = vld [vmem:[%s12305_s2 + $0x360] sm:$0xff] }
 0x388   :  { %7413 = vmatprep.mubr.msk.f32.mxu0 %vm8036_vm0, %v8037_v6 }
 0x389   :  { %v3790_v35 = vadd.f32 %v10222_v24, %v3658_v39  ;;  %7640 = vmatmul.mubr.msk.f32.gmra.mrb[84].mxu1 %vm4009_vm3, %v3914_v4 }
 0x38a   :  { %v3223_v63 = vpop.f32.mrb[88].mxu0  ;;  %7642 = vmatprep.mubr.msk.f32.mxu1 %vm8036_vm0, %v8037_v6 }
 0x38b   :  { %v3915_v5 = vmax.f32 %v3790_v35, 0.0  ;;  %v3659_v1 = vadd.f32 %v3223_v63, %v9449_v26  ;;  %v7256_v53 = vpop.f32.mrb[89].mxu0  ;;  %7414 = vmatmul.mubr.msk.f32.gmra.mrb[194].mxu0 %vm2546_vm2, %v382_v57  ;;  %v7907_v35 = vld [vmem:[%s12305_s2] sm:$0xff] }
 0x38c   :  { %7416 = vmatprep.mubr.msk.f32.mxu0 %vm8036_vm0, %v8037_v6 }
 0x38d   :  { %v3791_v10 = vadd.f32 %v10222_v24, %v3659_v1  ;;  %7643 = vmatmul.mubr.msk.f32.gmra.mrb[86].mxu1 %vm4009_vm3, %v3915_v5  ;;  %v12387_v5 = vld [vmem:[#allocation7_spill] sm:$0xff] }
 0x38e   :  { %v3228_v15 = vpop.f32.mrb[90].mxu0  ;;  %7645 = vmatprep.mubr.msk.f32.mxu1 %vm8036_vm0, %v8037_v6 }
 0x38f   :  { %v3916_v40 = vmax.f32 %v3791_v10, 0.0  ;;  %v3660_v26 = vadd.f32 %v3228_v15, %v9463_v50  ;;  %v7259_v30 = vpop.f32.mrb[91].mxu0  ;;  %7417 = vmatmul.mubr.msk.f32.gmra.mrb[196].mxu0 %vm2546_vm2, %v383_v18  ;;  %v391_v10 = vld [vmem:[%s12305_s2 + $0x368] sm:$0xff] }
 0x390   :  { %7419 = vmatprep.mubr.msk.f32.mxu0 %vm8036_vm0, %v8037_v6 }
 0x391   :  { %v3792_v11 = vadd.f32 %v10222_v24, %v3660_v26  ;;  %7646 = vmatmul.mubr.msk.f32.gmra.mrb[88].mxu1 %vm4009_vm3, %v3916_v40 }
 0x392   :  { %v3233_v28 = vpop.f32.mrb[92].mxu0  ;;  %7648 = vmatprep.mubr.msk.f32.mxu1 %vm8036_vm0, %v8037_v6 }
 0x393   :  { %v3917_v31 = vmax.f32 %v3792_v11, 0.0  ;;  %v3661_v50 = vadd.f32 %v3233_v28, %v9477_v21  ;;  %v7262_v43 = vpop.f32.mrb[93].mxu0  ;;  %7420 = vmatmul.mubr.msk.f32.gmra.mrb[198].mxu0 %vm2546_vm2, %v384_v12  ;;  %v12382_v21 = vld [vmem:[#allocation2_spill] sm:$0xff]  ;;  %v7908_v11 = vld [vmem:[%s12305_s2 + $0x8] sm:$0xff] }
 0x394   :  { %7422 = vmatprep.mubr.msk.f32.mxu0 %vm8036_vm0, %v8037_v6 }
 0x395   :  { %v3793_v25 = vadd.f32 %v10222_v24, %v3661_v50  ;;  %7649 = vmatmul.mubr.msk.f32.gmra.mrb[90].mxu1 %vm4009_vm3, %v3917_v31  ;;  %v12388_v31 = vld [vmem:[#allocation8_spill] sm:$0xff] }
 0x396   :  { %v3238_v51 = vpop.f32.mrb[94].mxu0  ;;  %7651 = vmatprep.mubr.msk.f32.mxu1 %vm8036_vm0, %v8037_v6 }
 0x397   :  { %v3918_v47 = vmax.f32 %v3793_v25, 0.0  ;;  %v3662_v22 = vadd.f32 %v3238_v51, %v12382_v21  ;;  %v7265_v42 = vpop.f32.mrb[95].mxu0  ;;  %7423 = vmatmul.mubr.msk.f32.gmra.mrb[200].mxu0 %vm2546_vm2, %v385_v32  ;;  %v392_v25 = vld [vmem:[%s12305_s2 + $0x370] sm:$0xff] }
 0x398   :  { %7425 = vmatprep.mubr.msk.f32.mxu0 %vm8036_vm0, %v8037_v6 }
 0x399   :  { %v3794_v3 = vadd.f32 %v10222_v24, %v3662_v22  ;;  %7652 = vmatmul.mubr.msk.f32.gmra.mrb[92].mxu1 %vm4009_vm3, %v3918_v47  ;;  %v10792_v24 = vld [vmem:[%s12306_s6] ss:$0 sm:$0xff] }
 0x39a   :  { %v3243_v13 = vpop.f32.mrb[96].mxu0  ;;  %7654 = vmatprep.mubr.msk.f32.mxu1 %vm8036_vm0, %v8037_v6 }
 0x39b   :  { %v3919_v62 = vmax.f32 %v3794_v3, 0.0  ;;  %v3663_v34 = vadd.f32 %v3243_v13, %v12383_v52  ;;  %v7268_v61 = vpop.f32.mrb[97].mxu0  ;;  %7426 = vmatmul.mubr.msk.f32.gmra.mrb[202].mxu0 %vm2546_vm2, %v386_v16  ;;  %v7909_v16 = vld [vmem:[%s12305_s2 + $0x10] sm:$0xff]  ;;  %v12389_v13 = vld [vmem:[#allocation9_spill] sm:$0xff] }
 0x39c   :  { %7428 = vmatprep.mubr.msk.f32.mxu0 %vm8036_vm0, %v8037_v6  ;;  %v393_v61 = vld [vmem:[%s12305_s2 + $0x378] sm:$0xff] }
 0x39d   :  { %v3795_v19 = vadd.f32 %v10792_v24, %v3663_v34  ;;  %7655 = vmatmul.mubr.msk.f32.gmra.mrb[94].mxu1 %vm4009_vm3, %v3919_v62 }
 0x39e   :  { %v3248_v20 = vpop.f32.mrb[98].mxu0  ;;  %7657 = vmatprep.mubr.msk.f32.mxu1 %vm8036_vm0, %v8037_v6 }
 0x39f   :  { %v3920_v9 = vmax.f32 %v3795_v19, 0.0  ;;  %v3664_v58 = vadd.f32 %v3248_v20, %v12384_v37  ;;  %v7271_v14 = vpop.f32.mrb[99].mxu0  ;;  %7429 = vmatmul.mubr.msk.f32.gmra.mrb[204].mxu0 %vm2546_vm2, %v387_v33 }
 0x3a0   :  { %7431 = vmatprep.mubr.msk.f32.mxu0 %vm8036_vm0, %v8037_v6 }
 0x3a1   :  { %v3796_v38 = vadd.f32 %v10792_v24, %v3664_v58  ;;  %7658 = vmatmul.mubr.msk.f32.gmra.mrb[96].mxu1 %vm4009_vm3, %v3920_v9  ;;  %v7910_v58 = vld [vmem:[%s12305_s2 + $0x18] sm:$0xff] }
 0x3a2   :  { %v3253_v46 = vpop.f32.mrb[100].mxu0  ;;  %7660 = vmatprep.mubr.msk.f32.mxu1 %vm8036_vm0, %v8037_v6 }
 0x3a3   :  { %v3921_v45 = vmax.f32 %v3796_v38, 0.0  ;;  %v3665_v49 = vadd.f32 %v3253_v46, %v12385_v60  ;;  %v7274_v29 = vpop.f32.mrb[101].mxu0  ;;  %7432 = vmatmul.mubr.msk.f32.gmra.mrb[206].mxu0 %vm2546_vm2, %v388_v8  ;;  %v12390_v8 = vld [vmem:[#allocation10_spill] sm:$0xff] }
 0x3a4   :  { %7434 = vmatprep.mubr.msk.f32.mxu0 %vm8036_vm0, %v8037_v6  ;;  %v394_v60 = vld [vmem:[%s12305_s2 + $0x380] sm:$0xff] }
 0x3a5   :  { %v3797_v27 = vadd.f32 %v10792_v24, %v3665_v49  ;;  %7661 = vmatmul.mubr.msk.f32.gmra.mrb[98].mxu1 %vm4009_vm3, %v3921_v45 }
 0x3a6   :  { %v3258_v23 = vpop.f32.mrb[102].mxu0  ;;  %7663 = vmatprep.mubr.msk.f32.mxu1 %vm8036_vm0, %v8037_v6 }
 0x3a7   :  { %v3922_v0 = vmax.f32 %v3797_v27, 0.0  ;;  %v3666_v17 = vadd.f32 %v3258_v23, %v12386_v54  ;;  %v7277_v41 = vpop.f32.mrb[103].mxu0  ;;  %7435 = vmatmul.mubr.msk.f32.gmra.mrb[208].mxu0 %vm2546_vm2, %v389_v55 }
 0x3a8   :  { %v4451_v36 = vpop.f32.mrb[250].mxu1  ;;  %7437 = vmatprep.mubr.msk.f32.mxu0 %vm8036_vm0, %v8037_v6 }
 0x3a9   :  { %v3798_v2 = vadd.f32 %v10792_v24, %v3666_v17  ;;  %v4452_v4 = vadd.f32 %v10821_v56, %v4451_v36  ;;  %v7506_v39 = vpop.f32.mrb[251].mxu1  ;;  %7664 = vmatmul.mubr.msk.f32.gmra.mrb[100].mxu1 %vm4009_vm3, %v3922_v0  ;;  %v7911_v0 = vld [vmem:[%s12305_s2 + $0x20] sm:$0xff]  ;;  %v12391_v17 = vld [vmem:[#allocation11_spill] sm:$0xff] }
 0x3aa   :  { %v3263_v44 = vpop.f32.mrb[104].mxu0  ;;  %7666 = vmatprep.mubr.msk.f32.mxu1 %vm8036_vm0, %v8037_v6 }
 0x3ab   :  { %v3923_v57 = vmax.f32 %v3798_v2, 0.0  ;;  %v5075_v63 = vadd.f32 %v7907_v35, %v4452_v4  ;;  %v3667_v1 = vadd.f32 %v3263_v44, %v12387_v5  ;;  %v7280_v53 = vpop.f32.mrb[105].mxu0  ;;  %7438 = vmatmul.mubr.msk.f32.gmra.mrb[210].mxu0 %vm2546_vm2, %v390_v7  ;;  %v395_v2 = vld [vmem:[%s12305_s2 + $0x388] sm:$0xff] }
 0x3ac   :  { %v4456_v18 = vpop.f32.mrb[252].mxu1  ;;  %7440 = vmatprep.mubr.msk.f32.mxu0 %vm8036_vm0, %v8037_v6 }
 0x3ad   :  { %5200 = vst.msk [vmem:[%s12308_s9] sm:$0xff] %vm2546_vm2, %v5075_v63  ;;  %v3799_v15 = vadd.f32 %v10792_v24, %v3667_v1  ;;  %v4457_v40 = vadd.f32 %v10821_v56, %v4456_v18  ;;  %v7509_v26 = vpop.f32.mrb[253].mxu1  ;;  %7667 = vmatmul.mubr.msk.f32.gmra.mrb[102].mxu1 %vm4009_vm3, %v3923_v57  ;;  %v7912_v63 = vld [vmem:[%s12305_s2 + $0x28] sm:$0xff]  ;;  %v12392_v1 = vld [vmem:[#allocation12_spill] sm:$0xff] }
 0x3ae   :  { %v3268_v30 = vpop.f32.mrb[106].mxu0  ;;  %7669 = vmatprep.mubr.msk.f32.mxu1 %vm8036_vm0, %v8037_v6 }
 0x3af   :  { %v3924_v12 = vmax.f32 %v3799_v15, 0.0  ;;  %v5076_v28 = vadd.f32 %v7908_v11, %v4457_v40  ;;  %v3668_v50 = vadd.f32 %v3268_v30, %v12388_v31  ;;  %v7283_v43 = vpop.f32.mrb[107].mxu0  ;;  %7441 = vmatmul.mubr.msk.f32.gmra.mrb[212].mxu0 %vm2546_vm2, %v391_v10  ;;  %v396_v15 = vld [vmem:[%s12305_s2 + $0x390] sm:$0xff] }
 0x3b0   :  { %v4461_v32 = vpop.f32.mrb[254].mxu1  ;;  %7443 = vmatprep.mubr.msk.f32.mxu0 %vm8036_vm0, %v8037_v6 }
 0x3b1   :  { %5201 = vst.msk [vmem:[%s12308_s9 + $0x8] sm:$0xff] %vm2546_vm2, %v5076_v28  ;;  %v3800_v51 = vadd.f32 %v10792_v24, %v3668_v50  ;;  %v4462_v47 = vadd.f32 %v10821_v56, %v4461_v32  ;;  %v7512_v21 = vpop.f32.mrb[255].mxu1  ;;  %7670 = vmatmul.mubr.msk.f32.gmra.mrb[104].mxu1 %vm4009_vm3, %v3924_v12  ;;  %v7913_v28 = vld [vmem:[%s12305_s2 + $0x30] sm:$0xff]  ;;  %v12393_v50 = vld [vmem:[#allocation13_spill] sm:$0xff] }
 0x3b2   :  { %v3273_v22 = vpop.f32.mrb[108].mxu0  ;;  %7672 = vmatprep.mubr.msk.f32.mxu1 %vm8036_vm0, %v8037_v6 }
 0x3b3   :  { %v3925_v42 = vmax.f32 %v3800_v51, 0.0  ;;  %v5077_v3 = vadd.f32 %v7909_v16, %v4462_v47  ;;  %v3669_v62 = vadd.f32 %v3273_v22, %v12389_v13  ;;  %v7286_v52 = vpop.f32.mrb[109].mxu0  ;;  %7444 = vmatmul.mubr.msk.f32.gmra.mrb[214].mxu0 %vm2546_vm2, %v392_v25  ;;  %v397_v51 = vld [vmem:[%s12305_s2 + $0x398] sm:$0xff] }
 0x3b4   :  { %v4466_v34 = vpop.f32.mrb[0].mxu1  ;;  %7446 = vmatprep.mubr.msk.f32.mxu0 %vm8036_vm0, %v8037_v6 }
 0x3b5   :  { %5202 = vst.msk [vmem:[%s12308_s9 + $0x10] sm:$0xff] %vm2546_vm2, %v5077_v3  ;;  %v3801_v33 = vadd.f32 %v10792_v24, %v3669_v62  ;;  %v4467_v19 = vadd.f32 %v10821_v56, %v4466_v34  ;;  %v7515_v20 = vpop.f32.mrb[1].mxu1  ;;  %7673 = vmatmul.mubr.msk.f32.gmra.mrb[106].mxu1 %vm4009_vm3, %v3925_v42  ;;  %v7914_v3 = vld [vmem:[%s12305_s2 + $0x38] sm:$0xff]  ;;  %v12394_v62 = vld [vmem:[#allocation14_spill] sm:$0xff] }
 0x3b6   :  { %v3278_v9 = vpop.f32.mrb[110].mxu0  ;;  %7675 = vmatprep.mubr.msk.f32.mxu1 %vm8036_vm0, %v8037_v6 }
 0x3b7   :  { %v3926_v37 = vmax.f32 %v3801_v33, 0.0  ;;  %v5078_v14 = vadd.f32 %v7910_v58, %v4467_v19  ;;  %v3670_v38 = vadd.f32 %v3278_v9, %v12390_v8  ;;  %v7289_v46 = vpop.f32.mrb[111].mxu0  ;;  %7447 = vmatmul.mubr.msk.f32.gmra.mrb[216].mxu0 %vm2546_vm2, %v393_v61  ;;  %v398_v33 = vld [vmem:[%s12305_s2 + $0x3a0] sm:$0xff] }
 0x3b8   :  { %v4471_v45 = vpop.f32.mrb[2].mxu1  ;;  %7449 = vmatprep.mubr.msk.f32.mxu0 %vm8036_vm0, %v8037_v6 }
 0x3b9   :  { %5203 = vst.msk [vmem:[%s12308_s9 + $0x18] sm:$0xff] %vm2546_vm2, %v5078_v14  ;;  %v3802_v49 = vadd.f32 %v10792_v24, %v3670_v38  ;;  %v4472_v29 = vadd.f32 %v10821_v56, %v4471_v45  ;;  %v7518_v55 = vpop.f32.mrb[3].mxu1  ;;  %7676 = vmatmul.mubr.msk.f32.gmra.mrb[108].mxu1 %vm4009_vm3, %v3926_v37  ;;  %v7915_v14 = vld [vmem:[%s12305_s2 + $0x40] sm:$0xff]  ;;  %v12395_v38 = vld [vmem:[#allocation15_spill] sm:$0xff] }
 0x3ba   :  { %v3283_v27 = vpop.f32.mrb[112].mxu0  ;;  %7678 = vmatprep.mubr.msk.f32.mxu1 %vm8036_vm0, %v8037_v6 }
 0x3bb   :  { %v3927_v23 = vmax.f32 %v3802_v49, 0.0  ;;  %v5079_v54 = vadd.f32 %v7911_v0, %v4472_v29  ;;  %v3671_v41 = vadd.f32 %v3283_v27, %v12391_v17  ;;  %v7292_v36 = vpop.f32.mrb[113].mxu0  ;;  %7450 = vmatmul.mubr.msk.f32.gmra.mrb[218].mxu0 %vm2546_vm2, %v394_v60  ;;  %v399_v49 = vld [vmem:[%s12305_s2 + $0x3a8] sm:$0xff] }
 0x3bc   :  { %v4476_v7 = vpop.f32.mrb[4].mxu1  ;;  %7452 = vmatprep.mubr.msk.f32.mxu0 %vm8036_vm0, %v8037_v6 }
 0x3bd   :  { %5204 = vst.msk [vmem:[%s12308_s9 + $0x20] sm:$0xff] %vm2546_vm2, %v5079_v54  ;;  %v3803_v4 = vadd.f32 %v10792_v24, %v3671_v41  ;;  %v4477_v39 = vadd.f32 %v10821_v56, %v4476_v7  ;;  %v7521_v44 = vpop.f32.mrb[5].mxu1  ;;  %7679 = vmatmul.mubr.msk.f32.gmra.mrb[110].mxu1 %vm4009_vm3, %v3927_v23  ;;  %v7916_v54 = vld [vmem:[%s12305_s2 + $0x48] sm:$0xff]  ;;  %v12396_v41 = vld [vmem:[#allocation16_spill] sm:$0xff] }
 0x3be   :  { %v3288_v57 = vpop.f32.mrb[114].mxu0  ;;  %7681 = vmatprep.mubr.msk.f32.mxu1 %vm8036_vm0, %v8037_v6 }
 0x3bf   :  { %v3928_v35 = vmax.f32 %v3803_v4, 0.0  ;;  %v5080_v5 = vadd.f32 %v7912_v63, %v4477_v39  ;;  %v3672_v53 = vadd.f32 %v3288_v57, %v12392_v1  ;;  %v7295_v18 = vpop.f32.mrb[115].mxu0  ;;  %7453 = vmatmul.mubr.msk.f32.gmra.mrb[220].mxu0 %vm2546_vm2, %v395_v2  ;;  %v400_v4 = vld [vmem:[%s12305_s2 + $0x3b0] sm:$0xff] }
 0x3c0   :  { %v4481_v10 = vpop.f32.mrb[6].mxu1  ;;  %7455 = vmatprep.mubr.msk.f32.mxu0 %vm8036_vm0, %v8037_v6 }
 0x3c1   :  { %5205 = vst.msk [vmem:[%s12308_s9 + $0x28] sm:$0xff] %vm2546_vm2, %v5080_v5  ;;  %v3804_v40 = vadd.f32 %v10792_v24, %v3672_v53  ;;  %v4482_v26 = vadd.f32 %v10821_v56, %v4481_v10  ;;  %v7524_v30 = vpop.f32.mrb[7].mxu1  ;;  %7682 = vmatmul.mubr.msk.f32.gmra.mrb[112].mxu1 %vm4009_vm3, %v3928_v35  ;;  %v7917_v5 = vld [vmem:[%s12305_s2 + $0x50] sm:$0xff]  ;;  %v12397_v53 = vld [vmem:[#allocation17_spill] sm:$0xff] }
 0x3c2   :  { %v3293_v12 = vpop.f32.mrb[116].mxu0  ;;  %7684 = vmatprep.mubr.msk.f32.mxu1 %vm8036_vm0, %v8037_v6 }
 0x3c3   :  { %v3929_v11 = vmax.f32 %v3804_v40, 0.0  ;;  %v5081_v31 = vadd.f32 %v7913_v28, %v4482_v26  ;;  %v3673_v43 = vadd.f32 %v3293_v12, %v12393_v50  ;;  %v7298_v32 = vpop.f32.mrb[117].mxu0  ;;  %7456 = vmatmul.mubr.msk.f32.gmra.mrb[222].mxu0 %vm2546_vm2, %v396_v15  ;;  %v401_v40 = vld [vmem:[%s12305_s2 + $0x3b8] sm:$0xff] }
 0x3c4   :  { %v4486_v25 = vpop.f32.mrb[8].mxu1  ;;  %7458 = vmatprep.mubr.msk.f32.mxu0 %vm8036_vm0, %v8037_v6 }
 0x3c5   :  { %5206 = vst.msk [vmem:[%s12308_s9 + $0x30] sm:$0xff] %vm2546_vm2, %v5081_v31  ;;  %v3805_v47 = vadd.f32 %v10792_v24, %v3673_v43  ;;  %v4487_v21 = vadd.f32 %v10821_v56, %v4486_v25  ;;  %v7527_v22 = vpop.f32.mrb[9].mxu1  ;;  %7685 = vmatmul.mubr.msk.f32.gmra.mrb[114].mxu1 %vm4009_vm3, %v3929_v11  ;;  %v7918_v31 = vld [vmem:[%s12305_s2 + $0x58] sm:$0xff]  ;;  %v12398_v43 = vld [vmem:[#allocation18_spill] sm:$0xff] }
 0x3c6   :  { %v3298_v42 = vpop.f32.mrb[118].mxu0  ;;  %7687 = vmatprep.mubr.msk.f32.mxu1 %vm8036_vm0, %v8037_v6 }
 0x3c7   :  { %v3930_v16 = vmax.f32 %v3805_v47, 0.0  ;;  %v5082_v13 = vadd.f32 %v7914_v3, %v4487_v21  ;;  %v3674_v52 = vadd.f32 %v3298_v42, %v12394_v62  ;;  %v7301_v34 = vpop.f32.mrb[119].mxu0  ;;  %7459 = vmatmul.mubr.msk.f32.gmra.mrb[224].mxu0 %vm2546_vm2, %v397_v51  ;;  %v402_v47 = vld [vmem:[%s12305_s2 + $0x3c0] sm:$0xff] }
 0x3c8   :  { %v4491_v61 = vpop.f32.mrb[10].mxu1  ;;  %7461 = vmatprep.mubr.msk.f32.mxu0 %vm8036_vm0, %v8037_v6 }
 0x3c9   :  { %5207 = vst.msk [vmem:[%s12308_s9 + $0x38] sm:$0xff] %vm2546_vm2, %v5082_v13  ;;  %v3806_v19 = vadd.f32 %v10792_v24, %v3674_v52  ;;  %v4492_v20 = vadd.f32 %v10821_v56, %v4491_v61  ;;  %v7530_v9 = vpop.f32.mrb[11].mxu1  ;;  %7688 = vmatmul.mubr.msk.f32.gmra.mrb[116].mxu1 %vm4009_vm3, %v3930_v16  ;;  %v7919_v13 = vld [vmem:[%s12305_s2 + $0x60] sm:$0xff]  ;;  %v12399_v52 = vld [vmem:[#allocation19_spill] sm:$0xff] }
 0x3ca   :  { %v3303_v37 = vpop.f32.mrb[120].mxu0  ;;  %7690 = vmatprep.mubr.msk.f32.mxu1 %vm8036_vm0, %v8037_v6 }
 0x3cb   :  { %v3931_v58 = vmax.f32 %v3806_v19, 0.0  ;;  %v5083_v8 = vadd.f32 %v7915_v14, %v4492_v20  ;;  %v3675_v46 = vadd.f32 %v3303_v37, %v12395_v38  ;;  %v7304_v45 = vpop.f32.mrb[121].mxu0  ;;  %7462 = vmatmul.mubr.msk.f32.gmra.mrb[226].mxu0 %vm2546_vm2, %v398_v33  ;;  %v403_v19 = vld [vmem:[%s12305_s2 + $0x3c8] sm:$0xff] }
 0x3cc   :  { %v4496_v60 = vpop.f32.mrb[12].mxu1  ;;  %7464 = vmatprep.mubr.msk.f32.mxu0 %vm8036_vm0, %v8037_v6 }
 0x3cd   :  { %5208 = vst.msk [vmem:[%s12308_s9 + $0x40] sm:$0xff] %vm2546_vm2, %v5083_v8  ;;  %v3807_v29 = vadd.f32 %v10792_v24, %v3675_v46  ;;  %v4497_v55 = vadd.f32 %v10821_v56, %v4496_v60  ;;  %v7533_v27 = vpop.f32.mrb[13].mxu1  ;;  %7691 = vmatmul.mubr.msk.f32.gmra.mrb[118].mxu1 %vm4009_vm3, %v3931_v58  ;;  %v7920_v8 = vld [vmem:[%s12305_s2 + $0x68] sm:$0xff]  ;;  %v12400_v46 = vld [vmem:[#allocation20_spill] sm:$0xff] }
 0x3ce   :  { %v3308_v23 = vpop.f32.mrb[122].mxu0  ;;  %7693 = vmatprep.mubr.msk.f32.mxu1 %vm8036_vm0, %v8037_v6 }
 0x3cf   :  { %v3932_v0 = vmax.f32 %v3807_v29, 0.0  ;;  %v5084_v17 = vadd.f32 %v7916_v54, %v4497_v55  ;;  %v3676_v36 = vadd.f32 %v3308_v23, %v12396_v41  ;;  %v7307_v7 = vpop.f32.mrb[123].mxu0  ;;  %7465 = vmatmul.mubr.msk.f32.gmra.mrb[228].mxu0 %vm2546_vm2, %v399_v49  ;;  %v404_v29 = vld [vmem:[%s12305_s2 + $0x3d0] sm:$0xff] }
 0x3d0   :  { %v4501_v2 = vpop.f32.mrb[14].mxu1  ;;  %7467 = vmatprep.mubr.msk.f32.mxu0 %vm8036_vm0, %v8037_v6 }
 0x3d1   :  { %5209 = vst.msk [vmem:[%s12308_s9 + $0x48] sm:$0xff] %vm2546_vm2, %v5084_v17  ;;  %v3808_v39 = vadd.f32 %v10792_v24, %v3676_v36  ;;  %v4502_v44 = vadd.f32 %v10821_v56, %v4501_v2  ;;  %v7536_v57 = vpop.f32.mrb[15].mxu1  ;;  %7694 = vmatmul.mubr.msk.f32.gmra.mrb[120].mxu1 %vm4009_vm3, %v3932_v0  ;;  %v7921_v17 = vld [vmem:[%s12305_s2 + $0x70] sm:$0xff]  ;;  %v12401_v36 = vld [vmem:[#allocation21_spill] sm:$0xff] }
 0x3d2   :  { %v3313_v35 = vpop.f32.mrb[124].mxu0  ;;  %7696 = vmatprep.mubr.msk.f32.mxu1 %vm8036_vm0, %v8037_v6 }
 0x3d3   :  { %v3933_v63 = vmax.f32 %v3808_v39, 0.0  ;;  %v5085_v1 = vadd.f32 %v7917_v5, %v4502_v44  ;;  %v3677_v18 = vadd.f32 %v3313_v35, %v12397_v53  ;;  %v7310_v10 = vpop.f32.mrb[125].mxu0  ;;  %7468 = vmatmul.mubr.msk.f32.gmra.mrb[230].mxu0 %vm2546_vm2, %v400_v4  ;;  %v405_v39 = vld [vmem:[%s12305_s2 + $0x3d8] sm:$0xff] }
 0x3d4   :  { %v4506_v15 = vpop.f32.mrb[16].mxu1  ;;  %7470 = vmatprep.mubr.msk.f32.mxu0 %vm8036_vm0, %v8037_v6 }
 0x3d5   :  { %5210 = vst.msk [vmem:[%s12308_s9 + $0x50] sm:$0xff] %vm2546_vm2, %v5085_v1  ;;  %v3809_v26 = vadd.f32 %v10792_v24, %v3677_v18  ;;  %v4507_v30 = vadd.f32 %v10821_v56, %v4506_v15  ;;  %v7539_v12 = vpop.f32.mrb[17].mxu1  ;;  %7697 = vmatmul.mubr.msk.f32.gmra.mrb[122].mxu1 %vm4009_vm3, %v3933_v63  ;;  %v7922_v1 = vld [vmem:[%s12305_s2 + $0x78] sm:$0xff]  ;;  %v12402_v18 = vld [vmem:[#allocation22_spill] sm:$0xff] }
 0x3d6   :  { %v3318_v11 = vpop.f32.mrb[126].mxu0  ;;  %7699 = vmatprep.mubr.msk.f32.mxu1 %vm8036_vm0, %v8037_v6 }
 0x3d7   :  { %v3934_v28 = vmax.f32 %v3809_v26, 0.0  ;;  %v5086_v50 = vadd.f32 %v7918_v31, %v4507_v30  ;;  %v3678_v32 = vadd.f32 %v3318_v11, %v12398_v43  ;;  %v7313_v25 = vpop.f32.mrb[127].mxu0  ;;  %7471 = vmatmul.mubr.msk.f32.gmra.mrb[232].mxu0 %vm2546_vm2, %v401_v40  ;;  %v406_v26 = vld [vmem:[%s12305_s2 + $0x3e0] sm:$0xff] }
 0x3d8   :  { %v4511_v51 = vpop.f32.mrb[18].mxu1  ;;  %7473 = vmatprep.mubr.msk.f32.mxu0 %vm8036_vm0, %v8037_v6 }
 0x3d9   :  { %5211 = vst.msk [vmem:[%s12308_s9 + $0x58] sm:$0xff] %vm2546_vm2, %v5086_v50  ;;  %v3810_v21 = vadd.f32 %v10792_v24, %v3678_v32  ;;  %v4512_v22 = vadd.f32 %v10821_v56, %v4511_v51  ;;  %v7542_v42 = vpop.f32.mrb[19].mxu1  ;;  %7700 = vmatmul.mubr.msk.f32.gmra.mrb[124].mxu1 %vm4009_vm3, %v3934_v28  ;;  %v7923_v50 = vld [vmem:[%s12305_s2 + $0x80] sm:$0xff]  ;;  %v12403_v32 = vld [vmem:[#allocation23_spill] sm:$0xff] }
 0x3da   :  { %v3323_v16 = vpop.f32.mrb[128].mxu0  ;;  %7702 = vmatprep.mubr.msk.f32.mxu1 %vm8036_vm0, %v8037_v6 }
 0x3db   :  { %v3935_v3 = vmax.f32 %v3810_v21, 0.0  ;;  %v5087_v62 = vadd.f32 %v7919_v13, %v4512_v22  ;;  %v3679_v34 = vadd.f32 %v3323_v16, %v12399_v52  ;;  %v7316_v61 = vpop.f32.mrb[129].mxu0  ;;  %7474 = vmatmul.mubr.msk.f32.gmra.mrb[234].mxu0 %vm2546_vm2, %v402_v47  ;;  %v7924_v13 = vld [vmem:[%s12305_s2 + $0x88] sm:$0xff]  ;;  %v12404_v52 = vld [vmem:[#allocation24_spill] sm:$0xff] }
 0x3dc   :  { %v4516_v33 = vpop.f32.mrb[20].mxu1  ;;  %7476 = vmatprep.mubr.msk.f32.mxu0 %vm8036_vm0, %v8037_v6 }
 0x3dd   :  { %5212 = vst.msk [vmem:[%s12308_s9 + $0x60] sm:$0xff] %vm2546_vm2, %v5087_v62  ;;  %v3811_v20 = vadd.f32 %v10792_v24, %v3679_v34  ;;  %v4517_v9 = vadd.f32 %v10821_v56, %v4516_v33  ;;  %v7545_v37 = vpop.f32.mrb[21].mxu1  ;;  %7703 = vmatmul.mubr.msk.f32.gmra.mrb[126].mxu1 %vm4009_vm3, %v3935_v3 }
 0x3de   :  { %v3328_v58 = vpop.f32.mrb[130].mxu0  ;;  %7705 = vmatprep.mubr.msk.f32.mxu1 %vm8036_vm0, %v8037_v6 }
 0x3df   :  { %v3936_v14 = vmax.f32 %v3811_v20, 0.0  ;;  %v5088_v38 = vadd.f32 %v7920_v8, %v4517_v9  ;;  %v3680_v45 = vadd.f32 %v3328_v58, %v12400_v46  ;;  %v7319_v60 = vpop.f32.mrb[131].mxu0  ;;  %7477 = vmatmul.mubr.msk.f32.gmra.mrb[236].mxu0 %vm2546_vm2, %v403_v19 }
 0x3e0   :  { %v4521_v49 = vpop.f32.mrb[22].mxu1  ;;  %7479 = vmatprep.mubr.msk.f32.mxu0 %vm8036_vm0, %v8037_v6 }
 0x3e1   :  { %5213 = vst.msk [vmem:[%s12308_s9 + $0x68] sm:$0xff] %vm2546_vm2, %v5088_v38  ;;  %v3812_v55 = vadd.f32 %v10792_v24, %v3680_v45  ;;  %v4522_v27 = vadd.f32 %v10821_v56, %v4521_v49  ;;  %v7548_v23 = vpop.f32.mrb[23].mxu1  ;;  %7706 = vmatmul.mubr.msk.f32.gmra.mrb[128].mxu1 %vm4009_vm3, %v3936_v14  ;;  %v7925_v14 = vld [vmem:[%s12305_s2 + $0x90] sm:$0xff]  ;;  %v12405_v38 = vld [vmem:[#allocation25_spill] sm:$0xff] }
 0x3e2   :  { %v3333_v0 = vpop.f32.mrb[132].mxu0  ;;  %7708 = vmatprep.mubr.msk.f32.mxu1 %vm8036_vm0, %v8037_v6 }
 0x3e3   :  { %v3937_v54 = vmax.f32 %v3812_v55, 0.0  ;;  %v5089_v41 = vadd.f32 %v7921_v17, %v4522_v27  ;;  %v3681_v7 = vadd.f32 %v3333_v0, %v12401_v36  ;;  %v7322_v2 = vpop.f32.mrb[133].mxu0  ;;  %7480 = vmatmul.mubr.msk.f32.gmra.mrb[238].mxu0 %vm2546_vm2, %v404_v29  ;;  %v7926_v0 = vld [vmem:[%s12305_s2 + $0x98] sm:$0xff]  ;;  %v12406_v17 = vld [vmem:[#allocation26_spill] sm:$0xff] }
 0x3e4   :  { %v4526_v4 = vpop.f32.mrb[24].mxu1  ;;  %7482 = vmatprep.mubr.msk.f32.mxu0 %vm8036_vm0, %v8037_v6 }
 0x3e5   :  { %5214 = vst.msk [vmem:[%s12308_s9 + $0x70] sm:$0xff] %vm2546_vm2, %v5089_v41  ;;  %v3813_v44 = vadd.f32 %v10792_v24, %v3681_v7  ;;  %v4527_v57 = vadd.f32 %v10821_v56, %v4526_v4  ;;  %v7551_v35 = vpop.f32.mrb[25].mxu1  ;;  %7709 = vmatmul.mubr.msk.f32.gmra.mrb[130].mxu1 %vm4009_vm3, %v3937_v54 }
 0x3e6   :  { %v3338_v63 = vpop.f32.mrb[134].mxu0  ;;  %7711 = vmatprep.mubr.msk.f32.mxu1 %vm8036_vm0, %v8037_v6  ;;  %v7927_v35 = vld [vmem:[%s12305_s2 + $0xa0] sm:$0xff] }
 0x3e7   :  { %v3938_v5 = vmax.f32 %v3813_v44, 0.0  ;;  %v5090_v53 = vadd.f32 %v7922_v1, %v4527_v57  ;;  %v3682_v10 = vadd.f32 %v3338_v63, %v12402_v18  ;;  %v7325_v15 = vpop.f32.mrb[135].mxu0  ;;  %7483 = vmatmul.mubr.msk.f32.gmra.mrb[240].mxu0 %vm2546_vm2, %v405_v39 }
 0x3e8   :  { %v4531_v40 = vpop.f32.mrb[26].mxu1  ;;  %7485 = vmatprep.mubr.msk.f32.mxu0 %vm8036_vm0, %v8037_v6 }
 0x3e9   :  { %5215 = vst.msk [vmem:[%s12308_s9 + $0x78] sm:$0xff] %vm2546_vm2, %v5090_v53  ;;  %v3814_v30 = vadd.f32 %v10792_v24, %v3682_v10  ;;  %v4532_v12 = vadd.f32 %v10821_v56, %v4531_v40  ;;  %v7554_v11 = vpop.f32.mrb[27].mxu1  ;;  %7712 = vmatmul.mubr.msk.f32.gmra.mrb[132].mxu1 %vm4009_vm3, %v3938_v5  ;;  %v12407_v5 = vld [vmem:[#allocation27_spill] sm:$0xff] }
 0x3ea   :  { %v3343_v28 = vpop.f32.mrb[136].mxu0  ;;  %7714 = vmatprep.mubr.msk.f32.mxu1 %vm8036_vm0, %v8037_v6 }
 0x3eb   :  { %v3939_v31 = vmax.f32 %v3814_v30, 0.0  ;;  %v5091_v43 = vadd.f32 %v7923_v50, %v4532_v12  ;;  %v3683_v25 = vadd.f32 %v3343_v28, %v12403_v32  ;;  %v7328_v51 = vpop.f32.mrb[137].mxu0  ;;  %7486 = vmatmul.mubr.msk.f32.gmra.mrb[242].mxu0 %vm2546_vm2, %v406_v26  ;;  %v7928_v12 = vld [vmem:[%s12305_s2 + $0xa8] sm:$0xff]  ;;  %v12408_v28 = vld [vmem:[#allocation28_spill] sm:$0xff] }
 0x3ec   :  { %v4536_v47 = vpop.f32.mrb[28].mxu1 }
 0x3ed   :  { %5216 = vst.msk [vmem:[%s12308_s9 + $0x80] sm:$0xff] %vm2546_vm2, %v5091_v43  ;;  %v3815_v21 = vadd.f32 %v10792_v24, %v3683_v25  ;;  %v4537_v22 = vadd.f32 %v10821_v56, %v4536_v47  ;;  %v7557_v42 = vpop.f32.mrb[29].mxu1  ;;  %7715 = vmatmul.mubr.msk.f32.gmra.mrb[134].mxu1 %vm4009_vm3, %v3939_v31 }
 0x3ee   :  { %v3348_v16 = vpop.f32.mrb[138].mxu0  ;;  %7717 = vmatprep.mubr.msk.f32.mxu1 %vm8036_vm0, %v8037_v6 }
 0x3ef   :  { %v3940_v3 = vmax.f32 %v3815_v21, 0.0  ;;  %v5092_v62 = vadd.f32 %v7924_v13, %v4537_v22  ;;  %v3684_v34 = vadd.f32 %v3348_v16, %v12404_v52  ;;  %v7331_v61 = vpop.f32.mrb[139].mxu0  ;;  %v7929_v22 = vld [vmem:[%s12305_s2 + $0xb0] sm:$0xff]  ;;  %v12409_v16 = vld [vmem:[#allocation29_spill] sm:$0xff] }
 0x3f0   :  { %v4541_v33 = vpop.f32.mrb[30].mxu1 }
 0x3f1   :  { %5217 = vst.msk [vmem:[%s12308_s9 + $0x88] sm:$0xff] %vm2546_vm2, %v5092_v62  ;;  %v3816_v19 = vadd.f32 %v10792_v24, %v3684_v34  ;;  %v4542_v20 = vadd.f32 %v10821_v56, %v4541_v33  ;;  %v7560_v9 = vpop.f32.mrb[31].mxu1  ;;  %7718 = vmatmul.mubr.msk.f32.gmra.mrb[136].mxu1 %vm4009_vm3, %v3940_v3 }
 0x3f2   :  { %v3353_v37 = vpop.f32.mrb[140].mxu0  ;;  %7720 = vmatprep.mubr.msk.f32.mxu1 %vm8036_vm0, %v8037_v6 }
 0x3f3   :  { %v3941_v58 = vmax.f32 %v3816_v19, 0.0  ;;  %v5093_v8 = vadd.f32 %v7925_v14, %v4542_v20  ;;  %v3685_v46 = vadd.f32 %v3353_v37, %v12405_v38  ;;  %v7334_v45 = vpop.f32.mrb[141].mxu0  ;;  %v7930_v20 = vld [vmem:[%s12305_s2 + $0xb8] sm:$0xff]  ;;  %v12410_v37 = vld [vmem:[#allocation30_spill] sm:$0xff] }
 0x3f4   :  { %v4546_v60 = vpop.f32.mrb[32].mxu1 }
 0x3f5   :  { %5218 = vst.msk [vmem:[%s12308_s9 + $0x90] sm:$0xff] %vm2546_vm2, %v5093_v8  ;;  %v3817_v49 = vadd.f32 %v10792_v24, %v3685_v46  ;;  %v4547_v29 = vadd.f32 %v10821_v56, %v4546_v60  ;;  %v7563_v55 = vpop.f32.mrb[33].mxu1  ;;  %7721 = vmatmul.mubr.msk.f32.gmra.mrb[138].mxu1 %vm4009_vm3, %v3941_v58 }
 0x3f6   :  { %v3358_v27 = vpop.f32.mrb[142].mxu0  ;;  %7723 = vmatprep.mubr.msk.f32.mxu1 %vm8036_vm0, %v8037_v6 }
 0x3f7   :  { %v3942_v23 = vmax.f32 %v3817_v49, 0.0  ;;  %v5094_v54 = vadd.f32 %v7926_v0, %v4547_v29  ;;  %v3686_v41 = vadd.f32 %v3358_v27, %v12406_v17  ;;  %v7337_v36 = vpop.f32.mrb[143].mxu0  ;;  %v7931_v29 = vld [vmem:[%s12305_s2 + $0xc0] sm:$0xff]  ;;  %v12411_v27 = vld [vmem:[#allocation31_spill] sm:$0xff] }
 0x3f8   :  { %v4551_v7 = vpop.f32.mrb[34].mxu1 }
 0x3f9   :  { %5219 = vst.msk [vmem:[%s12308_s9 + $0x98] sm:$0xff] %vm2546_vm2, %v5094_v54  ;;  %v3818_v2 = vadd.f32 %v10792_v24, %v3686_v41  ;;  %v4552_v4 = vadd.f32 %v10821_v56, %v4551_v7  ;;  %v7566_v39 = vpop.f32.mrb[35].mxu1  ;;  %7724 = vmatmul.mubr.msk.f32.gmra.mrb[140].mxu1 %vm4009_vm3, %v3942_v23 }
 0x3fa   :  { %v3363_v44 = vpop.f32.mrb[144].mxu0  ;;  %7726 = vmatprep.mubr.msk.f32.mxu1 %vm8036_vm0, %v8037_v6 }
 0x3fb   :  { %v3943_v57 = vmax.f32 %v3818_v2, 0.0  ;;  %v5095_v63 = vadd.f32 %v7927_v35, %v4552_v4  ;;  %v3687_v1 = vadd.f32 %v3363_v44, %v12407_v5  ;;  %v7340_v53 = vpop.f32.mrb[145].mxu0  ;;  %v7932_v4 = vld [vmem:[%s12305_s2 + $0xc8] sm:$0xff]  ;;  %v12412_v44 = vld [vmem:[#allocation32_spill] sm:$0xff] }
 0x3fc   :  { %v4556_v18 = vpop.f32.mrb[36].mxu1 }
 0x3fd   :  { %5220 = vst.msk [vmem:[%s12308_s9 + $0xa0] sm:$0xff] %vm2546_vm2, %v5095_v63  ;;  %v3819_v10 = vadd.f32 %v10792_v24, %v3687_v1  ;;  %v4557_v15 = vadd.f32 %v10821_v56, %v4556_v18  ;;  %v7569_v40 = vpop.f32.mrb[37].mxu1  ;;  %7727 = vmatmul.mubr.msk.f32.gmra.mrb[142].mxu1 %vm4009_vm3, %v3943_v57 }
 0x3fe   :  { %v3368_v26 = vpop.f32.mrb[146].mxu0  ;;  %7729 = vmatprep.mubr.msk.f32.mxu1 %vm8036_vm0, %v8037_v6 }
 0x3ff   :  { %v3944_v30 = vmax.f32 %v3819_v10, 0.0  ;;  %v5096_v11 = vadd.f32 %v7928_v12, %v4557_v15  ;;  %v3688_v31 = vadd.f32 %v3368_v26, %v12408_v28  ;;  %v7343_v50 = vpop.f32.mrb[147].mxu0  ;;  %v7933_v15 = vld [vmem:[%s12305_s2 + $0xd0] sm:$0xff]  ;;  %v12413_v26 = vld [vmem:[#allocation33_spill] sm:$0xff] }
 0x400   :  { %v4561_v43 = vpop.f32.mrb[38].mxu1 }
 0x401   :  { %5221 = vst.msk [vmem:[%s12308_s9 + $0xa8] sm:$0xff] %vm2546_vm2, %v5096_v11  ;;  %v3820_v32 = vadd.f32 %v10792_v24, %v3688_v31  ;;  %v4562_v25 = vadd.f32 %v10821_v56, %v4561_v43  ;;  %v7572_v51 = vpop.f32.mrb[39].mxu1  ;;  %7730 = vmatmul.mubr.msk.f32.gmra.mrb[144].mxu1 %vm4009_vm3, %v3944_v30 }
 0x402   :  { %v3373_v47 = vpop.f32.mrb[148].mxu0  ;;  %7732 = vmatprep.mubr.msk.f32.mxu1 %vm8036_vm0, %v8037_v6 }
 0x403   :  { %v3945_v21 = vmax.f32 %v3820_v32, 0.0  ;;  %v5097_v42 = vadd.f32 %v7929_v22, %v4562_v25  ;;  %v3689_v3 = vadd.f32 %v3373_v47, %v12409_v16  ;;  %v7346_v13 = vpop.f32.mrb[149].mxu0  ;;  %v7934_v25 = vld [vmem:[%s12305_s2 + $0xd8] sm:$0xff]  ;;  %v12414_v47 = vld [vmem:[#allocation34_spill] sm:$0xff] }
 0x404   :  { %v4566_v62 = vpop.f32.mrb[40].mxu1 }
 0x405   :  { %5222 = vst.msk [vmem:[%s12308_s9 + $0xb0] sm:$0xff] %vm2546_vm2, %v5097_v42  ;;  %v3821_v52 = vadd.f32 %v10792_v24, %v3689_v3  ;;  %v4567_v34 = vadd.f32 %v10821_v56, %v4566_v62  ;;  %v7575_v61 = vpop.f32.mrb[41].mxu1  ;;  %7733 = vmatmul.mubr.msk.f32.gmra.mrb[146].mxu1 %vm4009_vm3, %v3945_v21 }
 0x406   :  { %v3378_v33 = vpop.f32.mrb[150].mxu0  ;;  %7735 = vmatprep.mubr.msk.f32.mxu1 %vm8036_vm0, %v8037_v6 }
 0x407   :  { %v3946_v19 = vmax.f32 %v3821_v52, 0.0  ;;  %v5098_v9 = vadd.f32 %v7930_v20, %v4567_v34  ;;  %v3690_v58 = vadd.f32 %v3378_v33, %v12410_v37  ;;  %v7349_v14 = vpop.f32.mrb[151].mxu0  ;;  %v7935_v34 = vld [vmem:[%s12305_s2 + $0xe0] sm:$0xff]  ;;  %v12415_v33 = vld [vmem:[#allocation35_spill] sm:$0xff] }
 0x408   :  { %v4571_v8 = vpop.f32.mrb[42].mxu1 }
 0x409   :  { %5223 = vst.msk [vmem:[%s12308_s9 + $0xb8] sm:$0xff] %vm2546_vm2, %v5098_v9  ;;  %v3822_v38 = vadd.f32 %v10792_v24, %v3690_v58  ;;  %v4572_v46 = vadd.f32 %v10821_v56, %v4571_v8  ;;  %v7578_v45 = vpop.f32.mrb[43].mxu1  ;;  %7736 = vmatmul.mubr.msk.f32.gmra.mrb[148].mxu1 %vm4009_vm3, %v3946_v19 }
 0x40a   :  { %v3383_v60 = vpop.f32.mrb[152].mxu0  ;;  %7738 = vmatprep.mubr.msk.f32.mxu1 %vm8036_vm0, %v8037_v6 }
 0x40b   :  { %v3947_v49 = vmax.f32 %v3822_v38, 0.0  ;;  %v5099_v55 = vadd.f32 %v7931_v29, %v4572_v46  ;;  %v3691_v23 = vadd.f32 %v3383_v60, %v12411_v27  ;;  %v7352_v0 = vpop.f32.mrb[153].mxu0  ;;  %v7936_v46 = vld [vmem:[%s12305_s2 + $0xe8] sm:$0xff]  ;;  %v12416_v60 = vld [vmem:[#allocation36_spill] sm:$0xff] }
 0x40c   :  { %v4576_v54 = vpop.f32.mrb[44].mxu1 }
 0x40d   :  { %5224 = vst.msk [vmem:[%s12308_s9 + $0xc0] sm:$0xff] %vm2546_vm2, %v5099_v55  ;;  %v3823_v17 = vadd.f32 %v10792_v24, %v3691_v23  ;;  %v4577_v41 = vadd.f32 %v10821_v56, %v4576_v54  ;;  %v7581_v36 = vpop.f32.mrb[45].mxu1  ;;  %7739 = vmatmul.mubr.msk.f32.gmra.mrb[150].mxu1 %vm4009_vm3, %v3947_v49 }
 0x40e   :  { %v3388_v7 = vpop.f32.mrb[154].mxu0  ;;  %7741 = vmatprep.mubr.msk.f32.mxu1 %vm8036_vm0, %v8037_v6 }
 0x40f   :  { %v3948_v2 = vmax.f32 %v3823_v17, 0.0  ;;  %v5100_v39 = vadd.f32 %v7932_v4, %v4577_v41  ;;  %v3692_v57 = vadd.f32 %v3388_v7, %v12412_v44  ;;  %v7355_v35 = vpop.f32.mrb[155].mxu0  ;;  %v7937_v41 = vld [vmem:[%s12305_s2 + $0xf0] sm:$0xff]  ;;  %v12417_v7 = vld [vmem:[#allocation37_spill] sm:$0xff] }
 0x410   :  { %v4581_v63 = vpop.f32.mrb[46].mxu1 }
 0x411   :  { %5225 = vst.msk [vmem:[%s12308_s9 + $0xc8] sm:$0xff] %vm2546_vm2, %v5100_v39  ;;  %v3824_v5 = vadd.f32 %v10792_v24, %v3692_v57  ;;  %v4582_v1 = vadd.f32 %v10821_v56, %v4581_v63  ;;  %v7584_v53 = vpop.f32.mrb[47].mxu1  ;;  %7742 = vmatmul.mubr.msk.f32.gmra.mrb[152].mxu1 %vm4009_vm3, %v3948_v2 }
 0x412   :  { %v3393_v18 = vpop.f32.mrb[156].mxu0  ;;  %7744 = vmatprep.mubr.msk.f32.mxu1 %vm8036_vm0, %v8037_v6 }
 0x413   :  { %v3949_v10 = vmax.f32 %v3824_v5, 0.0  ;;  %v5101_v40 = vadd.f32 %v7933_v15, %v4582_v1  ;;  %v3693_v30 = vadd.f32 %v3393_v18, %v12413_v26  ;;  %v7358_v12 = vpop.f32.mrb[157].mxu0  ;;  %v7938_v1 = vld [vmem:[%s12305_s2 + $0xf8] sm:$0xff]  ;;  %v12418_v18 = vld [vmem:[#allocation38_spill] sm:$0xff] }
 0x414   :  { %v4586_v11 = vpop.f32.mrb[48].mxu1 }
 0x415   :  { %5226 = vst.msk [vmem:[%s12308_s9 + $0xd0] sm:$0xff] %vm2546_vm2, %v5101_v40  ;;  %v3825_v28 = vadd.f32 %v10792_v24, %v3693_v30  ;;  %v4587_v31 = vadd.f32 %v10821_v56, %v4586_v11  ;;  %v7587_v50 = vpop.f32.mrb[49].mxu1  ;;  %7745 = vmatmul.mubr.msk.f32.gmra.mrb[154].mxu1 %vm4009_vm3, %v3949_v10 }
 0x416   :  { %v3398_v43 = vpop.f32.mrb[158].mxu0  ;;  %7747 = vmatprep.mubr.msk.f32.mxu1 %vm8036_vm0, %v8037_v6 }
 0x417   :  { %v3950_v32 = vmax.f32 %v3825_v28, 0.0  ;;  %v5102_v51 = vadd.f32 %v7934_v25, %v4587_v31  ;;  %v3694_v21 = vadd.f32 %v3398_v43, %v12414_v47  ;;  %v7361_v22 = vpop.f32.mrb[159].mxu0  ;;  %v7939_v31 = vld [vmem:[%s12305_s2 + $0x100] sm:$0xff]  ;;  %v12419_v43 = vld [vmem:[#allocation39_spill] sm:$0xff] }
 0x418   :  { %v4591_v42 = vpop.f32.mrb[50].mxu1 }
 0x419   :  { %5227 = vst.msk [vmem:[%s12308_s9 + $0xd8] sm:$0xff] %vm2546_vm2, %v5102_v51  ;;  %v3826_v16 = vadd.f32 %v10792_v24, %v3694_v21  ;;  %v4592_v3 = vadd.f32 %v10821_v56, %v4591_v42  ;;  %v7590_v13 = vpop.f32.mrb[51].mxu1  ;;  %7748 = vmatmul.mubr.msk.f32.gmra.mrb[156].mxu1 %vm4009_vm3, %v3950_v32 }
 0x41a   :  { %v3403_v62 = vpop.f32.mrb[160].mxu0  ;;  %7750 = vmatprep.mubr.msk.f32.mxu1 %vm8036_vm0, %v8037_v6 }
 0x41b   :  { %v3951_v52 = vmax.f32 %v3826_v16, 0.0  ;;  %v5103_v61 = vadd.f32 %v7935_v34, %v4592_v3  ;;  %v3695_v19 = vadd.f32 %v3403_v62, %v12415_v33  ;;  %v7364_v20 = vpop.f32.mrb[161].mxu0  ;;  %v7940_v3 = vld [vmem:[%s12305_s2 + $0x108] sm:$0xff]  ;;  %v12420_v62 = vld [vmem:[#allocation40_spill] sm:$0xff] }
 0x41c   :  { %v4596_v9 = vpop.f32.mrb[52].mxu1 }
 0x41d   :  { %5228 = vst.msk [vmem:[%s12308_s9 + $0xe0] sm:$0xff] %vm2546_vm2, %v5103_v61  ;;  %v3827_v37 = vadd.f32 %v10792_v24, %v3695_v19  ;;  %v4597_v58 = vadd.f32 %v10821_v56, %v4596_v9  ;;  %v7593_v14 = vpop.f32.mrb[53].mxu1  ;;  %7751 = vmatmul.mubr.msk.f32.gmra.mrb[158].mxu1 %vm4009_vm3, %v3951_v52 }
 0x41e   :  { %v3408_v8 = vpop.f32.mrb[162].mxu0  ;;  %7753 = vmatprep.mubr.msk.f32.mxu1 %vm8036_vm0, %v8037_v6 }
 0x41f   :  { %v3952_v38 = vmax.f32 %v3827_v37, 0.0  ;;  %v5104_v45 = vadd.f32 %v7936_v46, %v4597_v58  ;;  %v3696_v49 = vadd.f32 %v3408_v8, %v12416_v60  ;;  %v7367_v29 = vpop.f32.mrb[163].mxu0  ;;  %v7941_v58 = vld [vmem:[%s12305_s2 + $0x110] sm:$0xff]  ;;  %v12421_v8 = vld [vmem:[#allocation41_spill] sm:$0xff] }
 0x420   :  { %v4601_v55 = vpop.f32.mrb[54].mxu1 }
 0x421   :  { %5229 = vst.msk [vmem:[%s12308_s9 + $0xe8] sm:$0xff] %vm2546_vm2, %v5104_v45  ;;  %v3828_v27 = vadd.f32 %v10792_v24, %v3696_v49  ;;  %v4602_v23 = vadd.f32 %v10821_v56, %v4601_v55  ;;  %v7596_v0 = vpop.f32.mrb[55].mxu1  ;;  %7754 = vmatmul.mubr.msk.f32.gmra.mrb[160].mxu1 %vm4009_vm3, %v3952_v38 }
 0x422   :  { %v3413_v54 = vpop.f32.mrb[164].mxu0  ;;  %7756 = vmatprep.mubr.msk.f32.mxu1 %vm8036_vm0, %v8037_v6 }
 0x423   :  { %v3953_v17 = vmax.f32 %v3828_v27, 0.0  ;;  %v5105_v36 = vadd.f32 %v7937_v41, %v4602_v23  ;;  %v3697_v2 = vadd.f32 %v3413_v54, %v12417_v7  ;;  %v7370_v4 = vpop.f32.mrb[165].mxu0  ;;  %v7942_v23 = vld [vmem:[%s12305_s2 + $0x118] sm:$0xff]  ;;  %v12422_v54 = vld [vmem:[#allocation42_spill] sm:$0xff] }
 0x424   :  { %v4606_v39 = vpop.f32.mrb[56].mxu1 }
 0x425   :  { %5230 = vst.msk [vmem:[%s12308_s9 + $0xf0] sm:$0xff] %vm2546_vm2, %v5105_v36  ;;  %v3829_v44 = vadd.f32 %v10792_v24, %v3697_v2  ;;  %v4607_v57 = vadd.f32 %v10821_v56, %v4606_v39  ;;  %v7599_v35 = vpop.f32.mrb[57].mxu1  ;;  %7757 = vmatmul.mubr.msk.f32.gmra.mrb[162].mxu1 %vm4009_vm3, %v3953_v17 }
 0x426   :  { %v3418_v63 = vpop.f32.mrb[166].mxu0  ;;  %7759 = vmatprep.mubr.msk.f32.mxu1 %vm8036_vm0, %v8037_v6 }
 0x427   :  { %v3954_v5 = vmax.f32 %v3829_v44, 0.0  ;;  %v5106_v53 = vadd.f32 %v7938_v1, %v4607_v57  ;;  %v3698_v10 = vadd.f32 %v3418_v63, %v12418_v18  ;;  %v7373_v15 = vpop.f32.mrb[167].mxu0  ;;  %v7944_v57 = vld [vmem:[%s12305_s2 + $0x120] sm:$0xff]  ;;  %v12423_v63 = vld [vmem:[#allocation43_spill] sm:$0xff] }
 0x428   :  { %v4611_v40 = vpop.f32.mrb[58].mxu1 }
 0x429   :  { %5231 = vst.msk [vmem:[%s12308_s9 + $0xf8] sm:$0xff] %vm2546_vm2, %v5106_v53  ;;  %v3830_v26 = vadd.f32 %v10792_v24, %v3698_v10  ;;  %v4612_v30 = vadd.f32 %v10821_v56, %v4611_v40  ;;  %v7602_v12 = vpop.f32.mrb[59].mxu1  ;;  %7760 = vmatmul.mubr.msk.f32.gmra.mrb[164].mxu1 %vm4009_vm3, %v3954_v5 }
 0x42a   :  { %v3423_v11 = vpop.f32.mrb[168].mxu0  ;;  %7762 = vmatprep.mubr.msk.f32.mxu1 %vm8036_vm0, %v8037_v6 }
 0x42b   :  { %v3955_v28 = vmax.f32 %v3830_v26, 0.0  ;;  %v5107_v50 = vadd.f32 %v7939_v31, %v4612_v30  ;;  %v3699_v32 = vadd.f32 %v3423_v11, %v12419_v43  ;;  %v7376_v25 = vpop.f32.mrb[169].mxu0  ;;  %v7945_v30 = vld [vmem:[%s12305_s2 + $0x128] sm:$0xff]  ;;  %v12424_v11 = vld [vmem:[#allocation44_spill] sm:$0xff]  ;;  %v11432_v43 = vld [vmem:[%s12307_s8] ss:$0 sm:$0xff] }
 0x42c   :  { %v4616_v51 = vpop.f32.mrb[60].mxu1 }
 0x42d   :  { %5232 = vst.msk [vmem:[%s12308_s9 + $0x100] sm:$0xff] %vm2546_vm2, %v5107_v50  ;;  %v3831_v47 = vadd.f32 %v10792_v24, %v3699_v32  ;;  %v4617_v21 = vadd.f32 %v10821_v56, %v4616_v51  ;;  %v7605_v22 = vpop.f32.mrb[61].mxu1  ;;  %7763 = vmatmul.mubr.msk.f32.gmra.mrb[166].mxu1 %vm4009_vm3, %v3955_v28 }
 0x42e   :  { %v3428_v42 = vpop.f32.mrb[170].mxu0  ;;  %7765 = vmatprep.mubr.msk.f32.mxu1 %vm8036_vm0, %v8037_v6 }
 0x42f   :  { %v3956_v16 = vmax.f32 %v3831_v47, 0.0  ;;  %v5108_v13 = vadd.f32 %v7940_v3, %v4617_v21  ;;  %v3700_v52 = vadd.f32 %v3428_v42, %v12420_v62  ;;  %v7379_v34 = vpop.f32.mrb[171].mxu0  ;;  %v7947_v21 = vld [vmem:[%s12305_s2 + $0x130] sm:$0xff]  ;;  %v12425_v42 = vld [vmem:[#allocation45_spill] sm:$0xff] }
 0x430   :  { %v4621_v61 = vpop.f32.mrb[62].mxu1 }
 0x431   :  { %5233 = vst.msk [vmem:[%s12308_s9 + $0x108] sm:$0xff] %vm2546_vm2, %v5108_v13  ;;  %v3832_v33 = vadd.f32 %v10792_v24, %v3700_v52  ;;  %v4622_v19 = vadd.f32 %v10821_v56, %v4621_v61  ;;  %v7608_v20 = vpop.f32.mrb[63].mxu1  ;;  %7766 = vmatmul.mubr.msk.f32.gmra.mrb[168].mxu1 %vm4009_vm3, %v3956_v16 }
 0x432   :  { %v3433_v9 = vpop.f32.mrb[172].mxu0  ;;  %7768 = vmatprep.mubr.msk.f32.mxu1 %vm8036_vm0, %v8037_v6 }
 0x433   :  { %v3957_v37 = vmax.f32 %v3832_v33, 0.0  ;;  %v5109_v14 = vadd.f32 %v7941_v58, %v4622_v19  ;;  %v3701_v38 = vadd.f32 %v3433_v9, %v12421_v8  ;;  %v7382_v46 = vpop.f32.mrb[173].mxu0  ;;  %v7948_v19 = vld [vmem:[%s12305_s2 + $0x138] sm:$0xff]  ;;  %v12426_v9 = vld [vmem:[#allocation46_spill] sm:$0xff] }
 0x434   :  { %v4626_v45 = vpop.f32.mrb[64].mxu1 }
 0x435   :  { %5234 = vst.msk [vmem:[%s12308_s9 + $0x110] sm:$0xff] %vm2546_vm2, %v5109_v14  ;;  %v3833_v60 = vadd.f32 %v10792_v24, %v3701_v38  ;;  %v4627_v49 = vadd.f32 %v10821_v56, %v4626_v45  ;;  %v7611_v29 = vpop.f32.mrb[65].mxu1  ;;  %7769 = vmatmul.mubr.msk.f32.gmra.mrb[170].mxu1 %vm4009_vm3, %v3957_v37  ;;  %v11400_v24 = vld [vmem:[%s12306_s6] ss:$0 sm:$0xff] }
 0x436   :  { %v3438_v55 = vpop.f32.mrb[174].mxu0  ;;  %7771 = vmatprep.mubr.msk.f32.mxu1 %vm8036_vm0, %v8037_v6 }
 0x437   :  { %v3958_v27 = vmax.f32 %v3833_v60, 0.0  ;;  %v5110_v0 = vadd.f32 %v7942_v23, %v4627_v49  ;;  %v3702_v17 = vadd.f32 %v3438_v55, %v12422_v54  ;;  %v7385_v41 = vpop.f32.mrb[175].mxu0  ;;  %v7949_v49 = vld [vmem:[%s12305_s2 + $0x140] sm:$0xff]  ;;  %v12427_v55 = vld [vmem:[#allocation47_spill] sm:$0xff] }
 0x438   :  { %v4631_v36 = vpop.f32.mrb[66].mxu1 }
 0x439   :  { %5235 = vst.msk [vmem:[%s12308_s9 + $0x118] sm:$0xff] %vm2546_vm2, %v5110_v0  ;;  %v3834_v7 = vadd.f32 %v11400_v24, %v3702_v17  ;;  %v4632_v2 = vadd.f32 %v10821_v56, %v4631_v36  ;;  %v7614_v4 = vpop.f32.mrb[67].mxu1  ;;  %7772 = vmatmul.mubr.msk.f32.gmra.mrb[172].mxu1 %vm4009_vm3, %v3958_v27 }
 0x43a   :  { %v3443_v39 = vpop.f32.mrb[176].mxu0  ;;  %7774 = vmatprep.mubr.msk.f32.mxu1 %vm8036_vm0, %v8037_v6 }
 0x43b   :  { %v3959_v44 = vmax.f32 %v3834_v7, 0.0  ;;  %v5111_v35 = vadd.f32 %v7944_v57, %v4632_v2  ;;  %v3703_v5 = vadd.f32 %v3443_v39, %v12423_v63  ;;  %v7388_v1 = vpop.f32.mrb[177].mxu0  ;;  %v7950_v2 = vld [vmem:[%s12305_s2 + $0x148] sm:$0xff]  ;;  %v12428_v39 = vld [vmem:[#allocation48_spill] sm:$0xff] }
 0x43c   :  { %v4636_v53 = vpop.f32.mrb[68].mxu1 }
 0x43d   :  { %5236 = vst.msk [vmem:[%s12308_s9 + $0x120] sm:$0xff] %vm2546_vm2, %v5111_v35  ;;  %v3835_v18 = vadd.f32 %v11400_v24, %v3703_v5  ;;  %v4637_v10 = vadd.f32 %v10821_v56, %v4636_v53  ;;  %v7617_v15 = vpop.f32.mrb[69].mxu1  ;;  %7775 = vmatmul.mubr.msk.f32.gmra.mrb[174].mxu1 %vm4009_vm3, %v3959_v44 }
 0x43e   :  { %v3448_v40 = vpop.f32.mrb[178].mxu0  ;;  %7777 = vmatprep.mubr.msk.f32.mxu1 %vm8036_vm0, %v8037_v6 }
 0x43f   :  { %v3960_v26 = vmax.f32 %v3835_v18, 0.0  ;;  %v5112_v12 = vadd.f32 %v7945_v30, %v4637_v10  ;;  %v3704_v28 = vadd.f32 %v3448_v40, %v12424_v11  ;;  %v7391_v31 = vpop.f32.mrb[179].mxu0  ;;  %v7951_v10 = vld [vmem:[%s12305_s2 + $0x150] sm:$0xff]  ;;  %v12429_v40 = vld [vmem:[#allocation49_spill] sm:$0xff] }
 0x440   :  { %v4641_v50 = vpop.f32.mrb[70].mxu1 }
 0x441   :  { %5237 = vst.msk [vmem:[%s12308_s9 + $0x128] sm:$0xff] %vm2546_vm2, %v5112_v12  ;;  %v3836_v56 = vadd.f32 %v11400_v24, %v3704_v28  ;;  %v4642_v32 = vadd.f32 %v11432_v43, %v4641_v50  ;;  %v7620_v25 = vpop.f32.mrb[71].mxu1  ;;  %7778 = vmatmul.mubr.msk.f32.gmra.mrb[176].mxu1 %vm4009_vm3, %v3960_v26 }
 0x442   :  { %v3453_v51 = vpop.f32.mrb[180].mxu0  ;;  %7780 = vmatprep.mubr.msk.f32.mxu1 %vm8036_vm0, %v8037_v6 }
 0x443   :  { %v3961_v47 = vmax.f32 %v3836_v56, 0.0  ;;  %v5113_v22 = vadd.f32 %v7947_v21, %v4642_v32  ;;  %v3705_v16 = vadd.f32 %v3453_v51, %v12425_v42  ;;  %v7394_v3 = vpop.f32.mrb[181].mxu0  ;;  %v7952_v32 = vld [vmem:[%s12305_s2 + $0x158] sm:$0xff]  ;;  %v12430_v51 = vld [vmem:[#allocation50_spill] sm:$0xff] }
 0x444   :  { %v4646_v13 = vpop.f32.mrb[72].mxu1 }
 0x445   :  { %5238 = vst.msk [vmem:[%s12308_s9 + $0x130] sm:$0xff] %vm2546_vm2, %v5113_v22  ;;  %v3837_v62 = vadd.f32 %v11400_v24, %v3705_v16  ;;  %v4647_v52 = vadd.f32 %v11432_v43, %v4646_v13  ;;  %v7623_v34 = vpop.f32.mrb[73].mxu1  ;;  %7781 = vmatmul.mubr.msk.f32.gmra.mrb[178].mxu1 %vm4009_vm3, %v3961_v47 }
 0x446   :  { %v3458_v61 = vpop.f32.mrb[182].mxu0  ;;  %7783 = vmatprep.mubr.msk.f32.mxu1 %vm8036_vm0, %v8037_v6 }
 0x447   :  { %v3962_v33 = vmax.f32 %v3837_v62, 0.0  ;;  %v5114_v20 = vadd.f32 %v7948_v19, %v4647_v52  ;;  %v3706_v37 = vadd.f32 %v3458_v61, %v12426_v9  ;;  %v7397_v58 = vpop.f32.mrb[183].mxu0  ;;  %v7953_v52 = vld [vmem:[%s12305_s2 + $0x160] sm:$0xff]  ;;  %v12431_v61 = vld [vmem:[#allocation51_spill] sm:$0xff] }
 0x448   :  { %v4651_v14 = vpop.f32.mrb[74].mxu1 }
 0x449   :  { %5239 = vst.msk [vmem:[%s12308_s9 + $0x138] sm:$0xff] %vm2546_vm2, %v5114_v20  ;;  %v3838_v8 = vadd.f32 %v11400_v24, %v3706_v37  ;;  %v4652_v38 = vadd.f32 %v11432_v43, %v4651_v14  ;;  %v7626_v46 = vpop.f32.mrb[75].mxu1  ;;  %7784 = vmatmul.mubr.msk.f32.gmra.mrb[180].mxu1 %vm4009_vm3, %v3962_v33 }
 0x44a   :  { %v3463_v45 = vpop.f32.mrb[184].mxu0  ;;  %7786 = vmatprep.mubr.msk.f32.mxu1 %vm8036_vm0, %v8037_v6 }
 0x44b   :  { %v3963_v60 = vmax.f32 %v3838_v8, 0.0  ;;  %v5115_v29 = vadd.f32 %v7949_v49, %v4652_v38  ;;  %v3707_v27 = vadd.f32 %v3463_v45, %v12427_v55  ;;  %v7400_v23 = vpop.f32.mrb[185].mxu0  ;;  %v7954_v38 = vld [vmem:[%s12305_s2 + $0x168] sm:$0xff]  ;;  %v12432_v45 = vld [vmem:[#allocation52_spill] sm:$0xff] }
 0x44c   :  { %v4656_v0 = vpop.f32.mrb[76].mxu1 }
 0x44d   :  { %5240 = vst.msk [vmem:[%s12308_s9 + $0x140] sm:$0xff] %vm2546_vm2, %v5115_v29  ;;  %v3839_v54 = vadd.f32 %v11400_v24, %v3707_v27  ;;  %v4657_v17 = vadd.f32 %v11432_v43, %v4656_v0  ;;  %v7629_v41 = vpop.f32.mrb[77].mxu1  ;;  %7787 = vmatmul.mubr.msk.f32.gmra.mrb[182].mxu1 %vm4009_vm3, %v3963_v60 }
 0x44e   :  { %v3468_v36 = vpop.f32.mrb[186].mxu0  ;;  %7789 = vmatprep.mubr.msk.f32.mxu1 %vm8036_vm0, %v8037_v6 }
 0x44f   :  { %v3964_v7 = vmax.f32 %v3839_v54, 0.0  ;;  %v5116_v4 = vadd.f32 %v7950_v2, %v4657_v17  ;;  %v3708_v44 = vadd.f32 %v3468_v36, %v12428_v39  ;;  %v7403_v57 = vpop.f32.mrb[187].mxu0  ;;  %v7955_v17 = vld [vmem:[%s12305_s2 + $0x170] sm:$0xff]  ;;  %v12433_v36 = vld [vmem:[#allocation53_spill] sm:$0xff] }
 0x450   :  { %v4661_v35 = vpop.f32.mrb[78].mxu1 }
 0x451   :  { %5241 = vst.msk [vmem:[%s12308_s9 + $0x148] sm:$0xff] %vm2546_vm2, %v5116_v4  ;;  %v3840_v63 = vadd.f32 %v11400_v24, %v3708_v44  ;;  %v4662_v5 = vadd.f32 %v11432_v43, %v4661_v35  ;;  %v7632_v1 = vpop.f32.mrb[79].mxu1  ;;  %7790 = vmatmul.mubr.msk.f32.gmra.mrb[184].mxu1 %vm4009_vm3, %v3964_v7 }
 0x452   :  { %v3473_v53 = vpop.f32.mrb[188].mxu0  ;;  %7792 = vmatprep.mubr.msk.f32.mxu1 %vm8036_vm0, %v8037_v6 }
 0x453   :  { %v3965_v18 = vmax.f32 %v3840_v63, 0.0  ;;  %v5117_v15 = vadd.f32 %v7951_v10, %v4662_v5  ;;  %v3709_v26 = vadd.f32 %v3473_v53, %v12429_v40  ;;  %v7406_v30 = vpop.f32.mrb[189].mxu0  ;;  %v7956_v5 = vld [vmem:[%s12305_s2 + $0x178] sm:$0xff]  ;;  %v12434_v53 = vld [vmem:[#allocation54_spill] sm:$0xff] }
 0x454   :  { %v4666_v12 = vpop.f32.mrb[80].mxu1 }
 0x455   :  { %5242 = vst.msk [vmem:[%s12308_s9 + $0x150] sm:$0xff] %vm2546_vm2, %v5117_v15  ;;  %v3841_v11 = vadd.f32 %v11400_v24, %v3709_v26  ;;  %v4667_v28 = vadd.f32 %v11432_v43, %v4666_v12  ;;  %v7635_v31 = vpop.f32.mrb[81].mxu1  ;;  %7793 = vmatmul.mubr.msk.f32.gmra.mrb[186].mxu1 %vm4009_vm3, %v3965_v18 }
 0x456   :  { %v3478_v50 = vpop.f32.mrb[190].mxu0  ;;  %7795 = vmatprep.mubr.msk.f32.mxu1 %vm8036_vm0, %v8037_v6 }
 0x457   :  { %v3966_v56 = vmax.f32 %v3841_v11, 0.0  ;;  %v5118_v25 = vadd.f32 %v7952_v32, %v4667_v28  ;;  %v3710_v47 = vadd.f32 %v3478_v50, %v12430_v51  ;;  %v7409_v21 = vpop.f32.mrb[191].mxu0  ;;  %v7957_v28 = vld [vmem:[%s12305_s2 + $0x180] sm:$0xff]  ;;  %v12435_v50 = vld [vmem:[#allocation55_spill] sm:$0xff] }
 0x458   :  { %v4671_v22 = vpop.f32.mrb[82].mxu1 }
 0x459   :  { %5243 = vst.msk [vmem:[%s12308_s9 + $0x158] sm:$0xff] %vm2546_vm2, %v5118_v25  ;;  %v3842_v42 = vadd.f32 %v11400_v24, %v3710_v47  ;;  %v4672_v16 = vadd.f32 %v11432_v43, %v4671_v22  ;;  %v7638_v3 = vpop.f32.mrb[83].mxu1  ;;  %7796 = vmatmul.mubr.msk.f32.gmra.mrb[188].mxu1 %vm4009_vm3, %v3966_v56 }
 0x45a   :  { %v3483_v13 = vpop.f32.mrb[192].mxu0  ;;  %7798 = vmatprep.mubr.msk.f32.mxu1 %vm8036_vm0, %v8037_v6 }
 0x45b   :  { %v3967_v62 = vmax.f32 %v3842_v42, 0.0  ;;  %v5119_v34 = vadd.f32 %v7953_v52, %v4672_v16  ;;  %v3711_v33 = vadd.f32 %v3483_v13, %v12431_v61  ;;  %v7412_v19 = vpop.f32.mrb[193].mxu0  ;;  %v7958_v16 = vld [vmem:[%s12305_s2 + $0x188] sm:$0xff]  ;;  %v12436_v13 = vld [vmem:[#allocation56_spill] sm:$0xff] }
 0x45c   :  { %v4676_v20 = vpop.f32.mrb[84].mxu1 }
 0x45d   :  { %5244 = vst.msk [vmem:[%s12308_s9 + $0x160] sm:$0xff] %vm2546_vm2, %v5119_v34  ;;  %v3843_v9 = vadd.f32 %v11400_v24, %v3711_v33  ;;  %v4677_v37 = vadd.f32 %v11432_v43, %v4676_v20  ;;  %v7641_v58 = vpop.f32.mrb[85].mxu1  ;;  %7799 = vmatmul.mubr.msk.f32.gmra.mrb[190].mxu1 %vm4009_vm3, %v3967_v62 }
 0x45e   :  { %v3488_v14 = vpop.f32.mrb[194].mxu0  ;;  %7801 = vmatprep.mubr.msk.f32.mxu1 %vm8036_vm0, %v8037_v6 }
 0x45f   :  { %v3968_v8 = vmax.f32 %v3843_v9, 0.0  ;;  %v5120_v46 = vadd.f32 %v7954_v38, %v4677_v37  ;;  %v3712_v60 = vadd.f32 %v3488_v14, %v12432_v45  ;;  %v7415_v49 = vpop.f32.mrb[195].mxu0  ;;  %v7959_v37 = vld [vmem:[%s12305_s2 + $0x190] sm:$0xff]  ;;  %v12437_v14 = vld [vmem:[#allocation57_spill] sm:$0xff] }
 0x460   :  { %v4681_v29 = vpop.f32.mrb[86].mxu1 }
 0x461   :  { %5245 = vst.msk [vmem:[%s12308_s9 + $0x168] sm:$0xff] %vm2546_vm2, %v5120_v46  ;;  %v3844_v55 = vadd.f32 %v11400_v24, %v3712_v60  ;;  %v4682_v27 = vadd.f32 %v11432_v43, %v4681_v29  ;;  %v7644_v23 = vpop.f32.mrb[87].mxu1  ;;  %7802 = vmatmul.mubr.msk.f32.gmra.mrb[192].mxu1 %vm4009_vm3, %v3968_v8 }
 0x462   :  { %v3493_v0 = vpop.f32.mrb[196].mxu0  ;;  %7804 = vmatprep.mubr.msk.f32.mxu1 %vm8036_vm0, %v8037_v6 }
 0x463   :  { %v3969_v54 = vmax.f32 %v3844_v55, 0.0  ;;  %v5121_v41 = vadd.f32 %v7955_v17, %v4682_v27  ;;  %v3713_v7 = vadd.f32 %v3493_v0, %v12433_v36  ;;  %v7418_v2 = vpop.f32.mrb[197].mxu0  ;;  %v7960_v27 = vld [vmem:[%s12305_s2 + $0x198] sm:$0xff]  ;;  %v12438_v0 = vld [vmem:[#allocation58_spill] sm:$0xff] }
 0x464   :  { %v4686_v4 = vpop.f32.mrb[88].mxu1 }
 0x465   :  { %5246 = vst.msk [vmem:[%s12308_s9 + $0x170] sm:$0xff] %vm2546_vm2, %v5121_v41  ;;  %v3845_v39 = vadd.f32 %v11400_v24, %v3713_v7  ;;  %v4687_v44 = vadd.f32 %v11432_v43, %v4686_v4  ;;  %v7647_v57 = vpop.f32.mrb[89].mxu1  ;;  %7805 = vmatmul.mubr.msk.f32.gmra.mrb[194].mxu1 %vm4009_vm3, %v3969_v54 }
 0x466   :  { %v3498_v35 = vpop.f32.mrb[198].mxu0  ;;  %7807 = vmatprep.mubr.msk.f32.mxu1 %vm8036_vm0, %v8037_v6 }
 0x467   :  { %v3970_v63 = vmax.f32 %v3845_v39, 0.0  ;;  %v5122_v1 = vadd.f32 %v7956_v5, %v4687_v44  ;;  %v3714_v18 = vadd.f32 %v3498_v35, %v12434_v53  ;;  %v7421_v10 = vpop.f32.mrb[199].mxu0  ;;  %v7961_v44 = vld [vmem:[%s12305_s2 + $0x1a0] sm:$0xff]  ;;  %v12439_v35 = vld [vmem:[#allocation59_spill] sm:$0xff] }
 0x468   :  { %v4691_v15 = vpop.f32.mrb[90].mxu1 }
 0x469   :  { %5247 = vst.msk [vmem:[%s12308_s9 + $0x178] sm:$0xff] %vm2546_vm2, %v5122_v1  ;;  %v3846_v40 = vadd.f32 %v11400_v24, %v3714_v18  ;;  %v4692_v26 = vadd.f32 %v11432_v43, %v4691_v15  ;;  %v7650_v30 = vpop.f32.mrb[91].mxu1  ;;  %7808 = vmatmul.mubr.msk.f32.gmra.mrb[196].mxu1 %vm4009_vm3, %v3970_v63 }
 0x46a   :  { %v3503_v12 = vpop.f32.mrb[200].mxu0  ;;  %7810 = vmatprep.mubr.msk.f32.mxu1 %vm8036_vm0, %v8037_v6 }
 0x46b   :  { %v3971_v11 = vmax.f32 %v3846_v40, 0.0  ;;  %v5123_v31 = vadd.f32 %v7957_v28, %v4692_v26  ;;  %v3715_v56 = vadd.f32 %v3503_v12, %v12435_v50  ;;  %v7424_v32 = vpop.f32.mrb[201].mxu0  ;;  %v7962_v26 = vld [vmem:[%s12305_s2 + $0x1a8] sm:$0xff]  ;;  %v12440_v12 = vld [vmem:[#allocation60_spill] sm:$0xff] }
 0x46c   :  { %v4696_v25 = vpop.f32.mrb[92].mxu1 }
 0x46d   :  { %5248 = vst.msk [vmem:[%s12308_s9 + $0x180] sm:$0xff] %vm2546_vm2, %v5123_v31  ;;  %v3847_v51 = vadd.f32 %v11400_v24, %v3715_v56  ;;  %v4697_v47 = vadd.f32 %v11432_v43, %v4696_v25  ;;  %v7653_v21 = vpop.f32.mrb[93].mxu1  ;;  %7811 = vmatmul.mubr.msk.f32.gmra.mrb[198].mxu1 %vm4009_vm3, %v3971_v11 }
 0x46e   :  { %v3508_v22 = vpop.f32.mrb[202].mxu0  ;;  %7813 = vmatprep.mubr.msk.f32.mxu1 %vm8036_vm0, %v8037_v6 }
 0x46f   :  { %v3972_v42 = vmax.f32 %v3847_v51, 0.0  ;;  %v5124_v3 = vadd.f32 %v7958_v16, %v4697_v47  ;;  %v3716_v62 = vadd.f32 %v3508_v22, %v12436_v13  ;;  %v7427_v52 = vpop.f32.mrb[203].mxu0  ;;  %v7963_v47 = vld [vmem:[%s12305_s2 + $0x1b0] sm:$0xff]  ;;  %v12441_v22 = vld [vmem:[#allocation61_spill] sm:$0xff] }
 0x470   :  { %v4701_v34 = vpop.f32.mrb[94].mxu1 }
 0x471   :  { %5249 = vst.msk [vmem:[%s12308_s9 + $0x188] sm:$0xff] %vm2546_vm2, %v5124_v3  ;;  %v3848_v61 = vadd.f32 %v11400_v24, %v3716_v62  ;;  %v4702_v33 = vadd.f32 %v11432_v43, %v4701_v34  ;;  %v7656_v19 = vpop.f32.mrb[95].mxu1  ;;  %7814 = vmatmul.mubr.msk.f32.gmra.mrb[200].mxu1 %vm4009_vm3, %v3972_v42 }
 0x472   :  { %v3513_v20 = vpop.f32.mrb[204].mxu0  ;;  %7816 = vmatprep.mubr.msk.f32.mxu1 %vm8036_vm0, %v8037_v6 }
 0x473   :  { %v3973_v9 = vmax.f32 %v3848_v61, 0.0  ;;  %v5125_v58 = vadd.f32 %v7959_v37, %v4702_v33  ;;  %v3717_v8 = vadd.f32 %v3513_v20, %v12437_v14  ;;  %v7430_v38 = vpop.f32.mrb[205].mxu0  ;;  %v7964_v33 = vld [vmem:[%s12305_s2 + $0x1b8] sm:$0xff]  ;;  %v12442_v20 = vld [vmem:[#allocation62_spill] sm:$0xff] }
 0x474   :  { %v4706_v46 = vpop.f32.mrb[96].mxu1 }
 0x475   :  { %5250 = vst.msk [vmem:[%s12308_s9 + $0x190] sm:$0xff] %vm2546_vm2, %v5125_v58  ;;  %v3849_v45 = vadd.f32 %v11400_v24, %v3717_v8  ;;  %v4707_v60 = vadd.f32 %v11432_v43, %v4706_v46  ;;  %v7659_v49 = vpop.f32.mrb[97].mxu1  ;;  %7817 = vmatmul.mubr.msk.f32.gmra.mrb[202].mxu1 %vm4009_vm3, %v3973_v9 }
 0x476   :  { %v3518_v29 = vpop.f32.mrb[206].mxu0  ;;  %7819 = vmatprep.mubr.msk.f32.mxu1 %vm8036_vm0, %v8037_v6 }
 0x477   :  { %v3974_v55 = vmax.f32 %v3849_v45, 0.0  ;;  %v5126_v23 = vadd.f32 %v7960_v27, %v4707_v60  ;;  %v3718_v54 = vadd.f32 %v3518_v29, %v12438_v0  ;;  %v7433_v17 = vpop.f32.mrb[207].mxu0  ;;  %v7965_v60 = vld [vmem:[%s12305_s2 + $0x1c0] sm:$0xff]  ;;  %v12443_v29 = vld [vmem:[#allocation63_spill] sm:$0xff] }
 0x478   :  { %v4711_v41 = vpop.f32.mrb[98].mxu1 }
 0x479   :  { %5251 = vst.msk [vmem:[%s12308_s9 + $0x198] sm:$0xff] %vm2546_vm2, %v5126_v23  ;;  %v3850_v36 = vadd.f32 %v11400_v24, %v3718_v54  ;;  %v4712_v7 = vadd.f32 %v11432_v43, %v4711_v41  ;;  %v7662_v2 = vpop.f32.mrb[99].mxu1  ;;  %7820 = vmatmul.mubr.msk.f32.gmra.mrb[204].mxu1 %vm4009_vm3, %v3974_v55 }
 0x47a   :  { %v3523_v4 = vpop.f32.mrb[208].mxu0  ;;  %7822 = vmatprep.mubr.msk.f32.mxu1 %vm8036_vm0, %v8037_v6 }
 0x47b   :  { %v3975_v39 = vmax.f32 %v3850_v36, 0.0  ;;  %v5127_v57 = vadd.f32 %v7961_v44, %v4712_v7  ;;  %v3719_v63 = vadd.f32 %v3523_v4, %v12439_v35  ;;  %v7436_v5 = vpop.f32.mrb[209].mxu0  ;;  %v7966_v7 = vld [vmem:[%s12305_s2 + $0x1c8] sm:$0xff]  ;;  %v12444_v4 = vld [vmem:[#allocation64_spill] sm:$0xff] }
 0x47c   :  { %v4716_v1 = vpop.f32.mrb[100].mxu1 }
 0x47d   :  { %5252 = vst.msk [vmem:[%s12308_s9 + $0x1a0] sm:$0xff] %vm2546_vm2, %v5127_v57  ;;  %v3851_v53 = vadd.f32 %v11400_v24, %v3719_v63  ;;  %v4717_v18 = vadd.f32 %v11432_v43, %v4716_v1  ;;  %v7665_v10 = vpop.f32.mrb[101].mxu1  ;;  %7823 = vmatmul.mubr.msk.f32.gmra.mrb[206].mxu1 %vm4009_vm3, %v3975_v39 }
 0x47e   :  { %v3528_v15 = vpop.f32.mrb[210].mxu0  ;;  %7825 = vmatprep.mubr.msk.f32.mxu1 %vm8036_vm0, %v8037_v6 }
 0x47f   :  { %v3976_v40 = vmax.f32 %v3851_v53, 0.0  ;;  %v5128_v30 = vadd.f32 %v7962_v26, %v4717_v18  ;;  %v3720_v11 = vadd.f32 %v3528_v15, %v12440_v12  ;;  %v7439_v28 = vpop.f32.mrb[211].mxu0  ;;  %v7967_v18 = vld [vmem:[%s12305_s2 + $0x1d0] sm:$0xff]  ;;  %v12445_v15 = vld [vmem:[#allocation65_spill] sm:$0xff] }
 0x480   :  { %v4721_v31 = vpop.f32.mrb[102].mxu1 }
 0x481   :  { %5253 = vst.msk [vmem:[%s12308_s9 + $0x1a8] sm:$0xff] %vm2546_vm2, %v5128_v30  ;;  %v3852_v50 = vadd.f32 %v11400_v24, %v3720_v11  ;;  %v4722_v56 = vadd.f32 %v11432_v43, %v4721_v31  ;;  %v7668_v32 = vpop.f32.mrb[103].mxu1  ;;  %7826 = vmatmul.mubr.msk.f32.gmra.mrb[208].mxu1 %vm4009_vm3, %v3976_v40 }
 0x482   :  { %v3533_v25 = vpop.f32.mrb[212].mxu0  ;;  %7828 = vmatprep.mubr.msk.f32.mxu1 %vm8036_vm0, %v8037_v6 }
 0x483   :  { %v3977_v51 = vmax.f32 %v3852_v50, 0.0  ;;  %v5129_v21 = vadd.f32 %v7963_v47, %v4722_v56  ;;  %v3721_v42 = vadd.f32 %v3533_v25, %v12441_v22  ;;  %v7442_v16 = vpop.f32.mrb[213].mxu0  ;;  %v7968_v56 = vld [vmem:[%s12305_s2 + $0x1d8] sm:$0xff]  ;;  %v12446_v25 = vld [vmem:[#allocation66_spill] sm:$0xff] }
 0x484   :  { %v4726_v3 = vpop.f32.mrb[104].mxu1 }
 0x485   :  { %5254 = vst.msk [vmem:[%s12308_s9 + $0x1b0] sm:$0xff] %vm2546_vm2, %v5129_v21  ;;  %v3853_v13 = vadd.f32 %v11400_v24, %v3721_v42  ;;  %v4727_v62 = vadd.f32 %v11432_v43, %v4726_v3  ;;  %v7671_v52 = vpop.f32.mrb[105].mxu1  ;;  %7829 = vmatmul.mubr.msk.f32.gmra.mrb[210].mxu1 %vm4009_vm3, %v3977_v51 }
 0x486   :  { %v3538_v34 = vpop.f32.mrb[214].mxu0  ;;  %7831 = vmatprep.mubr.msk.f32.mxu1 %vm8036_vm0, %v8037_v6 }
 0x487   :  { %v3978_v61 = vmax.f32 %v3853_v13, 0.0  ;;  %v5130_v19 = vadd.f32 %v7964_v33, %v4727_v62  ;;  %v3722_v9 = vadd.f32 %v3538_v34, %v12442_v20  ;;  %v7445_v37 = vpop.f32.mrb[215].mxu0  ;;  %v7969_v62 = vld [vmem:[%s12305_s2 + $0x1e0] sm:$0xff]  ;;  %v12447_v34 = vld [vmem:[#allocation67_spill] sm:$0xff] }
 0x488   :  { %v4731_v58 = vpop.f32.mrb[106].mxu1 }
 0x489   :  { %5255 = vst.msk [vmem:[%s12308_s9 + $0x1b8] sm:$0xff] %vm2546_vm2, %v5130_v19  ;;  %v3854_v14 = vadd.f32 %v11400_v24, %v3722_v9  ;;  %v4732_v8 = vadd.f32 %v11432_v43, %v4731_v58  ;;  %v7674_v38 = vpop.f32.mrb[107].mxu1  ;;  %7832 = vmatmul.mubr.msk.f32.gmra.mrb[212].mxu1 %vm4009_vm3, %v3978_v61 }
 0x48a   :  { %v3543_v46 = vpop.f32.mrb[216].mxu0  ;;  %7834 = vmatprep.mubr.msk.f32.mxu1 %vm8036_vm0, %v8037_v6 }
 0x48b   :  { %v3979_v45 = vmax.f32 %v3854_v14, 0.0  ;;  %v5131_v49 = vadd.f32 %v7965_v60, %v4732_v8  ;;  %v3723_v55 = vadd.f32 %v3543_v46, %v12443_v29  ;;  %v7448_v27 = vpop.f32.mrb[217].mxu0  ;;  %v7970_v8 = vld [vmem:[%s12305_s2 + $0x1e8] sm:$0xff]  ;;  %v12448_v46 = vld [vmem:[#allocation68_spill] sm:$0xff] }
 0x48c   :  { %v4736_v23 = vpop.f32.mrb[108].mxu1 }
 0x48d   :  { %5256 = vst.msk [vmem:[%s12308_s9 + $0x1c0] sm:$0xff] %vm2546_vm2, %v5131_v49  ;;  %v3855_v0 = vadd.f32 %v11400_v24, %v3723_v55  ;;  %v4737_v54 = vadd.f32 %v11432_v43, %v4736_v23  ;;  %v7677_v17 = vpop.f32.mrb[109].mxu1  ;;  %7835 = vmatmul.mubr.msk.f32.gmra.mrb[214].mxu1 %vm4009_vm3, %v3979_v45 }
 0x48e   :  { %v3548_v41 = vpop.f32.mrb[218].mxu0  ;;  %7837 = vmatprep.mubr.msk.f32.mxu1 %vm8036_vm0, %v8037_v6 }
 0x48f   :  { %v3980_v36 = vmax.f32 %v3855_v0, 0.0  ;;  %v5132_v2 = vadd.f32 %v7966_v7, %v4737_v54  ;;  %v3724_v39 = vadd.f32 %v3548_v41, %v12444_v4  ;;  %v7451_v44 = vpop.f32.mrb[219].mxu0  ;;  %v7971_v54 = vld [vmem:[%s12305_s2 + $0x1f0] sm:$0xff]  ;;  %v12449_v41 = vld [vmem:[#allocation69_spill] sm:$0xff] }
 0x490   :  { %v4741_v57 = vpop.f32.mrb[110].mxu1 }
 0x491   :  { %5257 = vst.msk [vmem:[%s12308_s9 + $0x1c8] sm:$0xff] %vm2546_vm2, %v5132_v2  ;;  %v3856_v35 = vadd.f32 %v11400_v24, %v3724_v39  ;;  %v4742_v63 = vadd.f32 %v11432_v43, %v4741_v57  ;;  %v7680_v5 = vpop.f32.mrb[111].mxu1  ;;  %7838 = vmatmul.mubr.msk.f32.gmra.mrb[216].mxu1 %vm4009_vm3, %v3980_v36 }
 0x492   :  { %v3553_v1 = vpop.f32.mrb[220].mxu0  ;;  %7840 = vmatprep.mubr.msk.f32.mxu1 %vm8036_vm0, %v8037_v6 }
 0x493   :  { %v3981_v53 = vmax.f32 %v3856_v35, 0.0  ;;  %v5133_v10 = vadd.f32 %v7967_v18, %v4742_v63  ;;  %v3725_v40 = vadd.f32 %v3553_v1, %v12445_v15  ;;  %v7454_v26 = vpop.f32.mrb[221].mxu0  ;;  %v7972_v63 = vld [vmem:[%s12305_s2 + $0x1f8] sm:$0xff]  ;;  %v12450_v1 = vld [vmem:[#allocation70_spill] sm:$0xff] }
 0x494   :  { %v4746_v30 = vpop.f32.mrb[112].mxu1 }
 0x495   :  { %5258 = vst.msk [vmem:[%s12308_s9 + $0x1d0] sm:$0xff] %vm2546_vm2, %v5133_v10  ;;  %v3857_v12 = vadd.f32 %v11400_v24, %v3725_v40  ;;  %v4747_v11 = vadd.f32 %v11432_v43, %v4746_v30  ;;  %v7683_v28 = vpop.f32.mrb[113].mxu1  ;;  %7841 = vmatmul.mubr.msk.f32.gmra.mrb[218].mxu1 %vm4009_vm3, %v3981_v53 }
 0x496   :  { %v3558_v31 = vpop.f32.mrb[222].mxu0  ;;  %7843 = vmatprep.mubr.msk.f32.mxu1 %vm8036_vm0, %v8037_v6 }
 0x497   :  { %v3982_v50 = vmax.f32 %v3857_v12, 0.0  ;;  %v5134_v32 = vadd.f32 %v7968_v56, %v4747_v11  ;;  %v3726_v51 = vadd.f32 %v3558_v31, %v12446_v25  ;;  %v7457_v47 = vpop.f32.mrb[223].mxu0  ;;  %v7973_v11 = vld [vmem:[%s12305_s2 + $0x200] sm:$0xff]  ;;  %v12451_v31 = vld [vmem:[#allocation71_spill] sm:$0xff] }
 0x498   :  { %v4751_v21 = vpop.f32.mrb[114].mxu1 }
 0x499   :  { %5259 = vst.msk [vmem:[%s12308_s9 + $0x1d8] sm:$0xff] %vm2546_vm2, %v5134_v32  ;;  %v3858_v22 = vadd.f32 %v11400_v24, %v3726_v51  ;;  %v4752_v42 = vadd.f32 %v11432_v43, %v4751_v21  ;;  %v7686_v16 = vpop.f32.mrb[115].mxu1  ;;  %7844 = vmatmul.mubr.msk.f32.gmra.mrb[220].mxu1 %vm4009_vm3, %v3982_v50 }
 0x49a   :  { %v3563_v3 = vpop.f32.mrb[224].mxu0  ;;  %7846 = vmatprep.mubr.msk.f32.mxu1 %vm8036_vm0, %v8037_v6 }
 0x49b   :  { %v3983_v13 = vmax.f32 %v3858_v22, 0.0  ;;  %v5135_v52 = vadd.f32 %v7969_v62, %v4752_v42  ;;  %v3727_v61 = vadd.f32 %v3563_v3, %v12447_v34  ;;  %v7460_v33 = vpop.f32.mrb[225].mxu0  ;;  %v7974_v42 = vld [vmem:[%s12305_s2 + $0x208] sm:$0xff]  ;;  %v12452_v3 = vld [vmem:[#allocation72_spill] sm:$0xff] }
 0x49c   :  { %v4756_v19 = vpop.f32.mrb[116].mxu1 }
 0x49d   :  { %5260 = vst.msk [vmem:[%s12308_s9 + $0x1e0] sm:$0xff] %vm2546_vm2, %v5135_v52  ;;  %v3859_v20 = vadd.f32 %v11400_v24, %v3727_v61  ;;  %v4757_v9 = vadd.f32 %v11432_v43, %v4756_v19  ;;  %v7689_v37 = vpop.f32.mrb[117].mxu1  ;;  %7847 = vmatmul.mubr.msk.f32.gmra.mrb[222].mxu1 %vm4009_vm3, %v3983_v13 }
 0x49e   :  { %v3568_v58 = vpop.f32.mrb[226].mxu0  ;;  %7849 = vmatprep.mubr.msk.f32.mxu1 %vm8036_vm0, %v8037_v6 }
 0x49f   :  { %v3984_v14 = vmax.f32 %v3859_v20, 0.0  ;;  %v5136_v38 = vadd.f32 %v7970_v8, %v4757_v9  ;;  %v3728_v45 = vadd.f32 %v3568_v58, %v12448_v46  ;;  %v7463_v60 = vpop.f32.mrb[227].mxu0  ;;  %v7975_v9 = vld [vmem:[%s12305_s2 + $0x210] sm:$0xff] }
 0x4a0   :  { %v4761_v49 = vpop.f32.mrb[118].mxu1 }
 0x4a1   :  { %5261 = vst.msk [vmem:[%s12308_s9 + $0x1e8] sm:$0xff] %vm2546_vm2, %v5136_v38  ;;  %v3860_v29 = vadd.f32 %v11400_v24, %v3728_v45  ;;  %v4762_v55 = vadd.f32 %v11432_v43, %v4761_v49  ;;  %v7692_v27 = vpop.f32.mrb[119].mxu1  ;;  %7850 = vmatmul.mubr.msk.f32.gmra.mrb[224].mxu1 %vm4009_vm3, %v3984_v14 }
 0x4a2   :  { %v3573_v23 = vpop.f32.mrb[228].mxu0  ;;  %7852 = vmatprep.mubr.msk.f32.mxu1 %vm8036_vm0, %v8037_v6 }
 0x4a3   :  { %v3985_v0 = vmax.f32 %v3860_v29, 0.0  ;;  %v5137_v17 = vadd.f32 %v7971_v54, %v4762_v55  ;;  %v3729_v36 = vadd.f32 %v3573_v23, %v12449_v41  ;;  %v7466_v7 = vpop.f32.mrb[229].mxu0 }
 0x4a4   :  { %v4766_v2 = vpop.f32.mrb[120].mxu1 }
 0x4a5   :  { %5262 = vst.msk [vmem:[%s12308_s9 + $0x1f0] sm:$0xff] %vm2546_vm2, %v5137_v17  ;;  %v3861_v4 = vadd.f32 %v11400_v24, %v3729_v36  ;;  %v4767_v39 = vadd.f32 %v11432_v43, %v4766_v2  ;;  %v7695_v44 = vpop.f32.mrb[121].mxu1  ;;  %7853 = vmatmul.mubr.msk.f32.gmra.mrb[226].mxu1 %vm4009_vm3, %v3985_v0  ;;  %v12453_v2 = vld [vmem:[#allocation73_spill] sm:$0xff] }
 0x4a6   :  { %v3578_v57 = vpop.f32.mrb[230].mxu0  ;;  %7855 = vmatprep.mubr.msk.f32.mxu1 %vm8036_vm0, %v8037_v6 }
 0x4a7   :  { %v3986_v35 = vmax.f32 %v3861_v4, 0.0  ;;  %v5138_v5 = vadd.f32 %v7972_v63, %v4767_v39  ;;  %v3730_v53 = vadd.f32 %v3578_v57, %v12450_v1  ;;  %v7469_v18 = vpop.f32.mrb[231].mxu0 }
 0x4a8   :  { %v4771_v10 = vpop.f32.mrb[122].mxu1 }
 0x4a9   :  { %5263 = vst.msk [vmem:[%s12308_s9 + $0x1f8] sm:$0xff] %vm2546_vm2, %v5138_v5  ;;  %v3862_v15 = vadd.f32 %v11400_v24, %v3730_v53  ;;  %v4772_v40 = vadd.f32 %v11432_v43, %v4771_v10  ;;  %v7698_v26 = vpop.f32.mrb[123].mxu1  ;;  %7856 = vmatmul.mubr.msk.f32.gmra.mrb[228].mxu1 %vm4009_vm3, %v3986_v35  ;;  %v7978_v53 = vld [vmem:[%s12305_s2 + $0x228] sm:$0xff]  ;;  %v12454_v10 = vld [vmem:[#allocation74_spill] sm:$0xff] }
 0x4aa   :  { %v3583_v30 = vpop.f32.mrb[232].mxu0  ;;  %7858 = vmatprep.mubr.msk.f32.mxu1 %vm8036_vm0, %v8037_v6 }
 0x4ab   :  { %v3987_v12 = vmax.f32 %v3862_v15, 0.0  ;;  %v5139_v28 = vadd.f32 %v7973_v11, %v4772_v40  ;;  %v3731_v50 = vadd.f32 %v3583_v30, %v12451_v31  ;;  %v7472_v56 = vpop.f32.mrb[233].mxu0  ;;  %v7979_v31 = vld [vmem:[%s12305_s2 + $0x230] sm:$0xff] }
 0x4ac   :  { %v4776_v32 = vpop.f32.mrb[124].mxu1 }
 0x4ad   :  { %5264 = vst.msk [vmem:[%s12308_s9 + $0x200] sm:$0xff] %vm2546_vm2, %v5139_v28  ;;  %v3863_v25 = vadd.f32 %v11400_v24, %v3731_v50  ;;  %v4777_v51 = vadd.f32 %v11432_v43, %v4776_v32  ;;  %v7701_v47 = vpop.f32.mrb[125].mxu1  ;;  %7859 = vmatmul.mubr.msk.f32.gmra.mrb[230].mxu1 %vm4009_vm3, %v3987_v12 }
 0x4ae   :  { %v3588_v21 = vpop.f32.mrb[234].mxu0  ;;  %7861 = vmatprep.mubr.msk.f32.mxu1 %vm8036_vm0, %v8037_v6 }
 0x4af   :  { %v3988_v22 = vmax.f32 %v3863_v25, 0.0  ;;  %v5140_v16 = vadd.f32 %v7974_v42, %v4777_v51  ;;  %v3732_v13 = vadd.f32 %v3588_v21, %v12452_v3  ;;  %v7475_v62 = vpop.f32.mrb[235].mxu0 }
 0x4b0   :  { %v4781_v52 = vpop.f32.mrb[126].mxu1  ;;  %v7982_v62 = vld [vmem:[%s12305_s2 + $0x248] sm:$0xff] }
 0x4b1   :  { %5265 = vst.msk [vmem:[%s12308_s9 + $0x208] sm:$0xff] %vm2546_vm2, %v5140_v16  ;;  %v3864_v34 = vadd.f32 %v11400_v24, %v3732_v13  ;;  %v4782_v61 = vadd.f32 %v11432_v43, %v4781_v52  ;;  %v7704_v33 = vpop.f32.mrb[127].mxu1  ;;  %7862 = vmatmul.mubr.msk.f32.gmra.mrb[232].mxu1 %vm4009_vm3, %v3988_v22  ;;  %v7981_v22 = vld [vmem:[%s12305_s2 + $0x240] sm:$0xff] }
 0x4b2   :  { %v3593_v19 = vpop.f32.mrb[236].mxu0  ;;  %7864 = vmatprep.mubr.msk.f32.mxu1 %vm8036_vm0, %v8037_v6 }
 0x4b3   :  { %v3989_v20 = vmax.f32 %v3864_v34, 0.0  ;;  %v5141_v37 = vadd.f32 %v7975_v9, %v4782_v61  ;;  %v3733_v58 = vadd.f32 %v3593_v19, %v10193_v59  ;;  %v7478_v14 = vpop.f32.mrb[237].mxu0  ;;  %v7976_v59 = vld [vmem:[%s12305_s2 + $0x218] sm:$0xff]  ;;  %v7983_v19 = vld [vmem:[%s12305_s2 + $0x250] sm:$0xff] }
 0x4b4   :  { %v4786_v8 = vpop.f32.mrb[128].mxu1  ;;  %v7984_v14 = vld [vmem:[%s12305_s2 + $0x258] sm:$0xff] }
 0x4b5   :  { %5266 = vst.msk [vmem:[%s12308_s9 + $0x210] sm:$0xff] %vm2546_vm2, %v5141_v37  ;;  %v3865_v38 = vadd.f32 %v11400_v24, %v3733_v58  ;;  %v4787_v46 = vadd.f32 %v11432_v43, %v4786_v8  ;;  %v7707_v45 = vpop.f32.mrb[129].mxu1  ;;  %7865 = vmatmul.mubr.msk.f32.gmra.mrb[234].mxu1 %vm4009_vm3, %v3989_v20 }
 0x4b6   :  { %v3598_v60 = vpop.f32.mrb[238].mxu0  ;;  %7867 = vmatprep.mubr.msk.f32.mxu1 %vm8036_vm0, %v8037_v6 }
 0x4b7   :  { %v3990_v49 = vmax.f32 %v3865_v38, 0.0  ;;  %v5142_v29 = vadd.f32 %v7976_v59, %v4787_v46  ;;  %v3734_v55 = vadd.f32 %v3598_v60, %v10196_v48  ;;  %v7481_v27 = vpop.f32.mrb[239].mxu0  ;;  %v7977_v48 = vld [vmem:[%s12305_s2 + $0x220] sm:$0xff] }
 0x4b8   :  { %v4791_v23 = vpop.f32.mrb[130].mxu1  ;;  %v7985_v60 = vld [vmem:[%s12305_s2 + $0x260] sm:$0xff]  ;;  %v7986_v27 = vld [vmem:[%s12305_s2 + $0x268] sm:$0xff] }
 0x4b9   :  { %5267 = vst.msk [vmem:[%s12308_s9 + $0x218] sm:$0xff] %vm2546_vm2, %v5142_v29  ;;  %v3866_v0 = vadd.f32 %v11400_v24, %v3734_v55  ;;  %v4792_v54 = vadd.f32 %v11432_v43, %v4791_v23  ;;  %v7710_v17 = vpop.f32.mrb[131].mxu1  ;;  %7868 = vmatmul.mubr.msk.f32.gmra.mrb[236].mxu1 %vm4009_vm3, %v3990_v49 }
 0x4ba   :  { %v3603_v41 = vpop.f32.mrb[240].mxu0  ;;  %7870 = vmatprep.mubr.msk.f32.mxu1 %vm8036_vm0, %v8037_v6 }
 0x4bb   :  { %v3991_v36 = vmax.f32 %v3866_v0, 0.0  ;;  %v5143_v7 = vadd.f32 %v7977_v48, %v4792_v54  ;;  %v3735_v4 = vadd.f32 %v3603_v41, %v12453_v2  ;;  %v7484_v39 = vpop.f32.mrb[241].mxu0  ;;  %v7987_v41 = vld [vmem:[%s12305_s2 + $0x270] sm:$0xff] }
 0x4bc   :  { %v4796_v44 = vpop.f32.mrb[132].mxu1 }
 0x4bd   :  { %5268 = vst.msk [vmem:[%s12308_s9 + $0x220] sm:$0xff] %vm2546_vm2, %v5143_v7  ;;  %v3867_v57 = vadd.f32 %v11400_v24, %v3735_v4  ;;  %v4797_v35 = vadd.f32 %v11432_v43, %v4796_v44  ;;  %v7713_v63 = vpop.f32.mrb[133].mxu1  ;;  %7871 = vmatmul.mubr.msk.f32.gmra.mrb[238].mxu1 %vm4009_vm3, %v3991_v36  ;;  %v7988_v4 = vld [vmem:[%s12305_s2 + $0x278] sm:$0xff] }
 0x4be   :  { %v3608_v5 = vpop.f32.mrb[242].mxu0  ;;  %7873 = vmatprep.mubr.msk.f32.mxu1 %vm8036_vm0, %v8037_v6  ;;  %v7989_v63 = vld [vmem:[%s12305_s2 + $0x280] sm:$0xff] }
 0x4bf   :  { %v3992_v1 = vmax.f32 %v3867_v57, 0.0  ;;  %v5144_v18 = vadd.f32 %v7978_v53, %v4797_v35  ;;  %v3736_v15 = vadd.f32 %v3608_v5, %v12454_v10  ;;  %v7487_v40 = vpop.f32.mrb[243].mxu0  ;;  %v7990_v10 = vld [vmem:[%s12305_s2 + $0x288] sm:$0xff] }
 0x4c0   :  { %v4801_v26 = vpop.f32.mrb[134].mxu1 }
 0x4c1   :  { %5269 = vst.msk [vmem:[%s12308_s9 + $0x228] sm:$0xff] %vm2546_vm2, %v5144_v18  ;;  %v3868_v30 = vadd.f32 %v11400_v24, %v3736_v15  ;;  %v4802_v12 = vadd.f32 %v11432_v43, %v4801_v26  ;;  %v7716_v11 = vpop.f32.mrb[135].mxu1  ;;  %7874 = vmatmul.mubr.msk.f32.gmra.mrb[240].mxu1 %vm4009_vm3, %v3992_v1 }
 0x4c2   :  { %7876 = vmatprep.mubr.msk.f32.mxu1 %vm8036_vm0, %v8037_v6  ;;  %v7980_v6 = vld [vmem:[%s12305_s2 + $0x238] sm:$0xff] }
 0x4c3   :  { %v3993_v28 = vmax.f32 %v3868_v30, 0.0  ;;  %v5145_v50 = vadd.f32 %v7979_v31, %v4802_v12  ;;  %v7991_v12 = vld [vmem:[%s12305_s2 + $0x290] sm:$0xff] }
 0x4c4   :  { %v4806_v56 = vpop.f32.mrb[136].mxu1 }
 0x4c5   :  { %5270 = vst.msk [vmem:[%s12308_s9 + $0x230] sm:$0xff] %vm2546_vm2, %v5145_v50  ;;  %v4807_v24 = vadd.f32 %v11432_v43, %v4806_v56  ;;  %v7719_v32 = vpop.f32.mrb[137].mxu1  ;;  %7877 = vmatmul.mubr.msk.f32.gmra.mrb[242].mxu1 %vm4009_vm3, %v3993_v28  ;;  %v7992_v56 = vld [vmem:[%s12305_s2 + $0x298] sm:$0xff] }
 0x4c7   :  { %v5146_v25 = vadd.f32 %v7980_v6, %v4807_v24 }
 0x4c8   :  { %v4811_v51 = vpop.f32.mrb[138].mxu1 }
 0x4c9   :  { %5271 = vst.msk [vmem:[%s12308_s9 + $0x238] sm:$0xff] %vm2546_vm2, %v5146_v25  ;;  %v4812_v47 = vadd.f32 %v11432_v43, %v4811_v51  ;;  %v7722_v21 = vpop.f32.mrb[139].mxu1  ;;  %v7993_v51 = vld [vmem:[%s12305_s2 + $0x2a0] sm:$0xff] }
 0x4cb   :  { %v5147_v42 = vadd.f32 %v7981_v22, %v4812_v47 }
 0x4cc   :  { %v4816_v16 = vpop.f32.mrb[140].mxu1 }
 0x4cd   :  { %5272 = vst.msk [vmem:[%s12308_s9 + $0x240] sm:$0xff] %vm2546_vm2, %v5147_v42  ;;  %v4817_v3 = vadd.f32 %v11432_v43, %v4816_v16  ;;  %v7725_v13 = vpop.f32.mrb[141].mxu1  ;;  %v7994_v16 = vld [vmem:[%s12305_s2 + $0x2a8] sm:$0xff] }
 0x4cf   :  { %v5148_v52 = vadd.f32 %v7982_v62, %v4817_v3 }
 0x4d0   :  { %v4821_v34 = vpop.f32.mrb[142].mxu1 }
 0x4d1   :  { %5273 = vst.msk [vmem:[%s12308_s9 + $0x248] sm:$0xff] %vm2546_vm2, %v5148_v52  ;;  %v4822_v61 = vadd.f32 %v11432_v43, %v4821_v34  ;;  %v7728_v33 = vpop.f32.mrb[143].mxu1  ;;  %v7995_v34 = vld [vmem:[%s12305_s2 + $0x2b0] sm:$0xff] }
 0x4d3   :  { %v5149_v20 = vadd.f32 %v7983_v19, %v4822_v61 }
 0x4d4   :  { %v4826_v9 = vpop.f32.mrb[144].mxu1 }
 0x4d5   :  { %5274 = vst.msk [vmem:[%s12308_s9 + $0x250] sm:$0xff] %vm2546_vm2, %v5149_v20  ;;  %v4827_v37 = vadd.f32 %v11432_v43, %v4826_v9  ;;  %v7731_v58 = vpop.f32.mrb[145].mxu1  ;;  %v7996_v9 = vld [vmem:[%s12305_s2 + $0x2b8] sm:$0xff] }
 0x4d7   :  { %v5150_v8 = vadd.f32 %v7984_v14, %v4827_v37 }
 0x4d8   :  { %v4831_v38 = vpop.f32.mrb[146].mxu1 }
 0x4d9   :  { %5275 = vst.msk [vmem:[%s12308_s9 + $0x258] sm:$0xff] %vm2546_vm2, %v5150_v8  ;;  %v4832_v46 = vadd.f32 %v11432_v43, %v4831_v38  ;;  %v7734_v45 = vpop.f32.mrb[147].mxu1  ;;  %v7997_v38 = vld [vmem:[%s12305_s2 + $0x2c0] sm:$0xff] }
 0x4db   :  { %v5151_v49 = vadd.f32 %v7985_v60, %v4832_v46 }
 0x4dc   :  { %v4836_v59 = vpop.f32.mrb[148].mxu1 }
 0x4dd   :  { %5276 = vst.msk [vmem:[%s12308_s9 + $0x260] sm:$0xff] %vm2546_vm2, %v5151_v49  ;;  %v4837_v29 = vadd.f32 %v11432_v43, %v4836_v59  ;;  %v7737_v55 = vpop.f32.mrb[149].mxu1  ;;  %v7998_v59 = vld [vmem:[%s12305_s2 + $0x2c8] sm:$0xff] }
 0x4df   :  { %v5152_v23 = vadd.f32 %v7986_v27, %v4837_v29 }
 0x4e0   :  { %v4841_v0 = vpop.f32.mrb[150].mxu1 }
 0x4e1   :  { %5277 = vst.msk [vmem:[%s12308_s9 + $0x268] sm:$0xff] %vm2546_vm2, %v5152_v23  ;;  %v4842_v54 = vadd.f32 %v11432_v43, %v4841_v0  ;;  %v7740_v17 = vpop.f32.mrb[151].mxu1  ;;  %v7999_v0 = vld [vmem:[%s12305_s2 + $0x2d0] sm:$0xff] }
 0x4e3   :  { %v5153_v36 = vadd.f32 %v7987_v41, %v4842_v54 }
 0x4e4   :  { %v4846_v48 = vpop.f32.mrb[152].mxu1 }
 0x4e5   :  { %5278 = vst.msk [vmem:[%s12308_s9 + $0x270] sm:$0xff] %vm2546_vm2, %v5153_v36  ;;  %v4847_v7 = vadd.f32 %v11432_v43, %v4846_v48  ;;  %v7743_v2 = vpop.f32.mrb[153].mxu1  ;;  %v8000_v48 = vld [vmem:[%s12305_s2 + $0x2d8] sm:$0xff] }
 0x4e7   :  { %v5154_v39 = vadd.f32 %v7988_v4, %v4847_v7 }
 0x4e8   :  { %v4851_v44 = vpop.f32.mrb[154].mxu1 }
 0x4e9   :  { %5279 = vst.msk [vmem:[%s12308_s9 + $0x278] sm:$0xff] %vm2546_vm2, %v5154_v39  ;;  %v4852_v57 = vadd.f32 %v11432_v43, %v4851_v44  ;;  %v7746_v35 = vpop.f32.mrb[155].mxu1  ;;  %v8001_v44 = vld [vmem:[%s12305_s2 + $0x2e0] sm:$0xff] }
 0x4eb   :  { %v5155_v5 = vadd.f32 %v7989_v63, %v4852_v57 }
 0x4ec   :  { %v4856_v1 = vpop.f32.mrb[156].mxu1 }
 0x4ed   :  { %5280 = vst.msk [vmem:[%s12308_s9 + $0x280] sm:$0xff] %vm2546_vm2, %v5155_v5  ;;  %v4857_v53 = vadd.f32 %v11432_v43, %v4856_v1  ;;  %v7749_v18 = vpop.f32.mrb[157].mxu1  ;;  %v8002_v1 = vld [vmem:[%s12305_s2 + $0x2e8] sm:$0xff] }
 0x4ef   :  { %v5156_v15 = vadd.f32 %v7990_v10, %v4857_v53 }
 0x4f0   :  { %v4861_v40 = vpop.f32.mrb[158].mxu1 }
 0x4f1   :  { %5281 = vst.msk [vmem:[%s12308_s9 + $0x288] sm:$0xff] %vm2546_vm2, %v5156_v15  ;;  %v4862_v26 = vadd.f32 %v11432_v43, %v4861_v40  ;;  %v7752_v30 = vpop.f32.mrb[159].mxu1  ;;  %v8003_v40 = vld [vmem:[%s12305_s2 + $0x2f0] sm:$0xff] }
 0x4f3   :  { %v5157_v11 = vadd.f32 %v7991_v12, %v4862_v26  ;;  %v12057_v12 = vld [vmem:[%s12307_s8] ss:$0 sm:$0xff] }
 0x4f4   :  { %v4866_v28 = vpop.f32.mrb[160].mxu1 }
 0x4f5   :  { %5282 = vst.msk [vmem:[%s12308_s9 + $0x290] sm:$0xff] %vm2546_vm2, %v5157_v11  ;;  %v4867_v31 = vadd.f32 %v11432_v43, %v4866_v28  ;;  %v7755_v50 = vpop.f32.mrb[161].mxu1  ;;  %v8005_v28 = vld [vmem:[%s12305_s2 + $0x2f8] sm:$0xff] }
 0x4f7   :  { %v5158_v24 = vadd.f32 %v7992_v56, %v4867_v31 }
 0x4f8   :  { %v4871_v32 = vpop.f32.mrb[162].mxu1 }
 0x4f9   :  { %5283 = vst.msk [vmem:[%s12308_s9 + $0x298] sm:$0xff] %vm2546_vm2, %v5158_v24  ;;  %v4872_v6 = vadd.f32 %v11432_v43, %v4871_v32  ;;  %v7758_v25 = vpop.f32.mrb[163].mxu1  ;;  %v8006_v32 = vld [vmem:[%s12305_s2 + $0x300] sm:$0xff] }
 0x4fb   :  { %v5159_v47 = vadd.f32 %v7993_v51, %v4872_v6 }
 0x4fc   :  { %v4876_v21 = vpop.f32.mrb[164].mxu1 }
 0x4fd   :  { %5284 = vst.msk [vmem:[%s12308_s9 + $0x2a0] sm:$0xff] %vm2546_vm2, %v5159_v47  ;;  %v4877_v22 = vadd.f32 %v11432_v43, %v4876_v21  ;;  %v7761_v42 = vpop.f32.mrb[165].mxu1  ;;  %v8007_v21 = vld [vmem:[%s12305_s2 + $0x308] sm:$0xff] }
 0x4ff   :  { %v5160_v3 = vadd.f32 %v7994_v16, %v4877_v22 }
 0x500   :  { %v4881_v13 = vpop.f32.mrb[166].mxu1 }
 0x501   :  { %5285 = vst.msk [vmem:[%s12308_s9 + $0x2a8] sm:$0xff] %vm2546_vm2, %v5160_v3  ;;  %v4882_v62 = vadd.f32 %v11432_v43, %v4881_v13  ;;  %v7764_v52 = vpop.f32.mrb[167].mxu1  ;;  %v8008_v13 = vld [vmem:[%s12305_s2 + $0x310] sm:$0xff] }
 0x503   :  { %v5161_v61 = vadd.f32 %v7995_v34, %v4882_v62 }
 0x504   :  { %v4886_v33 = vpop.f32.mrb[168].mxu1 }
 0x505   :  { %5286 = vst.msk [vmem:[%s12308_s9 + $0x2b0] sm:$0xff] %vm2546_vm2, %v5161_v61  ;;  %v4887_v19 = vadd.f32 %v11432_v43, %v4886_v33  ;;  %v7767_v20 = vpop.f32.mrb[169].mxu1  ;;  %v8009_v33 = vld [vmem:[%s12305_s2 + $0x318] sm:$0xff] }
 0x507   :  { %v5162_v37 = vadd.f32 %v7996_v9, %v4887_v19 }
 0x508   :  { %v4891_v58 = vpop.f32.mrb[170].mxu1 }
 0x509   :  { %5287 = vst.msk [vmem:[%s12308_s9 + $0x2b8] sm:$0xff] %vm2546_vm2, %v5162_v37  ;;  %v4892_v14 = vadd.f32 %v11432_v43, %v4891_v58  ;;  %v7770_v8 = vpop.f32.mrb[171].mxu1  ;;  %v8010_v58 = vld [vmem:[%s12305_s2 + $0x320] sm:$0xff] }
 0x50b   :  { %v5163_v46 = vadd.f32 %v7997_v38, %v4892_v14 }
 0x50c   :  { %v4896_v45 = vpop.f32.mrb[172].mxu1 }
 0x50d   :  { %5288 = vst.msk [vmem:[%s12308_s9 + $0x2c0] sm:$0xff] %vm2546_vm2, %v5163_v46  ;;  %v4897_v60 = vadd.f32 %v11432_v43, %v4896_v45  ;;  %v7773_v49 = vpop.f32.mrb[173].mxu1  ;;  %v8011_v45 = vld [vmem:[%s12305_s2 + $0x328] sm:$0xff] }
 0x50f   :  { %v5164_v29 = vadd.f32 %v7998_v59, %v4897_v60 }
 0x510   :  { %v4901_v55 = vpop.f32.mrb[174].mxu1 }
 0x511   :  { %5289 = vst.msk [vmem:[%s12308_s9 + $0x2c8] sm:$0xff] %vm2546_vm2, %v5164_v29  ;;  %v4902_v27 = vadd.f32 %v11432_v43, %v4901_v55  ;;  %v7776_v23 = vpop.f32.mrb[175].mxu1  ;;  %v8012_v55 = vld [vmem:[%s12305_s2 + $0x330] sm:$0xff] }
 0x513   :  { %v5165_v54 = vadd.f32 %v7999_v0, %v4902_v27 }
 0x514   :  { %v4906_v17 = vpop.f32.mrb[176].mxu1 }
 0x515   :  { %5290 = vst.msk [vmem:[%s12308_s9 + $0x2d0] sm:$0xff] %vm2546_vm2, %v5165_v54  ;;  %v4907_v41 = vadd.f32 %v11432_v43, %v4906_v17  ;;  %v7779_v36 = vpop.f32.mrb[177].mxu1  ;;  %v8013_v17 = vld [vmem:[%s12305_s2 + $0x338] sm:$0xff] }
 0x517   :  { %v5166_v7 = vadd.f32 %v8000_v48, %v4907_v41 }
 0x518   :  { %v4911_v2 = vpop.f32.mrb[178].mxu1 }
 0x519   :  { %5291 = vst.msk [vmem:[%s12308_s9 + $0x2d8] sm:$0xff] %vm2546_vm2, %v5166_v7  ;;  %v4912_v4 = vadd.f32 %v11432_v43, %v4911_v2  ;;  %v7782_v39 = vpop.f32.mrb[179].mxu1  ;;  %v8014_v2 = vld [vmem:[%s12305_s2 + $0x340] sm:$0xff] }
 0x51b   :  { %v5167_v57 = vadd.f32 %v8001_v44, %v4912_v4 }
 0x51c   :  { %v4916_v35 = vpop.f32.mrb[180].mxu1 }
 0x51d   :  { %5292 = vst.msk [vmem:[%s12308_s9 + $0x2e0] sm:$0xff] %vm2546_vm2, %v5167_v57  ;;  %v4917_v63 = vadd.f32 %v11432_v43, %v4916_v35  ;;  %v7785_v5 = vpop.f32.mrb[181].mxu1  ;;  %v8015_v35 = vld [vmem:[%s12305_s2 + $0x348] sm:$0xff] }
 0x51f   :  { %v5168_v53 = vadd.f32 %v8002_v1, %v4917_v63 }
 0x520   :  { %v4921_v18 = vpop.f32.mrb[182].mxu1 }
 0x521   :  { %5293 = vst.msk [vmem:[%s12308_s9 + $0x2e8] sm:$0xff] %vm2546_vm2, %v5168_v53  ;;  %v4922_v10 = vadd.f32 %v11432_v43, %v4921_v18  ;;  %v7788_v15 = vpop.f32.mrb[183].mxu1  ;;  %v8016_v18 = vld [vmem:[%s12305_s2 + $0x350] sm:$0xff] }
 0x523   :  { %v5169_v26 = vadd.f32 %v8003_v40, %v4922_v10 }
 0x524   :  { %v4926_v30 = vpop.f32.mrb[184].mxu1 }
 0x525   :  { %5294 = vst.msk [vmem:[%s12308_s9 + $0x2f0] sm:$0xff] %vm2546_vm2, %v5169_v26  ;;  %v4927_v11 = vadd.f32 %v12057_v12, %v4926_v30  ;;  %v7791_v43 = vpop.f32.mrb[185].mxu1  ;;  %v8017_v30 = vld [vmem:[%s12305_s2 + $0x358] sm:$0xff] }
 0x527   :  { %v5170_v31 = vadd.f32 %v8005_v28, %v4927_v11 }
 0x528   :  { %v4931_v50 = vpop.f32.mrb[186].mxu1 }
 0x529   :  { %5295 = vst.msk [vmem:[%s12308_s9 + $0x2f8] sm:$0xff] %vm2546_vm2, %v5170_v31  ;;  %v4932_v56 = vadd.f32 %v12057_v12, %v4931_v50  ;;  %v7794_v24 = vpop.f32.mrb[187].mxu1  ;;  %v8018_v50 = vld [vmem:[%s12305_s2 + $0x360] sm:$0xff] }
 0x52b   :  { %v5171_v6 = vadd.f32 %v8006_v32, %v4932_v56 }
 0x52c   :  { %v4936_v25 = vpop.f32.mrb[188].mxu1 }
 0x52d   :  { %5296 = vst.msk [vmem:[%s12308_s9 + $0x300] sm:$0xff] %vm2546_vm2, %v5171_v6  ;;  %v4937_v51 = vadd.f32 %v12057_v12, %v4936_v25  ;;  %v7797_v47 = vpop.f32.mrb[189].mxu1  ;;  %v8019_v25 = vld [vmem:[%s12305_s2 + $0x368] sm:$0xff] }
 0x52f   :  { %v5172_v22 = vadd.f32 %v8007_v21, %v4937_v51 }
 0x530   :  { %v4941_v42 = vpop.f32.mrb[190].mxu1 }
 0x531   :  { %5297 = vst.msk [vmem:[%s12308_s9 + $0x308] sm:$0xff] %vm2546_vm2, %v5172_v22  ;;  %v4942_v16 = vadd.f32 %v12057_v12, %v4941_v42  ;;  %v7800_v3 = vpop.f32.mrb[191].mxu1  ;;  %v8020_v42 = vld [vmem:[%s12305_s2 + $0x370] sm:$0xff] }
 0x533   :  { %v5173_v62 = vadd.f32 %v8008_v13, %v4942_v16 }
 0x534   :  { %v4946_v52 = vpop.f32.mrb[192].mxu1 }
 0x535   :  { %5298 = vst.msk [vmem:[%s12308_s9 + $0x310] sm:$0xff] %vm2546_vm2, %v5173_v62  ;;  %v4947_v34 = vadd.f32 %v12057_v12, %v4946_v52  ;;  %v7803_v61 = vpop.f32.mrb[193].mxu1  ;;  %v8021_v52 = vld [vmem:[%s12305_s2 + $0x378] sm:$0xff] }
 0x537   :  { %v5174_v19 = vadd.f32 %v8009_v33, %v4947_v34 }
 0x538   :  { %v4951_v20 = vpop.f32.mrb[194].mxu1 }
 0x539   :  { %5299 = vst.msk [vmem:[%s12308_s9 + $0x318] sm:$0xff] %vm2546_vm2, %v5174_v19  ;;  %v4952_v9 = vadd.f32 %v12057_v12, %v4951_v20  ;;  %v7806_v37 = vpop.f32.mrb[195].mxu1  ;;  %v8022_v20 = vld [vmem:[%s12305_s2 + $0x380] sm:$0xff] }
 0x53b   :  { %v5175_v14 = vadd.f32 %v8010_v58, %v4952_v9 }
 0x53c   :  { %v4956_v8 = vpop.f32.mrb[196].mxu1 }
 0x53d   :  { %5300 = vst.msk [vmem:[%s12308_s9 + $0x320] sm:$0xff] %vm2546_vm2, %v5175_v14  ;;  %v4957_v38 = vadd.f32 %v12057_v12, %v4956_v8  ;;  %v7809_v46 = vpop.f32.mrb[197].mxu1  ;;  %v8023_v8 = vld [vmem:[%s12305_s2 + $0x388] sm:$0xff] }
 0x53f   :  { %v5176_v60 = vadd.f32 %v8011_v45, %v4957_v38 }
 0x540   :  { %v4961_v49 = vpop.f32.mrb[198].mxu1 }
 0x541   :  { %5301 = vst.msk [vmem:[%s12308_s9 + $0x328] sm:$0xff] %vm2546_vm2, %v5176_v60  ;;  %v4962_v59 = vadd.f32 %v12057_v12, %v4961_v49  ;;  %v7812_v29 = vpop.f32.mrb[199].mxu1  ;;  %v8024_v49 = vld [vmem:[%s12305_s2 + $0x390] sm:$0xff] }
 0x543   :  { %v5177_v27 = vadd.f32 %v8012_v55, %v4962_v59 }
 0x544   :  { %v4966_v23 = vpop.f32.mrb[200].mxu1 }
 0x545   :  { %5302 = vst.msk [vmem:[%s12308_s9 + $0x330] sm:$0xff] %vm2546_vm2, %v5177_v27  ;;  %v4967_v0 = vadd.f32 %v12057_v12, %v4966_v23  ;;  %v7815_v54 = vpop.f32.mrb[201].mxu1  ;;  %v8025_v23 = vld [vmem:[%s12305_s2 + $0x398] sm:$0xff] }
 0x547   :  { %v5178_v41 = vadd.f32 %v8013_v17, %v4967_v0 }
 0x548   :  { %v4971_v36 = vpop.f32.mrb[202].mxu1 }
 0x549   :  { %5303 = vst.msk [vmem:[%s12308_s9 + $0x338] sm:$0xff] %vm2546_vm2, %v5178_v41  ;;  %v4972_v48 = vadd.f32 %v12057_v12, %v4971_v36  ;;  %v7818_v7 = vpop.f32.mrb[203].mxu1  ;;  %v8026_v36 = vld [vmem:[%s12305_s2 + $0x3a0] sm:$0xff] }
 0x54b   :  { %v5179_v4 = vadd.f32 %v8014_v2, %v4972_v48 }
 0x54c   :  { %v4976_v39 = vpop.f32.mrb[204].mxu1 }
 0x54d   :  { %5304 = vst.msk [vmem:[%s12308_s9 + $0x340] sm:$0xff] %vm2546_vm2, %v5179_v4  ;;  %v4977_v44 = vadd.f32 %v12057_v12, %v4976_v39  ;;  %v7821_v57 = vpop.f32.mrb[205].mxu1  ;;  %v8027_v39 = vld [vmem:[%s12305_s2 + $0x3a8] sm:$0xff] }
 0x54f   :  { %v5180_v63 = vadd.f32 %v8015_v35, %v4977_v44 }
 0x550   :  { %v4981_v5 = vpop.f32.mrb[206].mxu1 }
 0x551   :  { %5305 = vst.msk [vmem:[%s12308_s9 + $0x348] sm:$0xff] %vm2546_vm2, %v5180_v63  ;;  %v4982_v1 = vadd.f32 %v12057_v12, %v4981_v5  ;;  %v7824_v53 = vpop.f32.mrb[207].mxu1  ;;  %v8028_v5 = vld [vmem:[%s12305_s2 + $0x3b0] sm:$0xff] }
 0x553   :  { %v5181_v10 = vadd.f32 %v8016_v18, %v4982_v1 }
 0x554   :  { %v4986_v15 = vpop.f32.mrb[208].mxu1 }
 0x555   :  { %5306 = vst.msk [vmem:[%s12308_s9 + $0x350] sm:$0xff] %vm2546_vm2, %v5181_v10  ;;  %v4987_v40 = vadd.f32 %v12057_v12, %v4986_v15  ;;  %v7827_v26 = vpop.f32.mrb[209].mxu1  ;;  %v8029_v15 = vld [vmem:[%s12305_s2 + $0x3b8] sm:$0xff] }
 0x557   :  { %v5182_v11 = vadd.f32 %v8017_v30, %v4987_v40 }
 0x558   :  { %v4991_v43 = vpop.f32.mrb[210].mxu1 }
 0x559   :  { %5307 = vst.msk [vmem:[%s12308_s9 + $0x358] sm:$0xff] %vm2546_vm2, %v5182_v11  ;;  %v4992_v28 = vadd.f32 %v12057_v12, %v4991_v43  ;;  %v7830_v31 = vpop.f32.mrb[211].mxu1  ;;  %v8030_v43 = vld [vmem:[%s12305_s2 + $0x3c0] sm:$0xff] }
 0x55b   :  { %v5183_v56 = vadd.f32 %v8018_v50, %v4992_v28 }
 0x55c   :  { %v4996_v24 = vpop.f32.mrb[212].mxu1 }
 0x55d   :  { %5308 = vst.msk [vmem:[%s12308_s9 + $0x360] sm:$0xff] %vm2546_vm2, %v5183_v56  ;;  %v4997_v32 = vadd.f32 %v12057_v12, %v4996_v24  ;;  %v7833_v6 = vpop.f32.mrb[213].mxu1  ;;  %v8031_v24 = vld [vmem:[%s12305_s2 + $0x3c8] sm:$0xff] }
 0x55f   :  { %v5184_v51 = vadd.f32 %v8019_v25, %v4997_v32 }
 0x560   :  { %v5001_v47 = vpop.f32.mrb[214].mxu1 }
 0x561   :  { %5309 = vst.msk [vmem:[%s12308_s9 + $0x368] sm:$0xff] %vm2546_vm2, %v5184_v51  ;;  %v5002_v21 = vadd.f32 %v12057_v12, %v5001_v47  ;;  %v7836_v22 = vpop.f32.mrb[215].mxu1  ;;  %v8032_v47 = vld [vmem:[%s12305_s2 + $0x3d0] sm:$0xff] }
 0x563   :  { %v5185_v16 = vadd.f32 %v8020_v42, %v5002_v21 }
 0x564   :  { %v5006_v3 = vpop.f32.mrb[216].mxu1 }
 0x565   :  { %5310 = vst.msk [vmem:[%s12308_s9 + $0x370] sm:$0xff] %vm2546_vm2, %v5185_v16  ;;  %v5007_v13 = vadd.f32 %v12057_v12, %v5006_v3  ;;  %v7839_v62 = vpop.f32.mrb[217].mxu1  ;;  %v8033_v3 = vld [vmem:[%s12305_s2 + $0x3d8] sm:$0xff] }
 0x567   :  { %v5186_v34 = vadd.f32 %v8021_v52, %v5007_v13 }
 0x568   :  { %v5011_v61 = vpop.f32.mrb[218].mxu1 }
 0x569   :  { %5311 = vst.msk [vmem:[%s12308_s9 + $0x378] sm:$0xff] %vm2546_vm2, %v5186_v34  ;;  %v5012_v33 = vadd.f32 %v12057_v12, %v5011_v61  ;;  %v7842_v19 = vpop.f32.mrb[219].mxu1  ;;  %v8034_v61 = vld [vmem:[%s12305_s2 + $0x3e0] sm:$0xff] }
 0x56b   :  { %v5187_v9 = vadd.f32 %v8022_v20, %v5012_v33 }
 0x56c   :  { %v5016_v37 = vpop.f32.mrb[220].mxu1 }
 0x56d   :  { %5312 = vst.msk [vmem:[%s12308_s9 + $0x380] sm:$0xff] %vm2546_vm2, %v5187_v9  ;;  %v5017_v58 = vadd.f32 %v12057_v12, %v5016_v37  ;;  %v7845_v14 = vpop.f32.mrb[221].mxu1 }
 0x56f   :  { %v5188_v38 = vadd.f32 %v8023_v8, %v5017_v58 }
 0x570   :  { %v5021_v46 = vpop.f32.mrb[222].mxu1 }
 0x571   :  { %5313 = vst.msk [vmem:[%s12308_s9 + $0x388] sm:$0xff] %vm2546_vm2, %v5188_v38  ;;  %v5022_v45 = vadd.f32 %v12057_v12, %v5021_v46  ;;  %v7848_v60 = vpop.f32.mrb[223].mxu1 }
 0x573   :  { %v5189_v59 = vadd.f32 %v8024_v49, %v5022_v45 }
 0x574   :  { %v5026_v29 = vpop.f32.mrb[224].mxu1 }
 0x575   :  { %5314 = vst.msk [vmem:[%s12308_s9 + $0x390] sm:$0xff] %vm2546_vm2, %v5189_v59  ;;  %v5027_v55 = vadd.f32 %v12057_v12, %v5026_v29  ;;  %v7851_v27 = vpop.f32.mrb[225].mxu1 }
 0x577   :  { %v5190_v0 = vadd.f32 %v8025_v23, %v5027_v55 }
 0x578   :  { %v5031_v54 = vpop.f32.mrb[226].mxu1 }
 0x579   :  { %5315 = vst.msk [vmem:[%s12308_s9 + $0x398] sm:$0xff] %vm2546_vm2, %v5190_v0  ;;  %v5032_v17 = vadd.f32 %v12057_v12, %v5031_v54  ;;  %v7854_v41 = vpop.f32.mrb[227].mxu1 }
 0x57b   :  { %v5191_v48 = vadd.f32 %v8026_v36, %v5032_v17 }
 0x57c   :  { %v5036_v7 = vpop.f32.mrb[228].mxu1 }
 0x57d   :  { %5316 = vst.msk [vmem:[%s12308_s9 + $0x3a0] sm:$0xff] %vm2546_vm2, %v5191_v48  ;;  %v5037_v2 = vadd.f32 %v12057_v12, %v5036_v7  ;;  %v7857_v4 = vpop.f32.mrb[229].mxu1 }
 0x57f   :  { %v5192_v44 = vadd.f32 %v8027_v39, %v5037_v2 }
 0x580   :  { %v5041_v57 = vpop.f32.mrb[230].mxu1 }
 0x581   :  { %5317 = vst.msk [vmem:[%s12308_s9 + $0x3a8] sm:$0xff] %vm2546_vm2, %v5192_v44  ;;  %v5042_v35 = vadd.f32 %v12057_v12, %v5041_v57  ;;  %v7860_v63 = vpop.f32.mrb[231].mxu1 }
 0x583   :  { %v5193_v1 = vadd.f32 %v8028_v5, %v5042_v35 }
 0x584   :  { %v5046_v53 = vpop.f32.mrb[232].mxu1 }
 0x585   :  { %5318 = vst.msk [vmem:[%s12308_s9 + $0x3b0] sm:$0xff] %vm2546_vm2, %v5193_v1  ;;  %v5047_v18 = vadd.f32 %v12057_v12, %v5046_v53  ;;  %v7863_v10 = vpop.f32.mrb[233].mxu1 }
 0x587   :  { %v5194_v40 = vadd.f32 %v8029_v15, %v5047_v18 }
 0x588   :  { %v5051_v26 = vpop.f32.mrb[234].mxu1 }
 0x589   :  { %5319 = vst.msk [vmem:[%s12308_s9 + $0x3b8] sm:$0xff] %vm2546_vm2, %v5194_v40  ;;  %v5052_v30 = vadd.f32 %v12057_v12, %v5051_v26  ;;  %v7866_v11 = vpop.f32.mrb[235].mxu1 }
 0x58b   :  { %v5195_v28 = vadd.f32 %v8030_v43, %v5052_v30 }
 0x58c   :  { %v5056_v31 = vpop.f32.mrb[236].mxu1 }
 0x58d   :  { %5320 = vst.msk [vmem:[%s12308_s9 + $0x3c0] sm:$0xff] %vm2546_vm2, %v5195_v28  ;;  %v5057_v50 = vadd.f32 %v12057_v12, %v5056_v31  ;;  %v7869_v56 = vpop.f32.mrb[237].mxu1 }
 0x58f   :  { %v5196_v32 = vadd.f32 %v8031_v24, %v5057_v50 }
 0x590   :  { %v5061_v6 = vpop.f32.mrb[238].mxu1 }
 0x591   :  { %5321 = vst.msk [vmem:[%s12308_s9 + $0x3c8] sm:$0xff] %vm2546_vm2, %v5196_v32  ;;  %v5062_v25 = vadd.f32 %v12057_v12, %v5061_v6  ;;  %v7872_v51 = vpop.f32.mrb[239].mxu1 }
 0x593   :  { %v5197_v21 = vadd.f32 %v8032_v47, %v5062_v25 }
 0x594   :  { %v5066_v22 = vpop.f32.mrb[240].mxu1 }
 0x595   :  { %5322 = vst.msk [vmem:[%s12308_s9 + $0x3d0] sm:$0xff] %vm2546_vm2, %v5197_v21  ;;  %v5067_v42 = vadd.f32 %v12057_v12, %v5066_v22  ;;  %v7875_v16 = vpop.f32.mrb[241].mxu1 }
 0x597   :  { %v5198_v13 = vadd.f32 %v8033_v3, %v5067_v42 }
 0x598   :  { %v5071_v62 = vpop.f32.mrb[242].mxu1 }
 0x599   :  { %5323 = vst.msk [vmem:[%s12308_s9 + $0x3d8] sm:$0xff] %vm2546_vm2, %v5198_v13  ;;  %v5072_v52 = vadd.f32 %v12057_v12, %v5071_v62  ;;  %v7878_v34 = vpop.f32.mrb[243].mxu1 }
 0x59b   :  { %v5199_v33 = vadd.f32 %v8034_v61, %v5072_v52 }
 0x59d   :  { %5324 = vst.msk [vmem:[%s12308_s9 + $0x3e0] sm:$0xff] %vm2546_vm2, %v5199_v33 }

</bundles_post_ra>
